<compile_context>
chip_gen: v5e
topology: v5e:2x2
jax: 0.10.0
libtpu: 0.0.40
codegen_flags: <defaults>
</compile_context>

<pallas_src>
import math

import jax
import jax.numpy as jnp
from jax.experimental import pallas as pl
from jax.experimental.pallas import tpu as pltpu

LANE = 128


def _rnd(x, m):
    return (x + m - 1) // m * m


def _rowvec(v, n):
    out = jnp.zeros((1, n), jnp.float32)
    return out.at[0, : v.shape[0]].set(v.astype(jnp.float32))


def _mxu_lane_multiple():
    # v6e/v7x MXUs are 2x256x256: pad real channel counts > 128 to 256 there.
    try:
        kind = jax.devices()[0].device_kind.lower()
    except Exception:
        return LANE
    return 256 if ("v6" in kind or "v7" in kind) else LANE


def _round_ch(c):
    if c <= LANE:
        return LANE
    return _rnd(c, _mxu_lane_multiple())


def _pick_tm(r_out):
    # Output-row tile: >=2 grid steps where possible (v7x has 2 TensorCores), 256 at
    # size keeps the output lane-dense and feeds the 256-wide MXUs on v6e/v7x.
    if r_out >= 512:
        return 256
    if r_out > 128:
        return 128
    return max(16, _rnd(r_out, 16))


# ---------------------------------------------------------------------------
# Fused 3x3 conv kernel: 9 shifted-window bf16 MXU matmuls + f32 epilogue.
# ---------------------------------------------------------------------------
def _make_conv_kernel(n_phase, tap_phase, tap_off, tm, has_affine, do_relu,
                      want_short, has_add, out_dtype):
    def kernel(*refs):
        x_refs = refs[:n_phase]
        idx = n_phase
        w_ref = refs[idx]
        idx += 1
        if has_affine:
            s_ref, b_ref = refs[idx], refs[idx + 1]
            idx += 2
        if has_add:
            add_ref = refs[idx]
            idx += 1
        o_ref = refs[idx]
        idx += 1
        if want_short:
            short_ref = refs[idx]
            idx += 1
        acc_ref = refs[idx]

        # 9-tap loop == K tiling: accumulate straight into the f32 VMEM accumulator
        # (ref accumulation lets Mosaic keep the running sum in the MXU result RAM on
        # v7x; first tap assigns so there is no extra zero-fill store).
        for t in range(9):
            a = x_refs[tap_phase[t]][pl.ds(tap_off[t], tm), :]      # bf16, static offset
            d = jnp.dot(a, w_ref[t], preferred_element_type=jnp.float32)
            if t == 0:
                acc_ref[...] = d
            else:
                acc_ref[...] += d

        y = acc_ref[...]
        if has_affine:                       # fused BN2 epilogue (conv1 only)
            y = y * s_ref[...] + b_ref[...]
        if want_short:                       # raw (no-ReLU) columns carry the 1x1 shortcut
            short_ref[...] = y
        if do_relu:
            y = jnp.maximum(y, 0.0)
        if has_add:                          # fused residual add (conv2 only)
            y = y + add_ref[...]
        o_ref[...] = y.astype(out_dtype)

    return kernel


def fused_conv3x3(act, taps_w, stride, *, post_scale=None, post_bias=None,
                  relu=False, want_short=False, add=None, out_dtype=jnp.float32):
    """Fused 3x3 'same' conv (stride 1 or 2) on a pre-activated NHWC operand.

    taps_w      : (9, Kp, Np) bf16 per-tap weights (tap order kh*3+kw); extra output
                  columns on the centre tap may carry a fused 1x1 shortcut conv.
    post_*      : optional (1, Np) epilogue scale/bias; `relu` applies the epilogue ReLU.
    want_short  : also return the raw (pre-ReLU) f32 epilogue value (shortcut columns).
    add         : optional (N, Ho, Wo, Ca) residual added to the first Ca output columns.
    Returns (N, Ho, Wo, Np) in out_dtype (and the raw f32 slab if want_short).
    """
    n, h, w, c = act.shape
    s = stride
    ho = (h - 1) // s + 1
    wo = (w - 1) // s + 1
    kp, np_ = taps_w.shape[1], taps_w.shape[2]
    has_affine = post_scale is not None
    has_add = add is not None

    # --- bf16 phase slabs with the spatial zero border built in (operand is already
    #     pre-activated, so the border really is zero: no mask slab, no prologue). ---
    hp, wp = _rnd(h + 2, s), _rnd(w + 2, s)
    xp = jnp.pad(act.astype(jnp.bfloat16),
                 ((0, 0), (1, hp - h - 1), (1, wp - w - 1), (0, kp - c)))
    hg, wg = hp // s, wp // s

    tap_phase, tap_off = [], []
    for kh in range(3):
        for kw in range(3):
            tap_phase.append((kh % s) * s + (kw % s))
            tap_off.append((kh // s) * wg + (kw // s))
    halo_pad = _rnd(max(tap_off), 16)

    r_out = n * hg * wg
    tm = _pick_tm(r_out)
    nt = int(pl.cdiv(r_out, tm))
    r_pad = nt * tm
    win = tm + halo_pad                      # rows one grid step needs (tile + tap halo)
    r_in = r_pad + halo_pad

    # Pre-window the rows so each grid step is one plain Blocked block: windows overlap
    # only by the small halo and BlockSpec pipelining streams/double-buffers them
    # (VMEM per step is O(win*kp), independent of N*H*W).
    widx = (jnp.arange(nt, dtype=jnp.int32) * tm)[:, None] \
        + jnp.arange(win, dtype=jnp.int32)[None, :]
    x_phases = []
    for ph in range(s):
        for pw in range(s):
            p2 = xp[:, ph::s, pw::s, :].reshape(r_out, kp)
            p2 = jnp.pad(p2, ((0, r_in - r_out), (0, 0)))
            x_phases.append(p2[widx])        # (nt, win, kp) bf16

    n_phase = len(x_phases)
    inputs = list(x_phases) + [taps_w]
    in_specs = [pl.BlockSpec((None, win, kp), lambda i: (i, 0, 0))
                for _ in range(n_phase)]
    in_specs.append(pl.BlockSpec((9, kp, np_), lambda i: (0, 0, 0)))  # grid-invariant
    if has_affine:
        inputs += [post_scale, post_bias]
        in_specs += [pl.BlockSpec((1, np_), lambda i: (0, 0)) for _ in range(2)]
    if has_add:
        ca = add.shape[-1]
        add_slab = jnp.zeros((n, hg, wg, np_), jnp.float32)
        add_slab = add_slab.at[:, :ho, :wo, :ca].set(add.astype(jnp.float32))
        add_slab = add_slab.reshape(r_out, np_)
        add_slab = jnp.pad(add_slab, ((0, r_pad - r_out), (0, 0)))
        inputs.append(add_slab)
        in_specs.append(pl.BlockSpec((tm, np_), lambda i: (i, 0)))

    if want_short:
        out_shape = (jax.ShapeDtypeStruct((r_pad, np_), out_dtype),
                     jax.ShapeDtypeStruct((r_pad, np_), jnp.float32))
        out_specs = (pl.BlockSpec((tm, np_), lambda i: (i, 0)),
                     pl.BlockSpec((tm, np_), lambda i: (i, 0)))
        out_list = list(out_shape)
    else:
        out_shape = jax.ShapeDtypeStruct((r_pad, np_), out_dtype)
        out_specs = pl.BlockSpec((tm, np_), lambda i: (i, 0))
        out_list = [out_shape]

    kernel = _make_conv_kernel(n_phase, tuple(tap_phase), tuple(tap_off), tm,
                               has_affine, relu, want_short, has_add, out_dtype)

    # VMEM budget: double-buffered streamed blocks + resident weights/scales + f32 acc;
    # clamped below v7x's 64 MiB physical VMEM.
    blk = n_phase * win * kp * 2 + (tm * np_ * 4 if has_add else 0)
    blk += sum(tm * np_ * jnp.dtype(o.dtype).itemsize for o in out_list)
    inv = 9 * kp * np_ * 2 + (2 * np_ * 4 if has_affine else 0)
    est = 2 * (blk + inv) + tm * np_ * 4
    vmem_limit = int(min(48 * 1024 * 1024, max(32 * 1024 * 1024, 2 * est)))

    bytes_acc = sum(math.prod(a.shape) * a.dtype.itemsize for a in inputs)
    bytes_acc += sum(math.prod(o.shape) * jnp.dtype(o.dtype).itemsize for o in out_list)

    result = pl.pallas_call(
        kernel,
        out_shape=out_shape,
        grid=(nt,),
        in_specs=in_specs,
        out_specs=out_specs,
        scratch_shapes=[pltpu.VMEM((tm, np_), jnp.float32)],
        compiler_params=pltpu.CompilerParams(
            dimension_semantics=("parallel",),
            vmem_limit_bytes=vmem_limit),
        cost_estimate=pl.CostEstimate(
            flops=2 * 9 * r_pad * kp * np_,
            transcendentals=0,
            bytes_accessed=int(bytes_acc)),
    )(*inputs)

    def _unslab(o):
        return o[:r_out].reshape(n, hg, wg, np_)[:, :ho, :wo, :]

    if want_short:
        o_act, o_raw = result
        return _unslab(o_act), _unslab(o_raw)
    return _unslab(result)


# ---------------------------------------------------------------------------
# BasicBlock / NetworkBlock forward
# ---------------------------------------------------------------------------
def basic_block_forward(x, p, stride):
    n, h, w, cin = x.shape
    cout = p["conv1_w"].shape[-1]
    equal = (cin == cout)
    if equal:
        # Identity shortcut only matches shapes when the spatial size is preserved.
        assert stride == 1, "identity shortcut requires stride == 1 when cin == cout"

    kp1 = _round_ch(cin)
    ncols1 = cout if equal else 2 * cout        # extra columns = fused 1x1 shortcut conv
    np1 = _round_ch(ncols1)

    w1 = jnp.zeros((9, kp1, np1), jnp.float32)
    w1 = w1.at[:, :cin, :cout].set(p["conv1_w"].reshape(9, cin, cout))
    if not equal:
        w1 = w1.at[4, :cin, cout:2 * cout].set(p["short_w"])   # centre tap == 1x1 conv
    w1 = w1.astype(jnp.bfloat16)

    # BN2 folded into conv1's epilogue; shortcut columns stay raw (scale 1, bias 0).
    post_s = _rowvec(p["bn2_scale"], np1)
    post_b = _rowvec(p["bn2_bias"], np1)
    if not equal:
        post_s = post_s.at[0, cout:2 * cout].set(1.0)

    # BN1 + ReLU pre-activation applied once here: it fuses into the slab layout pass,
    # keeps the conv's zero border exact, and removes the per-tap in-kernel prologue.
    act1 = jnp.maximum(x * p["bn1_scale"] + p["bn1_bias"], 0.0)

    if equal:
        out1 = fused_conv3x3(act1, w1, stride, post_scale=post_s, post_bias=post_b,
                             relu=True, out_dtype=jnp.bfloat16)
        short = x                                   # identity shortcut (stride == 1)
    else:
        out1, raw1 = fused_conv3x3(act1, w1, stride, post_scale=post_s, post_bias=post_b,
                                   relu=True, want_short=True, out_dtype=jnp.bfloat16)
        short = raw1[..., cout:2 * cout]            # fused 1x1 shortcut conv, f32

    # conv2 consumes conv1's bf16, already-lane-padded activation directly: its padded
    # weight input-channels are zero, so any extra lanes are inert.  Epilogue = residual.
    kp2 = _round_ch(cout)
    act2 = out1[..., :kp2]
    np2 = _round_ch(cout)
    w2 = jnp.zeros((9, kp2, np2), jnp.float32)
    w2 = w2.at[:, :cout, :cout].set(p["conv2_w"].reshape(9, cout, cout))
    w2 = w2.astype(jnp.bfloat16)

    # TODO(synk): dropout (dropRate>0) would be fused between conv1's epilogue and conv2.
    out2 = fused_conv3x3(act2, w2, 1, add=short, out_dtype=jnp.float32)
    return out2[..., :cout]


def network_block_forward(x_nchw, params, strides):
    x = jnp.transpose(x_nchw, (0, 2, 3, 1)).astype(jnp.float32)   # NCHW -> NHWC
    for p, s in zip(params, strides):
        x = basic_block_forward(x, p, s)
    return jnp.transpose(x, (0, 3, 1, 2))                         # back to NCHW


# ---------------------------------------------------------------------------
# Deterministic parameter initialization
# ---------------------------------------------------------------------------
def _bn_params(key, c, eps=1e-5):
    k1, k2, k3, k4 = jax.random.split(key, 4)
    gamma = 1.0 + 0.1 * jax.random.normal(k1, (c,), jnp.float32)
    beta = 0.1 * jax.random.normal(k2, (c,), jnp.float32)
    mean = 0.1 * jax.random.normal(k3, (c,), jnp.float32)
    var = 1.0 + 0.1 * jnp.abs(jax.random.normal(k4, (c,), jnp.float32))
    scale = gamma / jnp.sqrt(var + eps)
    bias = beta - mean * scale
    return scale, bias


def _conv_w(key, kh, kw, cin, cout):
    std = math.sqrt(2.0 / (kh * kw * cout))
    return std * jax.random.normal(key, (kh, kw, cin, cout), jnp.float32)


def init_network_block(key, nb_layers, in_planes, out_planes, stride):
    params, strides = [], []
    for i in range(int(nb_layers)):
        cin = in_planes if i == 0 else out_planes
        st = stride if i == 0 else 1
        key, k1, k2, k3, k4, k5 = jax.random.split(key, 6)
        bn1_s, bn1_b = _bn_params(k1, cin)
        bn2_s, bn2_b = _bn_params(k2, out_planes)
        p = {"bn1_scale": bn1_s, "bn1_bias": bn1_b,
             "conv1_w": _conv_w(k3, 3, 3, cin, out_planes),
             "bn2_scale": bn2_s, "bn2_bias": bn2_b,
             "conv2_w": _conv_w(k4, 3, 3, out_planes, out_planes)}
        if cin != out_planes:
            p["short_w"] = _conv_w(k5, 1, 1, cin, out_planes).reshape(cin, out_planes)
        params.append(p)
        strides.append(st)
    return params, tuple(strides)


# ---------------------------------------------------------------------------
# Pure-JAX reference (bf16 matmul operands, f32 accumulation — mirrors kernel)
# ---------------------------------------------------------------------------
def _ref_conv3x3(x, w, stride):
    return jax.lax.conv_general_dilated(
        x.astype(jnp.bfloat16), w.astype(jnp.bfloat16), (stride, stride),
        ((1, 1), (1, 1)), dimension_numbers=("NHWC", "HWIO", "NHWC"),
        preferred_element_type=jnp.float32)


def _ref_conv1x1(x, w, stride):
    return jax.lax.conv_general_dilated(
        x.astype(jnp.bfloat16), w.reshape(1, 1, *w.shape).astype(jnp.bfloat16),
        (stride, stride), ((0, 0), (0, 0)),
        dimension_numbers=("NHWC", "HWIO", "NHWC"),
        preferred_element_type=jnp.float32)


def reference_forward(x_nchw, params, strides):
    x = jnp.transpose(x_nchw, (0, 2, 3, 1)).astype(jnp.float32)
    for p, s in zip(params, strides):
        cin = x.shape[-1]
        cout = p["conv1_w"].shape[-1]
        act = jnp.maximum(x * p["bn1_scale"] + p["bn1_bias"], 0.0)
        out = _ref_conv3x3(act, p["conv1_w"], s)
        short = x if cin == cout else _ref_conv1x1(act, p["short_w"], s)
        out = jnp.maximum(out * p["bn2_scale"] + p["bn2_bias"], 0.0)
        out = _ref_conv3x3(out, p["conv2_w"], 1)
        x = short + out
    return jnp.transpose(x, (0, 3, 1, 2))


# ---------------------------------------------------------------------------
if __name__ == "__main__":
    key = jax.random.PRNGKey(0)
    kx, kp_ = jax.random.split(key)

    # NetworkBlock(nb_layers=2, in_planes=4, out_planes=8, block=BasicBlock,
    #              stride=2, dropRate=0.0)
    nb_layers, in_planes, out_planes, stride = 2, 4, 8, 2
    x = jax.random.normal(kx, (2, in_planes, 16, 16), jnp.float32)  # NCHW
    params, strides = init_network_block(kp_, nb_layers, in_planes, out_planes, stride)

    fwd = jax.jit(network_block_forward, static_argnums=(2,))
    out = jax.block_until_ready(fwd(x, params, strides))

    ref = jax.block_until_ready(reference_forward(x, params, strides))
    assert out.shape == (2, out_planes, 8, 8), out.shape
    err = float(jnp.max(jnp.abs(out - ref)))
    assert jnp.allclose(out, ref, rtol=3e-2, atol=3e-2), err

    print("KERNEL_OK")
</pallas_src>

<mosaic_0001>
module attributes {stable_mosaic.version = 11 : i64} {
  func.func @kernel(%arg0: i32, %arg1: memref<1x144x128xbf16, #tpu.memory_space<vmem>>, %arg2: memref<1x144x128xbf16, #tpu.memory_space<vmem>>, %arg3: memref<1x144x128xbf16, #tpu.memory_space<vmem>>, %arg4: memref<1x144x128xbf16, #tpu.memory_space<vmem>>, %arg5: memref<9x128x128xbf16, #tpu.memory_space<vmem>>, %arg6: memref<1x128xf32, #tpu.memory_space<vmem>>, %arg7: memref<1x128xf32, #tpu.memory_space<vmem>>, %arg8: memref<128x128xbf16, #tpu.memory_space<vmem>>, %arg9: memref<128x128xf32, #tpu.memory_space<vmem>>, %arg10: memref<128x128xf32, #tpu.memory_space<vmem>>) attributes {dimension_semantics = [#tpu.dimension_semantics<parallel>], iteration_bounds = array<i64: 2>, scalar_prefetch = 0 : i64, scratch_operands = 1 : i64, tpu.core_type = #tpu.core_type<tc>, window_params = [{transform_indices = @transform_0, window_bounds = array<i64: 1, 144, 128>}, {transform_indices = @transform_1, window_bounds = array<i64: 1, 144, 128>}, {transform_indices = @transform_2, window_bounds = array<i64: 1, 144, 128>}, {transform_indices = @transform_3, window_bounds = array<i64: 1, 144, 128>}, {pipeline_mode = #tpu.pipeline_mode<synchronous>, transform_indices = @transform_4, window_bounds = array<i64: 9, 128, 128>}, {pipeline_mode = #tpu.pipeline_mode<synchronous>, transform_indices = @transform_5, window_bounds = array<i64: 1, 128>}, {pipeline_mode = #tpu.pipeline_mode<synchronous>, transform_indices = @transform_6, window_bounds = array<i64: 1, 128>}, {transform_indices = @transform_7, window_bounds = array<i64: 128, 128>}, {transform_indices = @transform_8, window_bounds = array<i64: 128, 128>}]} {
    %c0 = arith.constant 0 : index
    %c0_0 = arith.constant 0 : index
    %c0_1 = arith.constant 0 : index
    %0 = vector.load %arg1[%c0, %c0_0, %c0_1] : memref<1x144x128xbf16, #tpu.memory_space<vmem>>, vector<1x128x128xbf16>
    %1 = vector.shape_cast %0 : vector<1x128x128xbf16> to vector<128x128xbf16>
    %c0_2 = arith.constant 0 : index
    %c0_3 = arith.constant 0 : index
    %c0_4 = arith.constant 0 : index
    %2 = vector.load %arg5[%c0_2, %c0_3, %c0_4] : memref<9x128x128xbf16, #tpu.memory_space<vmem>>, vector<1x128x128xbf16>
    %3 = vector.shape_cast %2 : vector<1x128x128xbf16> to vector<128x128xbf16>
    %cst = arith.constant dense<0.000000e+00> : vector<128x128xf32>
    %4 = tpu.matmul %1, %3, %cst {dimension_numbers = #tpu.dot_dimension_numbers<[1], [0], [0], [1], [0, 0, 1, 1], [], []>} : vector<128x128xbf16>, vector<128x128xbf16>, vector<128x128xf32> -> vector<128x128xf32>
    %c0_5 = arith.constant 0 : index
    %c0_6 = arith.constant 0 : index
    %5 = vector.load %arg10[%c0_5, %c0_6] : memref<128x128xf32, #tpu.memory_space<vmem>>, vector<128x128xf32>
    tpu.vector_store %arg10[%c0_5, %c0_6], %4 {strides = array<i32>} : memref<128x128xf32, #tpu.memory_space<vmem>>, vector<128x128xf32>,
    %c0_7 = arith.constant 0 : index
    %c0_8 = arith.constant 0 : index
    %c0_9 = arith.constant 0 : index
    %6 = vector.load %arg2[%c0_7, %c0_8, %c0_9] : memref<1x144x128xbf16, #tpu.memory_space<vmem>>, vector<1x128x128xbf16>
    %7 = vector.shape_cast %6 : vector<1x128x128xbf16> to vector<128x128xbf16>
    %c1 = arith.constant 1 : index
    %c0_10 = arith.constant 0 : index
    %c0_11 = arith.constant 0 : index
    %8 = vector.load %arg5[%c1, %c0_10, %c0_11] : memref<9x128x128xbf16, #tpu.memory_space<vmem>>, vector<1x128x128xbf16>
    %9 = vector.shape_cast %8 : vector<1x128x128xbf16> to vector<128x128xbf16>
    %cst_12 = arith.constant dense<0.000000e+00> : vector<128x128xf32>
    %10 = tpu.matmul %7, %9, %cst_12 {dimension_numbers = #tpu.dot_dimension_numbers<[1], [0], [0], [1], [0, 0, 1, 1], [], []>} : vector<128x128xbf16>, vector<128x128xbf16>, vector<128x128xf32> -> vector<128x128xf32>
    %c0_13 = arith.constant 0 : index
    %c0_14 = arith.constant 0 : index
    %11 = vector.load %arg10[%c0_13, %c0_14] : memref<128x128xf32, #tpu.memory_space<vmem>>, vector<128x128xf32>
    %12 = arith.addf %11, %10 : vector<128x128xf32>
    %c0_15 = arith.constant 0 : index
    %c0_16 = arith.constant 0 : index
    %13 = vector.load %arg10[%c0_15, %c0_16] : memref<128x128xf32, #tpu.memory_space<vmem>>, vector<128x128xf32>
    tpu.vector_store %arg10[%c0_15, %c0_16], %12 {strides = array<i32>} : memref<128x128xf32, #tpu.memory_space<vmem>>, vector<128x128xf32>,
    %c0_17 = arith.constant 0 : index
    %c1_18 = arith.constant 1 : index
    %c0_19 = arith.constant 0 : index
    %14 = vector.load %arg1[%c0_17, %c1_18, %c0_19] : memref<1x144x128xbf16, #tpu.memory_space<vmem>>, vector<1x128x128xbf16>
    %15 = vector.shape_cast %14 : vector<1x128x128xbf16> to vector<128x128xbf16>
    %c2 = arith.constant 2 : index
    %c0_20 = arith.constant 0 : index
    %c0_21 = arith.constant 0 : index
    %16 = vector.load %arg5[%c2, %c0_20, %c0_21] : memref<9x128x128xbf16, #tpu.memory_space<vmem>>, vector<1x128x128xbf16>
    %17 = vector.shape_cast %16 : vector<1x128x128xbf16> to vector<128x128xbf16>
    %cst_22 = arith.constant dense<0.000000e+00> : vector<128x128xf32>
    %18 = tpu.matmul %15, %17, %cst_22 {dimension_numbers = #tpu.dot_dimension_numbers<[1], [0], [0], [1], [0, 0, 1, 1], [], []>} : vector<128x128xbf16>, vector<128x128xbf16>, vector<128x128xf32> -> vector<128x128xf32>
    %c0_23 = arith.constant 0 : index
    %c0_24 = arith.constant 0 : index
    %19 = vector.load %arg10[%c0_23, %c0_24] : memref<128x128xf32, #tpu.memory_space<vmem>>, vector<128x128xf32>
    %20 = arith.addf %19, %18 : vector<128x128xf32>
    %c0_25 = arith.constant 0 : index
    %c0_26 = arith.constant 0 : index
    %21 = vector.load %arg10[%c0_25, %c0_26] : memref<128x128xf32, #tpu.memory_space<vmem>>, vector<128x128xf32>
    tpu.vector_store %arg10[%c0_25, %c0_26], %20 {strides = array<i32>} : memref<128x128xf32, #tpu.memory_space<vmem>>, vector<128x128xf32>,
    %c0_27 = arith.constant 0 : index
    %c0_28 = arith.constant 0 : index
    %c0_29 = arith.constant 0 : index
    %22 = vector.load %arg3[%c0_27, %c0_28, %c0_29] : memref<1x144x128xbf16, #tpu.memory_space<vmem>>, vector<1x128x128xbf16>
    %23 = vector.shape_cast %22 : vector<1x128x128xbf16> to vector<128x128xbf16>
    %c3 = arith.constant 3 : index
    %c0_30 = arith.constant 0 : index
    %c0_31 = arith.constant 0 : index
    %24 = vector.load %arg5[%c3, %c0_30, %c0_31] : memref<9x128x128xbf16, #tpu.memory_space<vmem>>, vector<1x128x128xbf16>
    %25 = vector.shape_cast %24 : vector<1x128x128xbf16> to vector<128x128xbf16>
    %cst_32 = arith.constant dense<0.000000e+00> : vector<128x128xf32>
    %26 = tpu.matmul %23, %25, %cst_32 {dimension_numbers = #tpu.dot_dimension_numbers<[1], [0], [0], [1], [0, 0, 1, 1], [], []>} : vector<128x128xbf16>, vector<128x128xbf16>, vector<128x128xf32> -> vector<128x128xf32>
    %c0_33 = arith.constant 0 : index
    %c0_34 = arith.constant 0 : index
    %27 = vector.load %arg10[%c0_33, %c0_34] : memref<128x128xf32, #tpu.memory_space<vmem>>, vector<128x128xf32>
    %28 = arith.addf %27, %26 : vector<128x128xf32>
    %c0_35 = arith.constant 0 : index
    %c0_36 = arith.constant 0 : index
    %29 = vector.load %arg10[%c0_35, %c0_36] : memref<128x128xf32, #tpu.memory_space<vmem>>, vector<128x128xf32>
    tpu.vector_store %arg10[%c0_35, %c0_36], %28 {strides = array<i32>} : memref<128x128xf32, #tpu.memory_space<vmem>>, vector<128x128xf32>,
    %c0_37 = arith.constant 0 : index
    %c0_38 = arith.constant 0 : index
    %c0_39 = arith.constant 0 : index
    %30 = vector.load %arg4[%c0_37, %c0_38, %c0_39] : memref<1x144x128xbf16, #tpu.memory_space<vmem>>, vector<1x128x128xbf16>
    %31 = vector.shape_cast %30 : vector<1x128x128xbf16> to vector<128x128xbf16>
    %c4 = arith.constant 4 : index
    %c0_40 = arith.constant 0 : index
    %c0_41 = arith.constant 0 : index
    %32 = vector.load %arg5[%c4, %c0_40, %c0_41] : memref<9x128x128xbf16, #tpu.memory_space<vmem>>, vector<1x128x128xbf16>
    %33 = vector.shape_cast %32 : vector<1x128x128xbf16> to vector<128x128xbf16>
    %cst_42 = arith.constant dense<0.000000e+00> : vector<128x128xf32>
    %34 = tpu.matmul %31, %33, %cst_42 {dimension_numbers = #tpu.dot_dimension_numbers<[1], [0], [0], [1], [0, 0, 1, 1], [], []>} : vector<128x128xbf16>, vector<128x128xbf16>, vector<128x128xf32> -> vector<128x128xf32>
    %c0_43 = arith.constant 0 : index
    %c0_44 = arith.constant 0 : index
    %35 = vector.load %arg10[%c0_43, %c0_44] : memref<128x128xf32, #tpu.memory_space<vmem>>, vector<128x128xf32>
    %36 = arith.addf %35, %34 : vector<128x128xf32>
    %c0_45 = arith.constant 0 : index
    %c0_46 = arith.constant 0 : index
    %37 = vector.load %arg10[%c0_45, %c0_46] : memref<128x128xf32, #tpu.memory_space<vmem>>, vector<128x128xf32>
    tpu.vector_store %arg10[%c0_45, %c0_46], %36 {strides = array<i32>} : memref<128x128xf32, #tpu.memory_space<vmem>>, vector<128x128xf32>,
    %c0_47 = arith.constant 0 : index
    %c1_48 = arith.constant 1 : index
    %c0_49 = arith.constant 0 : index
    %38 = vector.load %arg3[%c0_47, %c1_48, %c0_49] : memref<1x144x128xbf16, #tpu.memory_space<vmem>>, vector<1x128x128xbf16>
    %39 = vector.shape_cast %38 : vector<1x128x128xbf16> to vector<128x128xbf16>
    %c5 = arith.constant 5 : index
    %c0_50 = arith.constant 0 : index
    %c0_51 = arith.constant 0 : index
    %40 = vector.load %arg5[%c5, %c0_50, %c0_51] : memref<9x128x128xbf16, #tpu.memory_space<vmem>>, vector<1x128x128xbf16>
    %41 = vector.shape_cast %40 : vector<1x128x128xbf16> to vector<128x128xbf16>
    %cst_52 = arith.constant dense<0.000000e+00> : vector<128x128xf32>
    %42 = tpu.matmul %39, %41, %cst_52 {dimension_numbers = #tpu.dot_dimension_numbers<[1], [0], [0], [1], [0, 0, 1, 1], [], []>} : vector<128x128xbf16>, vector<128x128xbf16>, vector<128x128xf32> -> vector<128x128xf32>
    %c0_53 = arith.constant 0 : index
    %c0_54 = arith.constant 0 : index
    %43 = vector.load %arg10[%c0_53, %c0_54] : memref<128x128xf32, #tpu.memory_space<vmem>>, vector<128x128xf32>
    %44 = arith.addf %43, %42 : vector<128x128xf32>
    %c0_55 = arith.constant 0 : index
    %c0_56 = arith.constant 0 : index
    %45 = vector.load %arg10[%c0_55, %c0_56] : memref<128x128xf32, #tpu.memory_space<vmem>>, vector<128x128xf32>
    tpu.vector_store %arg10[%c0_55, %c0_56], %44 {strides = array<i32>} : memref<128x128xf32, #tpu.memory_space<vmem>>, vector<128x128xf32>,
    %c0_57 = arith.constant 0 : index
    %c9 = arith.constant 9 : index
    %c0_58 = arith.constant 0 : index
    %46 = vector.load %arg1[%c0_57, %c9, %c0_58] : memref<1x144x128xbf16, #tpu.memory_space<vmem>>, vector<1x128x128xbf16>
    %47 = vector.shape_cast %46 : vector<1x128x128xbf16> to vector<128x128xbf16>
    %c6 = arith.constant 6 : index
    %c0_59 = arith.constant 0 : index
    %c0_60 = arith.constant 0 : index
    %48 = vector.load %arg5[%c6, %c0_59, %c0_60] : memref<9x128x128xbf16, #tpu.memory_space<vmem>>, vector<1x128x128xbf16>
    %49 = vector.shape_cast %48 : vector<1x128x128xbf16> to vector<128x128xbf16>
    %cst_61 = arith.constant dense<0.000000e+00> : vector<128x128xf32>
    %50 = tpu.matmul %47, %49, %cst_61 {dimension_numbers = #tpu.dot_dimension_numbers<[1], [0], [0], [1], [0, 0, 1, 1], [], []>} : vector<128x128xbf16>, vector<128x128xbf16>, vector<128x128xf32> -> vector<128x128xf32>
    %c0_62 = arith.constant 0 : index
    %c0_63 = arith.constant 0 : index
    %51 = vector.load %arg10[%c0_62, %c0_63] : memref<128x128xf32, #tpu.memory_space<vmem>>, vector<128x128xf32>
    %52 = arith.addf %51, %50 : vector<128x128xf32>
    %c0_64 = arith.constant 0 : index
    %c0_65 = arith.constant 0 : index
    %53 = vector.load %arg10[%c0_64, %c0_65] : memref<128x128xf32, #tpu.memory_space<vmem>>, vector<128x128xf32>
    tpu.vector_store %arg10[%c0_64, %c0_65], %52 {strides = array<i32>} : memref<128x128xf32, #tpu.memory_space<vmem>>, vector<128x128xf32>,
    %c0_66 = arith.constant 0 : index
    %c9_67 = arith.constant 9 : index
    %c0_68 = arith.constant 0 : index
    %54 = vector.load %arg2[%c0_66, %c9_67, %c0_68] : memref<1x144x128xbf16, #tpu.memory_space<vmem>>, vector<1x128x128xbf16>
    %55 = vector.shape_cast %54 : vector<1x128x128xbf16> to vector<128x128xbf16>
    %c7 = arith.constant 7 : index
    %c0_69 = arith.constant 0 : index
    %c0_70 = arith.constant 0 : index
    %56 = vector.load %arg5[%c7, %c0_69, %c0_70] : memref<9x128x128xbf16, #tpu.memory_space<vmem>>, vector<1x128x128xbf16>
    %57 = vector.shape_cast %56 : vector<1x128x128xbf16> to vector<128x128xbf16>
    %cst_71 = arith.constant dense<0.000000e+00> : vector<128x128xf32>
    %58 = tpu.matmul %55, %57, %cst_71 {dimension_numbers = #tpu.dot_dimension_numbers<[1], [0], [0], [1], [0, 0, 1, 1], [], []>} : vector<128x128xbf16>, vector<128x128xbf16>, vector<128x128xf32> -> vector<128x128xf32>
    %c0_72 = arith.constant 0 : index
    %c0_73 = arith.constant 0 : index
    %59 = vector.load %arg10[%c0_72, %c0_73] : memref<128x128xf32, #tpu.memory_space<vmem>>, vector<128x128xf32>
    %60 = arith.addf %59, %58 : vector<128x128xf32>
    %c0_74 = arith.constant 0 : index
    %c0_75 = arith.constant 0 : index
    %61 = vector.load %arg10[%c0_74, %c0_75] : memref<128x128xf32, #tpu.memory_space<vmem>>, vector<128x128xf32>
    tpu.vector_store %arg10[%c0_74, %c0_75], %60 {strides = array<i32>} : memref<128x128xf32, #tpu.memory_space<vmem>>, vector<128x128xf32>,
    %c0_76 = arith.constant 0 : index
    %c10 = arith.constant 10 : index
    %c0_77 = arith.constant 0 : index
    %62 = vector.load %arg1[%c0_76, %c10, %c0_77] : memref<1x144x128xbf16, #tpu.memory_space<vmem>>, vector<1x128x128xbf16>
    %63 = vector.shape_cast %62 : vector<1x128x128xbf16> to vector<128x128xbf16>
    %c8 = arith.constant 8 : index
    %c0_78 = arith.constant 0 : index
    %c0_79 = arith.constant 0 : index
    %64 = vector.load %arg5[%c8, %c0_78, %c0_79] : memref<9x128x128xbf16, #tpu.memory_space<vmem>>, vector<1x128x128xbf16>
    %65 = vector.shape_cast %64 : vector<1x128x128xbf16> to vector<128x128xbf16>
    %cst_80 = arith.constant dense<0.000000e+00> : vector<128x128xf32>
    %66 = tpu.matmul %63, %65, %cst_80 {dimension_numbers = #tpu.dot_dimension_numbers<[1], [0], [0], [1], [0, 0, 1, 1], [], []>} : vector<128x128xbf16>, vector<128x128xbf16>, vector<128x128xf32> -> vector<128x128xf32>
    %c0_81 = arith.constant 0 : index
    %c0_82 = arith.constant 0 : index
    %67 = vector.load %arg10[%c0_81, %c0_82] : memref<128x128xf32, #tpu.memory_space<vmem>>, vector<128x128xf32>
    %68 = arith.addf %67, %66 : vector<128x128xf32>
    %c0_83 = arith.constant 0 : index
    %c0_84 = arith.constant 0 : index
    %69 = vector.load %arg10[%c0_83, %c0_84] : memref<128x128xf32, #tpu.memory_space<vmem>>, vector<128x128xf32>
    tpu.vector_store %arg10[%c0_83, %c0_84], %68 {strides = array<i32>} : memref<128x128xf32, #tpu.memory_space<vmem>>, vector<128x128xf32>,
    %c0_85 = arith.constant 0 : index
    %c0_86 = arith.constant 0 : index
    %70 = vector.load %arg10[%c0_85, %c0_86] : memref<128x128xf32, #tpu.memory_space<vmem>>, vector<128x128xf32>
    %c0_87 = arith.constant 0 : index
    %c0_88 = arith.constant 0 : index
    %71 = vector.load %arg6[%c0_87, %c0_88] : memref<1x128xf32, #tpu.memory_space<vmem>>, vector<1x128xf32>
    %72 = vector.broadcast %71 : vector<1x128xf32> to vector<128x128xf32>
    %73 = arith.mulf %70, %72 : vector<128x128xf32>
    %c0_89 = arith.constant 0 : index
    %c0_90 = arith.constant 0 : index
    %74 = vector.load %arg7[%c0_89, %c0_90] : memref<1x128xf32, #tpu.memory_space<vmem>>, vector<1x128xf32>
    %75 = vector.broadcast %74 : vector<1x128xf32> to vector<128x128xf32>
    %76 = arith.addf %73, %75 : vector<128x128xf32>
    %c0_91 = arith.constant 0 : index
    %c0_92 = arith.constant 0 : index
    %77 = vector.load %arg9[%c0_91, %c0_92] : memref<128x128xf32, #tpu.memory_space<vmem>>, vector<128x128xf32>
    tpu.vector_store %arg9[%c0_91, %c0_92], %76 {strides = array<i32>} : memref<128x128xf32, #tpu.memory_space<vmem>>, vector<128x128xf32>,
    %cst_93 = arith.constant 0.000000e+00 : f32
    %78 = vector.broadcast %cst_93 : f32 to vector<128x128xf32>
    %79 = arith.maximumf %76, %78 : vector<128x128xf32>
    %80 = arith.truncf %79 : vector<128x128xf32> to vector<128x128xbf16>
    %c0_94 = arith.constant 0 : index
    %c0_95 = arith.constant 0 : index
    %81 = vector.load %arg8[%c0_94, %c0_95] : memref<128x128xbf16, #tpu.memory_space<vmem>>, vector<128x128xbf16>
    tpu.vector_store %arg8[%c0_94, %c0_95], %80 {strides = array<i32>} : memref<128x128xbf16, #tpu.memory_space<vmem>>, vector<128x128xbf16>,
    return
  }
  func.func @transform_0(%arg0: i32) -> (i32, i32, i32) {
    %c0_i32 = arith.constant 0 : i32
    %c0_i32_0 = arith.constant 0 : i32
    %c0_i32_1 = arith.constant 0 : i32
    return %arg0, %c0_i32, %c0_i32_0 : i32, i32, i32
  }
  func.func @transform_1(%arg0: i32) -> (i32, i32, i32) {
    %c0_i32 = arith.constant 0 : i32
    %c0_i32_0 = arith.constant 0 : i32
    %c0_i32_1 = arith.constant 0 : i32
    return %arg0, %c0_i32, %c0_i32_0 : i32, i32, i32
  }
  func.func @transform_2(%arg0: i32) -> (i32, i32, i32) {
    %c0_i32 = arith.constant 0 : i32
    %c0_i32_0 = arith.constant 0 : i32
    %c0_i32_1 = arith.constant 0 : i32
    return %arg0, %c0_i32, %c0_i32_0 : i32, i32, i32
  }
  func.func @transform_3(%arg0: i32) -> (i32, i32, i32) {
    %c0_i32 = arith.constant 0 : i32
    %c0_i32_0 = arith.constant 0 : i32
    %c0_i32_1 = arith.constant 0 : i32
    return %arg0, %c0_i32, %c0_i32_0 : i32, i32, i32
  }
  func.func @transform_4(%arg0: i32) -> (i32, i32, i32) {
    %c0_i32 = arith.constant 0 : i32
    %c0_i32_0 = arith.constant 0 : i32
    %c0_i32_1 = arith.constant 0 : i32
    %c0_i32_2 = arith.constant 0 : i32
    return %c0_i32, %c0_i32_0, %c0_i32_1 : i32, i32, i32
  }
  func.func @transform_5(%arg0: i32) -> (i32, i32) {
    %c0_i32 = arith.constant 0 : i32
    %c0_i32_0 = arith.constant 0 : i32
    %c0_i32_1 = arith.constant 0 : i32
    return %c0_i32, %c0_i32_0 : i32, i32
  }
  func.func @transform_6(%arg0: i32) -> (i32, i32) {
    %c0_i32 = arith.constant 0 : i32
    %c0_i32_0 = arith.constant 0 : i32
    %c0_i32_1 = arith.constant 0 : i32
    return %c0_i32, %c0_i32_0 : i32, i32
  }
  func.func @transform_7(%arg0: i32) -> (i32, i32) {
    %c0_i32 = arith.constant 0 : i32
    %c0_i32_0 = arith.constant 0 : i32
    return %arg0, %c0_i32 : i32, i32
  }
  func.func @transform_8(%arg0: i32) -> (i32, i32) {
    %c0_i32 = arith.constant 0 : i32
    %c0_i32_0 = arith.constant 0 : i32
    return %arg0, %c0_i32 : i32, i32
  }
}

module attributes {stable_mosaic.version = 11 : i64} {
  func.func @kernel(%arg0: i32, %arg1: memref<1x160x128xbf16, #tpu.memory_space<vmem>>, %arg2: memref<9x128x128xbf16, #tpu.memory_space<vmem>>, %arg3: memref<128x128xf32, #tpu.memory_space<vmem>>, %arg4: memref<128x128xf32, #tpu.memory_space<vmem>>, %arg5: memref<128x128xf32, #tpu.memory_space<vmem>>) attributes {dimension_semantics = [#tpu.dimension_semantics<parallel>], iteration_bounds = array<i64: 2>, scalar_prefetch = 0 : i64, scratch_operands = 1 : i64, tpu.core_type = #tpu.core_type<tc>, window_params = [{transform_indices = @transform_0, window_bounds = array<i64: 1, 160, 128>}, {pipeline_mode = #tpu.pipeline_mode<synchronous>, transform_indices = @transform_1, window_bounds = array<i64: 9, 128, 128>}, {transform_indices = @transform_2, window_bounds = array<i64: 128, 128>}, {transform_indices = @transform_3, window_bounds = array<i64: 128, 128>}]} {
    %c0 = arith.constant 0 : index
    %c0_0 = arith.constant 0 : index
    %c0_1 = arith.constant 0 : index
    %0 = vector.load %arg1[%c0, %c0_0, %c0_1] : memref<1x160x128xbf16, #tpu.memory_space<vmem>>, vector<1x128x128xbf16>
    %1 = vector.shape_cast %0 : vector<1x128x128xbf16> to vector<128x128xbf16>
    %c0_2 = arith.constant 0 : index
    %c0_3 = arith.constant 0 : index
    %c0_4 = arith.constant 0 : index
    %2 = vector.load %arg2[%c0_2, %c0_3, %c0_4] : memref<9x128x128xbf16, #tpu.memory_space<vmem>>, vector<1x128x128xbf16>
    %3 = vector.shape_cast %2 : vector<1x128x128xbf16> to vector<128x128xbf16>
    %cst = arith.constant dense<0.000000e+00> : vector<128x128xf32>
    %4 = tpu.matmul %1, %3, %cst {dimension_numbers = #tpu.dot_dimension_numbers<[1], [0], [0], [1], [0, 0, 1, 1], [], []>} : vector<128x128xbf16>, vector<128x128xbf16>, vector<128x128xf32> -> vector<128x128xf32>
    %c0_5 = arith.constant 0 : index
    %c0_6 = arith.constant 0 : index
    %5 = vector.load %arg5[%c0_5, %c0_6] : memref<128x128xf32, #tpu.memory_space<vmem>>, vector<128x128xf32>
    tpu.vector_store %arg5[%c0_5, %c0_6], %4 {strides = array<i32>} : memref<128x128xf32, #tpu.memory_space<vmem>>, vector<128x128xf32>,
    %c0_7 = arith.constant 0 : index
    %c1 = arith.constant 1 : index
    %c0_8 = arith.constant 0 : index
    %6 = vector.load %arg1[%c0_7, %c1, %c0_8] : memref<1x160x128xbf16, #tpu.memory_space<vmem>>, vector<1x128x128xbf16>
    %7 = vector.shape_cast %6 : vector<1x128x128xbf16> to vector<128x128xbf16>
    %c1_9 = arith.constant 1 : index
    %c0_10 = arith.constant 0 : index
    %c0_11 = arith.constant 0 : index
    %8 = vector.load %arg2[%c1_9, %c0_10, %c0_11] : memref<9x128x128xbf16, #tpu.memory_space<vmem>>, vector<1x128x128xbf16>
    %9 = vector.shape_cast %8 : vector<1x128x128xbf16> to vector<128x128xbf16>
    %cst_12 = arith.constant dense<0.000000e+00> : vector<128x128xf32>
    %10 = tpu.matmul %7, %9, %cst_12 {dimension_numbers = #tpu.dot_dimension_numbers<[1], [0], [0], [1], [0, 0, 1, 1], [], []>} : vector<128x128xbf16>, vector<128x128xbf16>, vector<128x128xf32> -> vector<128x128xf32>
    %c0_13 = arith.constant 0 : index
    %c0_14 = arith.constant 0 : index
    %11 = vector.load %arg5[%c0_13, %c0_14] : memref<128x128xf32, #tpu.memory_space<vmem>>, vector<128x128xf32>
    %12 = arith.addf %11, %10 : vector<128x128xf32>
    %c0_15 = arith.constant 0 : index
    %c0_16 = arith.constant 0 : index
    %13 = vector.load %arg5[%c0_15, %c0_16] : memref<128x128xf32, #tpu.memory_space<vmem>>, vector<128x128xf32>
    tpu.vector_store %arg5[%c0_15, %c0_16], %12 {strides = array<i32>} : memref<128x128xf32, #tpu.memory_space<vmem>>, vector<128x128xf32>,
    %c0_17 = arith.constant 0 : index
    %c2 = arith.constant 2 : index
    %c0_18 = arith.constant 0 : index
    %14 = vector.load %arg1[%c0_17, %c2, %c0_18] : memref<1x160x128xbf16, #tpu.memory_space<vmem>>, vector<1x128x128xbf16>
    %15 = vector.shape_cast %14 : vector<1x128x128xbf16> to vector<128x128xbf16>
    %c2_19 = arith.constant 2 : index
    %c0_20 = arith.constant 0 : index
    %c0_21 = arith.constant 0 : index
    %16 = vector.load %arg2[%c2_19, %c0_20, %c0_21] : memref<9x128x128xbf16, #tpu.memory_space<vmem>>, vector<1x128x128xbf16>
    %17 = vector.shape_cast %16 : vector<1x128x128xbf16> to vector<128x128xbf16>
    %cst_22 = arith.constant dense<0.000000e+00> : vector<128x128xf32>
    %18 = tpu.matmul %15, %17, %cst_22 {dimension_numbers = #tpu.dot_dimension_numbers<[1], [0], [0], [1], [0, 0, 1, 1], [], []>} : vector<128x128xbf16>, vector<128x128xbf16>, vector<128x128xf32> -> vector<128x128xf32>
    %c0_23 = arith.constant 0 : index
    %c0_24 = arith.constant 0 : index
    %19 = vector.load %arg5[%c0_23, %c0_24] : memref<128x128xf32, #tpu.memory_space<vmem>>, vector<128x128xf32>
    %20 = arith.addf %19, %18 : vector<128x128xf32>
    %c0_25 = arith.constant 0 : index
    %c0_26 = arith.constant 0 : index
    %21 = vector.load %arg5[%c0_25, %c0_26] : memref<128x128xf32, #tpu.memory_space<vmem>>, vector<128x128xf32>
    tpu.vector_store %arg5[%c0_25, %c0_26], %20 {strides = array<i32>} : memref<128x128xf32, #tpu.memory_space<vmem>>, vector<128x128xf32>,
    %c0_27 = arith.constant 0 : index
    %c10 = arith.constant 10 : index
    %c0_28 = arith.constant 0 : index
    %22 = vector.load %arg1[%c0_27, %c10, %c0_28] : memref<1x160x128xbf16, #tpu.memory_space<vmem>>, vector<1x128x128xbf16>
    %23 = vector.shape_cast %22 : vector<1x128x128xbf16> to vector<128x128xbf16>
    %c3 = arith.constant 3 : index
    %c0_29 = arith.constant 0 : index
    %c0_30 = arith.constant 0 : index
    %24 = vector.load %arg2[%c3, %c0_29, %c0_30] : memref<9x128x128xbf16, #tpu.memory_space<vmem>>, vector<1x128x128xbf16>
    %25 = vector.shape_cast %24 : vector<1x128x128xbf16> to vector<128x128xbf16>
    %cst_31 = arith.constant dense<0.000000e+00> : vector<128x128xf32>
    %26 = tpu.matmul %23, %25, %cst_31 {dimension_numbers = #tpu.dot_dimension_numbers<[1], [0], [0], [1], [0, 0, 1, 1], [], []>} : vector<128x128xbf16>, vector<128x128xbf16>, vector<128x128xf32> -> vector<128x128xf32>
    %c0_32 = arith.constant 0 : index
    %c0_33 = arith.constant 0 : index
    %27 = vector.load %arg5[%c0_32, %c0_33] : memref<128x128xf32, #tpu.memory_space<vmem>>, vector<128x128xf32>
    %28 = arith.addf %27, %26 : vector<128x128xf32>
    %c0_34 = arith.constant 0 : index
    %c0_35 = arith.constant 0 : index
    %29 = vector.load %arg5[%c0_34, %c0_35] : memref<128x128xf32, #tpu.memory_space<vmem>>, vector<128x128xf32>
    tpu.vector_store %arg5[%c0_34, %c0_35], %28 {strides = array<i32>} : memref<128x128xf32, #tpu.memory_space<vmem>>, vector<128x128xf32>,
    %c0_36 = arith.constant 0 : index
    %c11 = arith.constant 11 : index
    %c0_37 = arith.constant 0 : index
    %30 = vector.load %arg1[%c0_36, %c11, %c0_37] : memref<1x160x128xbf16, #tpu.memory_space<vmem>>, vector<1x128x128xbf16>
    %31 = vector.shape_cast %30 : vector<1x128x128xbf16> to vector<128x128xbf16>
    %c4 = arith.constant 4 : index
    %c0_38 = arith.constant 0 : index
    %c0_39 = arith.constant 0 : index
    %32 = vector.load %arg2[%c4, %c0_38, %c0_39] : memref<9x128x128xbf16, #tpu.memory_space<vmem>>, vector<1x128x128xbf16>
    %33 = vector.shape_cast %32 : vector<1x128x128xbf16> to vector<128x128xbf16>
    %cst_40 = arith.constant dense<0.000000e+00> : vector<128x128xf32>
    %34 = tpu.matmul %31, %33, %cst_40 {dimension_numbers = #tpu.dot_dimension_numbers<[1], [0], [0], [1], [0, 0, 1, 1], [], []>} : vector<128x128xbf16>, vector<128x128xbf16>, vector<128x128xf32> -> vector<128x128xf32>
    %c0_41 = arith.constant 0 : index
    %c0_42 = arith.constant 0 : index
    %35 = vector.load %arg5[%c0_41, %c0_42] : memref<128x128xf32, #tpu.memory_space<vmem>>, vector<128x128xf32>
    %36 = arith.addf %35, %34 : vector<128x128xf32>
    %c0_43 = arith.constant 0 : index
    %c0_44 = arith.constant 0 : index
    %37 = vector.load %arg5[%c0_43, %c0_44] : memref<128x128xf32, #tpu.memory_space<vmem>>, vector<128x128xf32>
    tpu.vector_store %arg5[%c0_43, %c0_44], %36 {strides = array<i32>} : memref<128x128xf32, #tpu.memory_space<vmem>>, vector<128x128xf32>,
    %c0_45 = arith.constant 0 : index
    %c12 = arith.constant 12 : index
    %c0_46 = arith.constant 0 : index
    %38 = vector.load %arg1[%c0_45, %c12, %c0_46] : memref<1x160x128xbf16, #tpu.memory_space<vmem>>, vector<1x128x128xbf16>
    %39 = vector.shape_cast %38 : vector<1x128x128xbf16> to vector<128x128xbf16>
    %c5 = arith.constant 5 : index
    %c0_47 = arith.constant 0 : index
    %c0_48 = arith.constant 0 : index
    %40 = vector.load %arg2[%c5, %c0_47, %c0_48] : memref<9x128x128xbf16, #tpu.memory_space<vmem>>, vector<1x128x128xbf16>
    %41 = vector.shape_cast %40 : vector<1x128x128xbf16> to vector<128x128xbf16>
    %cst_49 = arith.constant dense<0.000000e+00> : vector<128x128xf32>
    %42 = tpu.matmul %39, %41, %cst_49 {dimension_numbers = #tpu.dot_dimension_numbers<[1], [0], [0], [1], [0, 0, 1, 1], [], []>} : vector<128x128xbf16>, vector<128x128xbf16>, vector<128x128xf32> -> vector<128x128xf32>
    %c0_50 = arith.constant 0 : index
    %c0_51 = arith.constant 0 : index
    %43 = vector.load %arg5[%c0_50, %c0_51] : memref<128x128xf32, #tpu.memory_space<vmem>>, vector<128x128xf32>
    %44 = arith.addf %43, %42 : vector<128x128xf32>
    %c0_52 = arith.constant 0 : index
    %c0_53 = arith.constant 0 : index
    %45 = vector.load %arg5[%c0_52, %c0_53] : memref<128x128xf32, #tpu.memory_space<vmem>>, vector<128x128xf32>
    tpu.vector_store %arg5[%c0_52, %c0_53], %44 {strides = array<i32>} : memref<128x128xf32, #tpu.memory_space<vmem>>, vector<128x128xf32>,
    %c0_54 = arith.constant 0 : index
    %c20 = arith.constant 20 : index
    %c0_55 = arith.constant 0 : index
    %46 = vector.load %arg1[%c0_54, %c20, %c0_55] : memref<1x160x128xbf16, #tpu.memory_space<vmem>>, vector<1x128x128xbf16>
    %47 = vector.shape_cast %46 : vector<1x128x128xbf16> to vector<128x128xbf16>
    %c6 = arith.constant 6 : index
    %c0_56 = arith.constant 0 : index
    %c0_57 = arith.constant 0 : index
    %48 = vector.load %arg2[%c6, %c0_56, %c0_57] : memref<9x128x128xbf16, #tpu.memory_space<vmem>>, vector<1x128x128xbf16>
    %49 = vector.shape_cast %48 : vector<1x128x128xbf16> to vector<128x128xbf16>
    %cst_58 = arith.constant dense<0.000000e+00> : vector<128x128xf32>
    %50 = tpu.matmul %47, %49, %cst_58 {dimension_numbers = #tpu.dot_dimension_numbers<[1], [0], [0], [1], [0, 0, 1, 1], [], []>} : vector<128x128xbf16>, vector<128x128xbf16>, vector<128x128xf32> -> vector<128x128xf32>
    %c0_59 = arith.constant 0 : index
    %c0_60 = arith.constant 0 : index
    %51 = vector.load %arg5[%c0_59, %c0_60] : memref<128x128xf32, #tpu.memory_space<vmem>>, vector<128x128xf32>
    %52 = arith.addf %51, %50 : vector<128x128xf32>
    %c0_61 = arith.constant 0 : index
    %c0_62 = arith.constant 0 : index
    %53 = vector.load %arg5[%c0_61, %c0_62] : memref<128x128xf32, #tpu.memory_space<vmem>>, vector<128x128xf32>
    tpu.vector_store %arg5[%c0_61, %c0_62], %52 {strides = array<i32>} : memref<128x128xf32, #tpu.memory_space<vmem>>, vector<128x128xf32>,
    %c0_63 = arith.constant 0 : index
    %c21 = arith.constant 21 : index
    %c0_64 = arith.constant 0 : index
    %54 = vector.load %arg1[%c0_63, %c21, %c0_64] : memref<1x160x128xbf16, #tpu.memory_space<vmem>>, vector<1x128x128xbf16>
    %55 = vector.shape_cast %54 : vector<1x128x128xbf16> to vector<128x128xbf16>
    %c7 = arith.constant 7 : index
    %c0_65 = arith.constant 0 : index
    %c0_66 = arith.constant 0 : index
    %56 = vector.load %arg2[%c7, %c0_65, %c0_66] : memref<9x128x128xbf16, #tpu.memory_space<vmem>>, vector<1x128x128xbf16>
    %57 = vector.shape_cast %56 : vector<1x128x128xbf16> to vector<128x128xbf16>
    %cst_67 = arith.constant dense<0.000000e+00> : vector<128x128xf32>
    %58 = tpu.matmul %55, %57, %cst_67 {dimension_numbers = #tpu.dot_dimension_numbers<[1], [0], [0], [1], [0, 0, 1, 1], [], []>} : vector<128x128xbf16>, vector<128x128xbf16>, vector<128x128xf32> -> vector<128x128xf32>
    %c0_68 = arith.constant 0 : index
    %c0_69 = arith.constant 0 : index
    %59 = vector.load %arg5[%c0_68, %c0_69] : memref<128x128xf32, #tpu.memory_space<vmem>>, vector<128x128xf32>
    %60 = arith.addf %59, %58 : vector<128x128xf32>
    %c0_70 = arith.constant 0 : index
    %c0_71 = arith.constant 0 : index
    %61 = vector.load %arg5[%c0_70, %c0_71] : memref<128x128xf32, #tpu.memory_space<vmem>>, vector<128x128xf32>
    tpu.vector_store %arg5[%c0_70, %c0_71], %60 {strides = array<i32>} : memref<128x128xf32, #tpu.memory_space<vmem>>, vector<128x128xf32>,
    %c0_72 = arith.constant 0 : index
    %c22 = arith.constant 22 : index
    %c0_73 = arith.constant 0 : index
    %62 = vector.load %arg1[%c0_72, %c22, %c0_73] : memref<1x160x128xbf16, #tpu.memory_space<vmem>>, vector<1x128x128xbf16>
    %63 = vector.shape_cast %62 : vector<1x128x128xbf16> to vector<128x128xbf16>
    %c8 = arith.constant 8 : index
    %c0_74 = arith.constant 0 : index
    %c0_75 = arith.constant 0 : index
    %64 = vector.load %arg2[%c8, %c0_74, %c0_75] : memref<9x128x128xbf16, #tpu.memory_space<vmem>>, vector<1x128x128xbf16>
    %65 = vector.shape_cast %64 : vector<1x128x128xbf16> to vector<128x128xbf16>
    %cst_76 = arith.constant dense<0.000000e+00> : vector<128x128xf32>
    %66 = tpu.matmul %63, %65, %cst_76 {dimension_numbers = #tpu.dot_dimension_numbers<[1], [0], [0], [1], [0, 0, 1, 1], [], []>} : vector<128x128xbf16>, vector<128x128xbf16>, vector<128x128xf32> -> vector<128x128xf32>
    %c0_77 = arith.constant 0 : index
    %c0_78 = arith.constant 0 : index
    %67 = vector.load %arg5[%c0_77, %c0_78] : memref<128x128xf32, #tpu.memory_space<vmem>>, vector<128x128xf32>
    %68 = arith.addf %67, %66 : vector<128x128xf32>
    %c0_79 = arith.constant 0 : index
    %c0_80 = arith.constant 0 : index
    %69 = vector.load %arg5[%c0_79, %c0_80] : memref<128x128xf32, #tpu.memory_space<vmem>>, vector<128x128xf32>
    tpu.vector_store %arg5[%c0_79, %c0_80], %68 {strides = array<i32>} : memref<128x128xf32, #tpu.memory_space<vmem>>, vector<128x128xf32>,
    %c0_81 = arith.constant 0 : index
    %c0_82 = arith.constant 0 : index
    %70 = vector.load %arg5[%c0_81, %c0_82] : memref<128x128xf32, #tpu.memory_space<vmem>>, vector<128x128xf32>
    %c0_83 = arith.constant 0 : index
    %c0_84 = arith.constant 0 : index
    %71 = vector.load %arg3[%c0_83, %c0_84] : memref<128x128xf32, #tpu.memory_space<vmem>>, vector<128x128xf32>
    %72 = arith.addf %70, %71 : vector<128x128xf32>
    %c0_85 = arith.constant 0 : index
    %c0_86 = arith.constant 0 : index
    %73 = vector.load %arg4[%c0_85, %c0_86] : memref<128x128xf32, #tpu.memory_space<vmem>>, vector<128x128xf32>
    tpu.vector_store %arg4[%c0_85, %c0_86], %72 {strides = array<i32>} : memref<128x128xf32, #tpu.memory_space<vmem>>, vector<128x128xf32>,
    return
  }
  func.func @transform_0(%arg0: i32) -> (i32, i32, i32) {
    %c0_i32 = arith.constant 0 : i32
    %c0_i32_0 = arith.constant 0 : i32
    %c0_i32_1 = arith.constant 0 : i32
    return %arg0, %c0_i32, %c0_i32_0 : i32, i32, i32
  }
  func.func @transform_1(%arg0: i32) -> (i32, i32, i32) {
    %c0_i32 = arith.constant 0 : i32
    %c0_i32_0 = arith.constant 0 : i32
    %c0_i32_1 = arith.constant 0 : i32
    %c0_i32_2 = arith.constant 0 : i32
    return %c0_i32, %c0_i32_0, %c0_i32_1 : i32, i32, i32
  }
  func.func @transform_2(%arg0: i32) -> (i32, i32) {
    %c0_i32 = arith.constant 0 : i32
    %c0_i32_0 = arith.constant 0 : i32
    return %arg0, %c0_i32 : i32, i32
  }
  func.func @transform_3(%arg0: i32) -> (i32, i32) {
    %c0_i32 = arith.constant 0 : i32
    %c0_i32_0 = arith.constant 0 : i32
    return %arg0, %c0_i32 : i32, i32
  }
}

module attributes {stable_mosaic.version = 11 : i64} {
  func.func @kernel(%arg0: i32, %arg1: memref<1x160x128xbf16, #tpu.memory_space<vmem>>, %arg2: memref<9x128x128xbf16, #tpu.memory_space<vmem>>, %arg3: memref<1x128xf32, #tpu.memory_space<vmem>>, %arg4: memref<1x128xf32, #tpu.memory_space<vmem>>, %arg5: memref<128x128xbf16, #tpu.memory_space<vmem>>, %arg6: memref<128x128xf32, #tpu.memory_space<vmem>>) attributes {dimension_semantics = [#tpu.dimension_semantics<parallel>], iteration_bounds = array<i64: 2>, scalar_prefetch = 0 : i64, scratch_operands = 1 : i64, tpu.core_type = #tpu.core_type<tc>, window_params = [{transform_indices = @transform_0, window_bounds = array<i64: 1, 160, 128>}, {pipeline_mode = #tpu.pipeline_mode<synchronous>, transform_indices = @transform_1, window_bounds = array<i64: 9, 128, 128>}, {pipeline_mode = #tpu.pipeline_mode<synchronous>, transform_indices = @transform_2, window_bounds = array<i64: 1, 128>}, {pipeline_mode = #tpu.pipeline_mode<synchronous>, transform_indices = @transform_3, window_bounds = array<i64: 1, 128>}, {transform_indices = @transform_4, window_bounds = array<i64: 128, 128>}]} {
    %c0 = arith.constant 0 : index
    %c0_0 = arith.constant 0 : index
    %c0_1 = arith.constant 0 : index
    %0 = vector.load %arg1[%c0, %c0_0, %c0_1] : memref<1x160x128xbf16, #tpu.memory_space<vmem>>, vector<1x128x128xbf16>
    %1 = vector.shape_cast %0 : vector<1x128x128xbf16> to vector<128x128xbf16>
    %c0_2 = arith.constant 0 : index
    %c0_3 = arith.constant 0 : index
    %c0_4 = arith.constant 0 : index
    %2 = vector.load %arg2[%c0_2, %c0_3, %c0_4] : memref<9x128x128xbf16, #tpu.memory_space<vmem>>, vector<1x128x128xbf16>
    %3 = vector.shape_cast %2 : vector<1x128x128xbf16> to vector<128x128xbf16>
    %cst = arith.constant dense<0.000000e+00> : vector<128x128xf32>
    %4 = tpu.matmul %1, %3, %cst {dimension_numbers = #tpu.dot_dimension_numbers<[1], [0], [0], [1], [0, 0, 1, 1], [], []>} : vector<128x128xbf16>, vector<128x128xbf16>, vector<128x128xf32> -> vector<128x128xf32>
    %c0_5 = arith.constant 0 : index
    %c0_6 = arith.constant 0 : index
    %5 = vector.load %arg6[%c0_5, %c0_6] : memref<128x128xf32, #tpu.memory_space<vmem>>, vector<128x128xf32>
    tpu.vector_store %arg6[%c0_5, %c0_6], %4 {strides = array<i32>} : memref<128x128xf32, #tpu.memory_space<vmem>>, vector<128x128xf32>,
    %c0_7 = arith.constant 0 : index
    %c1 = arith.constant 1 : index
    %c0_8 = arith.constant 0 : index
    %6 = vector.load %arg1[%c0_7, %c1, %c0_8] : memref<1x160x128xbf16, #tpu.memory_space<vmem>>, vector<1x128x128xbf16>
    %7 = vector.shape_cast %6 : vector<1x128x128xbf16> to vector<128x128xbf16>
    %c1_9 = arith.constant 1 : index
    %c0_10 = arith.constant 0 : index
    %c0_11 = arith.constant 0 : index
    %8 = vector.load %arg2[%c1_9, %c0_10, %c0_11] : memref<9x128x128xbf16, #tpu.memory_space<vmem>>, vector<1x128x128xbf16>
    %9 = vector.shape_cast %8 : vector<1x128x128xbf16> to vector<128x128xbf16>
    %cst_12 = arith.constant dense<0.000000e+00> : vector<128x128xf32>
    %10 = tpu.matmul %7, %9, %cst_12 {dimension_numbers = #tpu.dot_dimension_numbers<[1], [0], [0], [1], [0, 0, 1, 1], [], []>} : vector<128x128xbf16>, vector<128x128xbf16>, vector<128x128xf32> -> vector<128x128xf32>
    %c0_13 = arith.constant 0 : index
    %c0_14 = arith.constant 0 : index
    %11 = vector.load %arg6[%c0_13, %c0_14] : memref<128x128xf32, #tpu.memory_space<vmem>>, vector<128x128xf32>
    %12 = arith.addf %11, %10 : vector<128x128xf32>
    %c0_15 = arith.constant 0 : index
    %c0_16 = arith.constant 0 : index
    %13 = vector.load %arg6[%c0_15, %c0_16] : memref<128x128xf32, #tpu.memory_space<vmem>>, vector<128x128xf32>
    tpu.vector_store %arg6[%c0_15, %c0_16], %12 {strides = array<i32>} : memref<128x128xf32, #tpu.memory_space<vmem>>, vector<128x128xf32>,
    %c0_17 = arith.constant 0 : index
    %c2 = arith.constant 2 : index
    %c0_18 = arith.constant 0 : index
    %14 = vector.load %arg1[%c0_17, %c2, %c0_18] : memref<1x160x128xbf16, #tpu.memory_space<vmem>>, vector<1x128x128xbf16>
    %15 = vector.shape_cast %14 : vector<1x128x128xbf16> to vector<128x128xbf16>
    %c2_19 = arith.constant 2 : index
    %c0_20 = arith.constant 0 : index
    %c0_21 = arith.constant 0 : index
    %16 = vector.load %arg2[%c2_19, %c0_20, %c0_21] : memref<9x128x128xbf16, #tpu.memory_space<vmem>>, vector<1x128x128xbf16>
    %17 = vector.shape_cast %16 : vector<1x128x128xbf16> to vector<128x128xbf16>
    %cst_22 = arith.constant dense<0.000000e+00> : vector<128x128xf32>
    %18 = tpu.matmul %15, %17, %cst_22 {dimension_numbers = #tpu.dot_dimension_numbers<[1], [0], [0], [1], [0, 0, 1, 1], [], []>} : vector<128x128xbf16>, vector<128x128xbf16>, vector<128x128xf32> -> vector<128x128xf32>
    %c0_23 = arith.constant 0 : index
    %c0_24 = arith.constant 0 : index
    %19 = vector.load %arg6[%c0_23, %c0_24] : memref<128x128xf32, #tpu.memory_space<vmem>>, vector<128x128xf32>
    %20 = arith.addf %19, %18 : vector<128x128xf32>
    %c0_25 = arith.constant 0 : index
    %c0_26 = arith.constant 0 : index
    %21 = vector.load %arg6[%c0_25, %c0_26] : memref<128x128xf32, #tpu.memory_space<vmem>>, vector<128x128xf32>
    tpu.vector_store %arg6[%c0_25, %c0_26], %20 {strides = array<i32>} : memref<128x128xf32, #tpu.memory_space<vmem>>, vector<128x128xf32>,
    %c0_27 = arith.constant 0 : index
    %c10 = arith.constant 10 : index
    %c0_28 = arith.constant 0 : index
    %22 = vector.load %arg1[%c0_27, %c10, %c0_28] : memref<1x160x128xbf16, #tpu.memory_space<vmem>>, vector<1x128x128xbf16>
    %23 = vector.shape_cast %22 : vector<1x128x128xbf16> to vector<128x128xbf16>
    %c3 = arith.constant 3 : index
    %c0_29 = arith.constant 0 : index
    %c0_30 = arith.constant 0 : index
    %24 = vector.load %arg2[%c3, %c0_29, %c0_30] : memref<9x128x128xbf16, #tpu.memory_space<vmem>>, vector<1x128x128xbf16>
    %25 = vector.shape_cast %24 : vector<1x128x128xbf16> to vector<128x128xbf16>
    %cst_31 = arith.constant dense<0.000000e+00> : vector<128x128xf32>
    %26 = tpu.matmul %23, %25, %cst_31 {dimension_numbers = #tpu.dot_dimension_numbers<[1], [0], [0], [1], [0, 0, 1, 1], [], []>} : vector<128x128xbf16>, vector<128x128xbf16>, vector<128x128xf32> -> vector<128x128xf32>
    %c0_32 = arith.constant 0 : index
    %c0_33 = arith.constant 0 : index
    %27 = vector.load %arg6[%c0_32, %c0_33] : memref<128x128xf32, #tpu.memory_space<vmem>>, vector<128x128xf32>
    %28 = arith.addf %27, %26 : vector<128x128xf32>
    %c0_34 = arith.constant 0 : index
    %c0_35 = arith.constant 0 : index
    %29 = vector.load %arg6[%c0_34, %c0_35] : memref<128x128xf32, #tpu.memory_space<vmem>>, vector<128x128xf32>
    tpu.vector_store %arg6[%c0_34, %c0_35], %28 {strides = array<i32>} : memref<128x128xf32, #tpu.memory_space<vmem>>, vector<128x128xf32>,
    %c0_36 = arith.constant 0 : index
    %c11 = arith.constant 11 : index
    %c0_37 = arith.constant 0 : index
    %30 = vector.load %arg1[%c0_36, %c11, %c0_37] : memref<1x160x128xbf16, #tpu.memory_space<vmem>>, vector<1x128x128xbf16>
    %31 = vector.shape_cast %30 : vector<1x128x128xbf16> to vector<128x128xbf16>
    %c4 = arith.constant 4 : index
    %c0_38 = arith.constant 0 : index
    %c0_39 = arith.constant 0 : index
    %32 = vector.load %arg2[%c4, %c0_38, %c0_39] : memref<9x128x128xbf16, #tpu.memory_space<vmem>>, vector<1x128x128xbf16>
    %33 = vector.shape_cast %32 : vector<1x128x128xbf16> to vector<128x128xbf16>
    %cst_40 = arith.constant dense<0.000000e+00> : vector<128x128xf32>
    %34 = tpu.matmul %31, %33, %cst_40 {dimension_numbers = #tpu.dot_dimension_numbers<[1], [0], [0], [1], [0, 0, 1, 1], [], []>} : vector<128x128xbf16>, vector<128x128xbf16>, vector<128x128xf32> -> vector<128x128xf32>
    %c0_41 = arith.constant 0 : index
    %c0_42 = arith.constant 0 : index
    %35 = vector.load %arg6[%c0_41, %c0_42] : memref<128x128xf32, #tpu.memory_space<vmem>>, vector<128x128xf32>
    %36 = arith.addf %35, %34 : vector<128x128xf32>
    %c0_43 = arith.constant 0 : index
    %c0_44 = arith.constant 0 : index
    %37 = vector.load %arg6[%c0_43, %c0_44] : memref<128x128xf32, #tpu.memory_space<vmem>>, vector<128x128xf32>
    tpu.vector_store %arg6[%c0_43, %c0_44], %36 {strides = array<i32>} : memref<128x128xf32, #tpu.memory_space<vmem>>, vector<128x128xf32>,
    %c0_45 = arith.constant 0 : index
    %c12 = arith.constant 12 : index
    %c0_46 = arith.constant 0 : index
    %38 = vector.load %arg1[%c0_45, %c12, %c0_46] : memref<1x160x128xbf16, #tpu.memory_space<vmem>>, vector<1x128x128xbf16>
    %39 = vector.shape_cast %38 : vector<1x128x128xbf16> to vector<128x128xbf16>
    %c5 = arith.constant 5 : index
    %c0_47 = arith.constant 0 : index
    %c0_48 = arith.constant 0 : index
    %40 = vector.load %arg2[%c5, %c0_47, %c0_48] : memref<9x128x128xbf16, #tpu.memory_space<vmem>>, vector<1x128x128xbf16>
    %41 = vector.shape_cast %40 : vector<1x128x128xbf16> to vector<128x128xbf16>
    %cst_49 = arith.constant dense<0.000000e+00> : vector<128x128xf32>
    %42 = tpu.matmul %39, %41, %cst_49 {dimension_numbers = #tpu.dot_dimension_numbers<[1], [0], [0], [1], [0, 0, 1, 1], [], []>} : vector<128x128xbf16>, vector<128x128xbf16>, vector<128x128xf32> -> vector<128x128xf32>
    %c0_50 = arith.constant 0 : index
    %c0_51 = arith.constant 0 : index
    %43 = vector.load %arg6[%c0_50, %c0_51] : memref<128x128xf32, #tpu.memory_space<vmem>>, vector<128x128xf32>
    %44 = arith.addf %43, %42 : vector<128x128xf32>
    %c0_52 = arith.constant 0 : index
    %c0_53 = arith.constant 0 : index
    %45 = vector.load %arg6[%c0_52, %c0_53] : memref<128x128xf32, #tpu.memory_space<vmem>>, vector<128x128xf32>
    tpu.vector_store %arg6[%c0_52, %c0_53], %44 {strides = array<i32>} : memref<128x128xf32, #tpu.memory_space<vmem>>, vector<128x128xf32>,
    %c0_54 = arith.constant 0 : index
    %c20 = arith.constant 20 : index
    %c0_55 = arith.constant 0 : index
    %46 = vector.load %arg1[%c0_54, %c20, %c0_55] : memref<1x160x128xbf16, #tpu.memory_space<vmem>>, vector<1x128x128xbf16>
    %47 = vector.shape_cast %46 : vector<1x128x128xbf16> to vector<128x128xbf16>
    %c6 = arith.constant 6 : index
    %c0_56 = arith.constant 0 : index
    %c0_57 = arith.constant 0 : index
    %48 = vector.load %arg2[%c6, %c0_56, %c0_57] : memref<9x128x128xbf16, #tpu.memory_space<vmem>>, vector<1x128x128xbf16>
    %49 = vector.shape_cast %48 : vector<1x128x128xbf16> to vector<128x128xbf16>
    %cst_58 = arith.constant dense<0.000000e+00> : vector<128x128xf32>
    %50 = tpu.matmul %47, %49, %cst_58 {dimension_numbers = #tpu.dot_dimension_numbers<[1], [0], [0], [1], [0, 0, 1, 1], [], []>} : vector<128x128xbf16>, vector<128x128xbf16>, vector<128x128xf32> -> vector<128x128xf32>
    %c0_59 = arith.constant 0 : index
    %c0_60 = arith.constant 0 : index
    %51 = vector.load %arg6[%c0_59, %c0_60] : memref<128x128xf32, #tpu.memory_space<vmem>>, vector<128x128xf32>
    %52 = arith.addf %51, %50 : vector<128x128xf32>
    %c0_61 = arith.constant 0 : index
    %c0_62 = arith.constant 0 : index
    %53 = vector.load %arg6[%c0_61, %c0_62] : memref<128x128xf32, #tpu.memory_space<vmem>>, vector<128x128xf32>
    tpu.vector_store %arg6[%c0_61, %c0_62], %52 {strides = array<i32>} : memref<128x128xf32, #tpu.memory_space<vmem>>, vector<128x128xf32>,
    %c0_63 = arith.constant 0 : index
    %c21 = arith.constant 21 : index
    %c0_64 = arith.constant 0 : index
    %54 = vector.load %arg1[%c0_63, %c21, %c0_64] : memref<1x160x128xbf16, #tpu.memory_space<vmem>>, vector<1x128x128xbf16>
    %55 = vector.shape_cast %54 : vector<1x128x128xbf16> to vector<128x128xbf16>
    %c7 = arith.constant 7 : index
    %c0_65 = arith.constant 0 : index
    %c0_66 = arith.constant 0 : index
    %56 = vector.load %arg2[%c7, %c0_65, %c0_66] : memref<9x128x128xbf16, #tpu.memory_space<vmem>>, vector<1x128x128xbf16>
    %57 = vector.shape_cast %56 : vector<1x128x128xbf16> to vector<128x128xbf16>
    %cst_67 = arith.constant dense<0.000000e+00> : vector<128x128xf32>
    %58 = tpu.matmul %55, %57, %cst_67 {dimension_numbers = #tpu.dot_dimension_numbers<[1], [0], [0], [1], [0, 0, 1, 1], [], []>} : vector<128x128xbf16>, vector<128x128xbf16>, vector<128x128xf32> -> vector<128x128xf32>
    %c0_68 = arith.constant 0 : index
    %c0_69 = arith.constant 0 : index
    %59 = vector.load %arg6[%c0_68, %c0_69] : memref<128x128xf32, #tpu.memory_space<vmem>>, vector<128x128xf32>
    %60 = arith.addf %59, %58 : vector<128x128xf32>
    %c0_70 = arith.constant 0 : index
    %c0_71 = arith.constant 0 : index
    %61 = vector.load %arg6[%c0_70, %c0_71] : memref<128x128xf32, #tpu.memory_space<vmem>>, vector<128x128xf32>
    tpu.vector_store %arg6[%c0_70, %c0_71], %60 {strides = array<i32>} : memref<128x128xf32, #tpu.memory_space<vmem>>, vector<128x128xf32>,
    %c0_72 = arith.constant 0 : index
    %c22 = arith.constant 22 : index
    %c0_73 = arith.constant 0 : index
    %62 = vector.load %arg1[%c0_72, %c22, %c0_73] : memref<1x160x128xbf16, #tpu.memory_space<vmem>>, vector<1x128x128xbf16>
    %63 = vector.shape_cast %62 : vector<1x128x128xbf16> to vector<128x128xbf16>
    %c8 = arith.constant 8 : index
    %c0_74 = arith.constant 0 : index
    %c0_75 = arith.constant 0 : index
    %64 = vector.load %arg2[%c8, %c0_74, %c0_75] : memref<9x128x128xbf16, #tpu.memory_space<vmem>>, vector<1x128x128xbf16>
    %65 = vector.shape_cast %64 : vector<1x128x128xbf16> to vector<128x128xbf16>
    %cst_76 = arith.constant dense<0.000000e+00> : vector<128x128xf32>
    %66 = tpu.matmul %63, %65, %cst_76 {dimension_numbers = #tpu.dot_dimension_numbers<[1], [0], [0], [1], [0, 0, 1, 1], [], []>} : vector<128x128xbf16>, vector<128x128xbf16>, vector<128x128xf32> -> vector<128x128xf32>
    %c0_77 = arith.constant 0 : index
    %c0_78 = arith.constant 0 : index
    %67 = vector.load %arg6[%c0_77, %c0_78] : memref<128x128xf32, #tpu.memory_space<vmem>>, vector<128x128xf32>
    %68 = arith.addf %67, %66 : vector<128x128xf32>
    %c0_79 = arith.constant 0 : index
    %c0_80 = arith.constant 0 : index
    %69 = vector.load %arg6[%c0_79, %c0_80] : memref<128x128xf32, #tpu.memory_space<vmem>>, vector<128x128xf32>
    tpu.vector_store %arg6[%c0_79, %c0_80], %68 {strides = array<i32>} : memref<128x128xf32, #tpu.memory_space<vmem>>, vector<128x128xf32>,
    %c0_81 = arith.constant 0 : index
    %c0_82 = arith.constant 0 : index
    %70 = vector.load %arg6[%c0_81, %c0_82] : memref<128x128xf32, #tpu.memory_space<vmem>>, vector<128x128xf32>
    %c0_83 = arith.constant 0 : index
    %c0_84 = arith.constant 0 : index
    %71 = vector.load %arg3[%c0_83, %c0_84] : memref<1x128xf32, #tpu.memory_space<vmem>>, vector<1x128xf32>
    %72 = vector.broadcast %71 : vector<1x128xf32> to vector<128x128xf32>
    %73 = arith.mulf %70, %72 : vector<128x128xf32>
    %c0_85 = arith.constant 0 : index
    %c0_86 = arith.constant 0 : index
    %74 = vector.load %arg4[%c0_85, %c0_86] : memref<1x128xf32, #tpu.memory_space<vmem>>, vector<1x128xf32>
    %75 = vector.broadcast %74 : vector<1x128xf32> to vector<128x128xf32>
    %76 = arith.addf %73, %75 : vector<128x128xf32>
    %cst_87 = arith.constant 0.000000e+00 : f32
    %77 = vector.broadcast %cst_87 : f32 to vector<128x128xf32>
    %78 = arith.maximumf %76, %77 : vector<128x128xf32>
    %79 = arith.truncf %78 : vector<128x128xf32> to vector<128x128xbf16>
    %c0_88 = arith.constant 0 : index
    %c0_89 = arith.constant 0 : index
    %80 = vector.load %arg5[%c0_88, %c0_89] : memref<128x128xbf16, #tpu.memory_space<vmem>>, vector<128x128xbf16>
    tpu.vector_store %arg5[%c0_88, %c0_89], %79 {strides = array<i32>} : memref<128x128xbf16, #tpu.memory_space<vmem>>, vector<128x128xbf16>,
    return
  }
  func.func @transform_0(%arg0: i32) -> (i32, i32, i32) {
    %c0_i32 = arith.constant 0 : i32
    %c0_i32_0 = arith.constant 0 : i32
    %c0_i32_1 = arith.constant 0 : i32
    return %arg0, %c0_i32, %c0_i32_0 : i32, i32, i32
  }
  func.func @transform_1(%arg0: i32) -> (i32, i32, i32) {
    %c0_i32 = arith.constant 0 : i32
    %c0_i32_0 = arith.constant 0 : i32
    %c0_i32_1 = arith.constant 0 : i32
    %c0_i32_2 = arith.constant 0 : i32
    return %c0_i32, %c0_i32_0, %c0_i32_1 : i32, i32, i32
  }
  func.func @transform_2(%arg0: i32) -> (i32, i32) {
    %c0_i32 = arith.constant 0 : i32
    %c0_i32_0 = arith.constant 0 : i32
    %c0_i32_1 = arith.constant 0 : i32
    return %c0_i32, %c0_i32_0 : i32, i32
  }
  func.func @transform_3(%arg0: i32) -> (i32, i32) {
    %c0_i32 = arith.constant 0 : i32
    %c0_i32_0 = arith.constant 0 : i32
    %c0_i32_1 = arith.constant 0 : i32
    return %c0_i32, %c0_i32_0 : i32, i32
  }
  func.func @transform_4(%arg0: i32) -> (i32, i32) {
    %c0_i32 = arith.constant 0 : i32
    %c0_i32_0 = arith.constant 0 : i32
    return %arg0, %c0_i32 : i32, i32
  }
}

</mosaic_0001>

<bundles_post_ra>
// kernel: network_block_forward.4
= control target key start
LH: loop header
LB: loop body
LE: loop exit
PB: predicated region body
PF: predicated region fallthrough
CT: control target
= control target key end

     0   :  { %s3937_s27 = smov 0   ;;  %s4523_s0 = inlined_call_operand.vmem [shape: bf16[2,144,128], index: 0, kind: input, shape index: {}]   ;;  %s4524_s1 = inlined_call_operand.vmem [shape: bf16[2,144,128], index: 1, kind: input, shape index: {}]   ;;  %s4525_s2 = inlined_call_operand.vmem [shape: bf16[2,144,128], index: 2, kind: input, shape index: {}]   ;;  %s4526_s3 = inlined_call_operand.vmem [shape: bf16[2,144,128], index: 3, kind: input, shape index: {}]   ;;  %s4527_s4 = inlined_call_operand.vmem [shape: bf16[9,128,128], index: 4, kind: input, shape index: {}]   ;;  %s4528_s5 = inlined_call_operand.vmem [shape: f32[1,128], index: 5, kind: input, shape index: {}]   ;;  %s4529_s6 = inlined_call_operand.vmem [shape: f32[1,128], index: 6, kind: input, shape index: {}]   ;;  %s4530_s7 = inlined_call_operand.vmem [shape: bf16[256,128], index: 7, kind: output, shape index: {0}]   ;;  %s4531_s8 = inlined_call_operand.vmem [shape: f32[256,128], index: 8, kind: output, shape index: {1}]  }
   0x1 LB: > { %s3943_s28 = sadd.s32 4294967295, %s3890_s27   ;;  %p2943_p0 = scmp.ge.s32.totalorder %s3890_s27, 1  ;;  %s3890_s27 = sphi %s3937_s27, %s19_s27  }
   0x2   : > { %p295_p1 = scmp.lt.s32.totalorder %s3890_s27, 3 }
   0x4   : > { %p296_p2 = pnand %p2943_p0, %p295_p1 }
   0x5   : > { %p349_p3 = scmp.lt.s32.totalorder (!%p296_p2), %s3943_s28, 1 }
   0x6   : > { %299 = sbr.rel (%p296_p2) target bundleno = 470 (0x1d6), region = 48 }
   0xb   : > { %v3673_v0 = vld [vmem:[%s4527_s4 + $0x38] sm:$0xff]  ;;  %v3672_v1 = vld [vmem:[%s4527_s4 + $0x30] sm:$0xff]  ;;  %v3671_v2 = vld [vmem:[%s4527_s4 + $0x28] sm:$0xff]  ;;  %s350_s19 = scalar_select %p349_p3, %s3943_s28, 1  ;;  %vm877_vm0 = vsmask.f32 7424 }
   0xc   : > { %3849 = vmatpush.bf16.msra.mxu1 %v3673_v0  ;;  %3850 = vmatpush.bf16.msra.mxu2 %v3673_v0  ;;  %v3670_v3 = vld [vmem:[%s4527_s4 + $0x20] sm:$0xff]  ;;  %v3669_v4 = vld [vmem:[%s4527_s4 + $0x18] sm:$0xff]  ;;  %v3668_v5 = vld [vmem:[%s4527_s4 + $0x10] sm:$0xff]  ;;  %vm2522_vm1 = vcmask 1046528  }
   0xd   : > { %3851 = vmatpush.bf16.msra.mxu3 %v3673_v0  ;;  %509 = vmatpush.bf16.msra.mxu0 %v3673_v0  ;;  %v3667_v6 = vld [vmem:[%s4527_s4 + $0x8] sm:$0xff]  ;;  %s3970_s22 = smul.u32 72, %s350_s19  ;;  %v3666_v7 = vld [vmem:[%s4527_s4] sm:$0xff]  ;;  %v3705_v8 = vld [vmem:[%s4527_s4 + $0xb8] sm:$0xff] }
   0xe   : > { %v3689_v9 = vld [vmem:[%s4527_s4 + $0x78] sm:$0xff]  ;;  %v3704_v16 = vld [vmem:[%s4527_s4 + $0xb0] sm:$0xff]  ;;  %v3703_v20 = vld [vmem:[%s4527_s4 + $0xa8] sm:$0xff] }
   0xf   : > { %s3979_s29 = scalar_lea.vmem %s4523_s0, %s3970_s22  ;;  %v3721_v14 = vld [vmem:[%s4527_s4 + $0xf8] sm:$0xff]  ;;  %v3688_v17 = vld [vmem:[%s4527_s4 + $0x70] sm:$0xff]  ;;  %v3687_v21 = vld [vmem:[%s4527_s4 + $0x68] sm:$0xff]  ;;  %s4094_s20 = scalar_lea.vmem %s4524_s1, %s3970_s22 }
  0x10   : > { %3852 = vmatpush.bf16.msra.mxu1 %v3672_v1  ;;  %3853 = vmatpush.bf16.msra.mxu2 %v3672_v1  ;;  %v3660_v10 = vld [vmem:[%s3979_s29 + $0x10] sm:$0xff]  ;;  %v3662_v11 = vld [vmem:[%s3979_s29 + $0x20] sm:$0xff]  ;;  %v3737_v15 = vld [vmem:[%s4527_s4 + $0x138] sm:$0xff]  ;;  %s4106_s9 = scalar_lea.vmem %s4525_s2, %s3970_s22  ;;  %s4112_s12 = scalar_lea.vmem %s4526_s3, %s3970_s22 }
  0x11   : > { %3854 = vmatpush.bf16.msra.mxu3 %v3672_v1  ;;  %510 = vmatpush.bf16.msra.mxu0 %v3672_v1  ;;  %v3664_v12 = vld [vmem:[%s3979_s29 + $0x30] sm:$0xff]  ;;  %v3658_v13 = vld [vmem:[%s3979_s29] sm:$0xff]  ;;  %v3719_v22 = vld [vmem:[%s4527_s4 + $0xe8] sm:$0xff] }
  0x12   : > { %v3720_v18 = vld [vmem:[%s4527_s4 + $0xf0] sm:$0xff]  ;;  %v3735_v23 = vld [vmem:[%s4527_s4 + $0x128] sm:$0xff]  ;;  %v3702_v24 = vld [vmem:[%s4527_s4 + $0xa0] sm:$0xff] }
  0x13   : > { %v3736_v19 = vld [vmem:[%s4527_s4 + $0x130] sm:$0xff]  ;;  %v3686_v25 = vld [vmem:[%s4527_s4 + $0x60] sm:$0xff]  ;;  %v3701_v28 = vld [vmem:[%s4527_s4 + $0x98] sm:$0xff] }
  0x14   : > { %3855 = vmatpush.bf16.msra.mxu1 %v3671_v2  ;;  %3856 = vmatpush.bf16.msra.mxu2 %v3671_v2  ;;  %v3718_v26 = vld [vmem:[%s4527_s4 + $0xe0] sm:$0xff]  ;;  %v3685_v29 = vld [vmem:[%s4527_s4 + $0x58] sm:$0xff]  ;;  %v3663_v31 = vld [vmem:[%s3979_s29 + $0x28] sm:$0xff] }
  0x15   : > { %3857 = vmatpush.bf16.msra.mxu3 %v3671_v2  ;;  %511 = vmatpush.bf16.msra.mxu0 %v3671_v2  ;;  %v3734_v27 = vld [vmem:[%s4527_s4 + $0x120] sm:$0xff]  ;;  %v3661_v30 = vld [vmem:[%s3979_s29 + $0x18] sm:$0xff]  ;;  %v3659_v33 = vld [vmem:[%s3979_s29 + $0x8] sm:$0xff] }
  0x16   : > { %v3665_v32 = vld [vmem:[%s3979_s29 + $0x38] sm:$0xff]  ;;  %v3690_v34 = vld [vmem:[%s3979_s29] sm:$0xff]  ;;  %v3700_v37 = vld [vmem:[%s4527_s4 + $0x90] sm:$0xff] }
  0x17   : > { %v3717_v35 = vld [vmem:[%s4527_s4 + $0xd8] sm:$0xff]  ;;  %v3684_v38 = vld [vmem:[%s4527_s4 + $0x50] sm:$0xff]  ;;  %v4057_v39 = vld [vmem:[%s3979_s29 + $0x8] sm:$0xff]  ;;  %v881_v40 = vshll.u32 %v3690_v34, 16  ;;  %v879_v45 = vshrl.u32 %v3690_v34, 16 }
  0x18   : > { %3858 = vmatpush.bf16.msra.mxu1 %v3670_v3  ;;  %3859 = vmatpush.bf16.msra.mxu2 %v3670_v3  ;;  %v3733_v36 = vld [vmem:[%s4527_s4 + $0x118] sm:$0xff]  ;;  %v3716_v41 = vld [vmem:[%s4527_s4 + $0xd0] sm:$0xff]  ;;  %v3699_v43 = vld [vmem:[%s4527_s4 + $0x88] sm:$0xff]  ;;  %v886_v47 = vshll.u32 %v4057_v39, 16 }
  0x19   : > { %3860 = vmatpush.bf16.msra.mxu3 %v3670_v3  ;;  %512 = vmatpush.bf16.msra.mxu0 %v3670_v3  ;;  %v3732_v42 = vld [vmem:[%s4527_s4 + $0x110] sm:$0xff]  ;;  %v3683_v44 = vld [vmem:[%s4527_s4 + $0x48] sm:$0xff]  ;;  %v883_v46 = vrot.slane %v881_v40, 1  ;;  %v3698_v50 = vld [vmem:[%s4527_s4 + $0x80] sm:$0xff] }
  0x1a   : > { %v3715_v48 = vld [vmem:[%s4527_s4 + $0xc8] sm:$0xff]  ;;  %v3682_v51 = vld [vmem:[%s4527_s4 + $0x40] sm:$0xff]  ;;  %v3769_v52 = vld [vmem:[%s4527_s4 + $0x1b8] sm:$0xff]  ;;  %v888_v55 = vrot.slane %v886_v47, 1 }
  0x1b   : > { %v3731_v49 = vld [vmem:[%s4527_s4 + $0x108] sm:$0xff]  ;;  %v3753_v53 = vld [vmem:[%s4527_s4 + $0x178] sm:$0xff]  ;;  %v884_v54 = vor.u32 %v883_v46, %v879_v45  ;;  %v3714_v56 = vld [vmem:[%s4527_s4 + $0xc0] sm:$0xff] }
  0x1c   : > { %3861 = vmatpush.bf16.msra.mxu1 %v3669_v4  ;;  %3862 = vmatpush.bf16.msra.mxu2 %v3669_v4  ;;  %v3730_v57 = vld [vmem:[%s4527_s4 + $0x100] sm:$0xff]  ;;  %v3785_v58 = vld [vmem:[%s4527_s4 + $0x1f8] sm:$0xff]  ;;  %v3768_v0 = vld [vmem:[%s4527_s4 + $0x1b0] sm:$0xff] }
  0x1d   : > { %3863 = vmatpush.bf16.msra.mxu3 %v3669_v4  ;;  %513 = vmatpush.bf16.msra.mxu0 %v3669_v4  ;;  %v3801_v59 = vld [vmem:[%s4527_s4 + $0x238] sm:$0xff]  ;;  %v3674_v60 = vld [vmem:[%s4094_s20] sm:$0xff]  ;;  %v889_v61 = vsel %vm877_vm0, %v884_v54, %v888_v55  ;;  %v3752_v1 = vld [vmem:[%s4527_s4 + $0x170] sm:$0xff] }
  0x1e   : > { %v3706_v62 = vld [vmem:[%s4106_s9] sm:$0xff]  ;;  %v3784_v2 = vld [vmem:[%s4527_s4 + $0x1f0] sm:$0xff]  ;;  %v3797_v34 = vld [vmem:[%s4527_s4 + $0x218] sm:$0xff] }
  0x1f   : > { %v3722_v63 = vld [vmem:[%s4112_s12] sm:$0xff]  ;;  %v3800_v3 = vld [vmem:[%s4527_s4 + $0x230] sm:$0xff] }
  0x20   : > { %3864 = vmatpush.bf16.msra.mxu1 %v3668_v5  ;;  %3865 = vmatpush.bf16.msra.mxu2 %v3668_v5  ;;  %v3692_v4 = vld [vmem:[%s3979_s29 + $0x10] sm:$0xff]  ;;  %v3710_v54 = vld [vmem:[%s4106_s9 + $0x20] sm:$0xff] }
  0x21   : > { %3866 = vmatpush.bf16.msra.mxu3 %v3668_v5  ;;  %514 = vmatpush.bf16.msra.mxu0 %v3668_v5  ;;  %v3767_v5 = vld [vmem:[%s4527_s4 + $0x1a8] sm:$0xff]  ;;  %v3780_v45 = vld [vmem:[%s4527_s4 + $0x1d0] sm:$0xff] }
  0x22   : > { %v3748_v46 = vld [vmem:[%s4527_s4 + $0x150] sm:$0xff] }
  0x23   : > { %v3796_v47 = vld [vmem:[%s4527_s4 + $0x210] sm:$0xff] }
  0x24   : > { %3867 = vmatpush.bf16.msra.mxu1 %v3667_v6  ;;  %3868 = vmatpush.bf16.msra.mxu2 %v3667_v6 }
  0x25   : > { %3869 = vmatpush.bf16.msra.mxu3 %v3667_v6  ;;  %515 = vmatpush.bf16.msra.mxu0 %v3667_v6  ;;  %v3751_v6 = vld [vmem:[%s4527_s4 + $0x168] sm:$0xff] }
  0x28   : > { %3870 = vmatpush.bf16.msra.mxu1 %v3666_v7  ;;  %3871 = vmatpush.bf16.msra.mxu2 %v3666_v7 }
  0x29   : > { %3872 = vmatpush.bf16.msra.mxu3 %v3666_v7  ;;  %516 = vmatpush.bf16.msra.mxu0 %v3666_v7  ;;  %v3783_v7 = vld [vmem:[%s4527_s4 + $0x1e8] sm:$0xff] }
  0x2b   : > { %527 = vmatmul.bf16.vlgmr.msra.gmra.mxu1 %v3660_v10  ;;  %537 = vmatmul.bf16.vlgmr.msra.gmra.mxu2 %v3662_v11  ;;  %v894_v10 = vshll.u32 %v3692_v4, 16 }
  0x2c   : > { %1002 = vmatpush.bf16.msrb.mxu2 %v3705_v8  ;;  %703 = vmatpush.bf16.msrb.mxu1 %v3689_v9  ;;  %v3799_v8 = vld [vmem:[%s4527_s4 + $0x228] sm:$0xff]  ;;  %v890_v9 = vshrl.u32 %v4057_v39, 16  ;;  %v3677_v39 = vld [vmem:[%s4094_s20 + $0x18] sm:$0xff] }
  0x2d   : > { %547 = vmatmul.bf16.vlgmr.msra.gmra.mxu3 %v3664_v12  ;;  %517 = vmatmul.bf16.vlgmr.msra.gmra.mxu0 %v3658_v13  ;;  %v896_v12 = vrot.slane %v894_v10, 1  ;;  %v3675_v13 = vld [vmem:[%s4094_s20 + $0x8] sm:$0xff] }
  0x2e   : > { %1228 = vmatpush.bf16.msrb.mxu3 %v3721_v14  ;;  %1454 = vmatpush.bf16.msrb.mxu0 %v3737_v15  ;;  %v892_v11 = vor.u32 %v890_v9, %v888_v55  ;;  %v3707_v15 = vld [vmem:[%s4106_s9 + $0x8] sm:$0xff]  ;;  %v3726_v55 = vld [vmem:[%s4112_s12 + $0x20] sm:$0xff] }
  0x30   : > { %1003 = vmatpush.bf16.msrb.mxu2 %v3704_v16  ;;  %704 = vmatpush.bf16.msrb.mxu1 %v3688_v17  ;;  %v897_v14 = vsel %vm877_vm0, %v892_v11, %v896_v12  ;;  %v3723_v16 = vld [vmem:[%s4112_s12 + $0x8] sm:$0xff]  ;;  %v3693_v17 = vld [vmem:[%s3979_s29 + $0x18] sm:$0xff]  ;;  %v3794_v11 = vld [vmem:[%s4527_s4 + $0x200] sm:$0xff] }
  0x32   : > { %1229 = vmatpush.bf16.msrb.mxu3 %v3720_v18  ;;  %1455 = vmatpush.bf16.msrb.mxu0 %v3736_v19  ;;  %v3766_v18 = vld [vmem:[%s4527_s4 + $0x1a0] sm:$0xff] }
  0x33   : > { %v3782_v19 = vld [vmem:[%s4527_s4 + $0x1e0] sm:$0xff] }
  0x34   : > { %1004 = vmatpush.bf16.msrb.mxu2 %v3703_v20  ;;  %705 = vmatpush.bf16.msrb.mxu1 %v3687_v21  ;;  %v3750_v20 = vld [vmem:[%s4527_s4 + $0x160] sm:$0xff] }
  0x35   : > { %v3798_v21 = vld [vmem:[%s4527_s4 + $0x220] sm:$0xff] }
  0x36   : > { %1230 = vmatpush.bf16.msrb.mxu3 %v3719_v22  ;;  %1456 = vmatpush.bf16.msrb.mxu0 %v3735_v23  ;;  %v898_v22 = vshrl.u32 %v3692_v4, 16  ;;  %v902_v23 = vshll.u32 %v3693_v17, 16  ;;  %v3727_v4 = vld [vmem:[%s4112_s12 + $0x28] sm:$0xff] }
  0x38   : > { %1005 = vmatpush.bf16.msrb.mxu2 %v3702_v24  ;;  %706 = vmatpush.bf16.msrb.mxu1 %v3686_v25  ;;  %v900_v24 = vor.u32 %v898_v22, %v896_v12  ;;  %v904_v25 = vrot.slane %v902_v23, 1 }
  0x3a   : > { %1231 = vmatpush.bf16.msrb.mxu3 %v3718_v26  ;;  %1457 = vmatpush.bf16.msrb.mxu0 %v3734_v27  ;;  %v3676_v26 = vld [vmem:[%s4094_s20 + $0x10] sm:$0xff]  ;;  %v905_v27 = vsel %vm877_vm0, %v900_v24, %v904_v25 }
  0x3b   : > { %532 = vmatmul.bf16.gmra.mxu1 %v3661_v30  ;;  %542 = vmatmul.bf16.gmra.mxu2 %v3663_v31  ;;  %v3694_v30 = vld [vmem:[%s3979_s29 + $0x20] sm:$0xff]  ;;  %v3765_v31 = vld [vmem:[%s4527_s4 + $0x198] sm:$0xff] }
  0x3c   : > { %1006 = vmatpush.bf16.msrb.mxu2 %v3701_v28  ;;  %707 = vmatpush.bf16.msrb.mxu1 %v3685_v29  ;;  %v3708_v28 = vld [vmem:[%s4106_s9 + $0x10] sm:$0xff] }
  0x3d   : > { %552 = vmatmul.bf16.gmra.mxu3 %v3665_v32  ;;  %522 = vmatmul.bf16.gmra.mxu0 %v3659_v33  ;;  %v3724_v29 = vld [vmem:[%s4112_s12 + $0x10] sm:$0xff]  ;;  %v3781_v32 = vld [vmem:[%s4527_s4 + $0x1d8] sm:$0xff] }
  0x3e   : > { %1232 = vmatpush.bf16.msrb.mxu3 %v3717_v35  ;;  %1458 = vmatpush.bf16.msrb.mxu0 %v3733_v36  ;;  %v3749_v33 = vld [vmem:[%s4527_s4 + $0x158] sm:$0xff]  ;;  %v906_v35 = vshrl.u32 %v3693_v17, 16  ;;  %v910_v36 = vshll.u32 %v3694_v30, 16 }
  0x40   : > { %1007 = vmatpush.bf16.msrb.mxu2 %v3700_v37  ;;  %708 = vmatpush.bf16.msrb.mxu1 %v3684_v38  ;;  %v908_v37 = vor.u32 %v906_v35, %v904_v25  ;;  %v912_v38 = vrot.slane %v910_v36, 1 }
  0x42   : > { %1233 = vmatpush.bf16.msrb.mxu3 %v3716_v41  ;;  %1459 = vmatpush.bf16.msrb.mxu0 %v3732_v42  ;;  %v913_v40 = vsel %vm877_vm0, %v908_v37, %v912_v38  ;;  %v3709_v41 = vld [vmem:[%s4106_s9 + $0x18] sm:$0xff] }
  0x43   : > { %v3725_v42 = vld [vmem:[%s4112_s12 + $0x18] sm:$0xff] }
  0x44   : > { %1008 = vmatpush.bf16.msrb.mxu2 %v3699_v43  ;;  %709 = vmatpush.bf16.msrb.mxu1 %v3683_v44  ;;  %v3695_v43 = vld [vmem:[%s3979_s29 + $0x28] sm:$0xff]  ;;  %v3764_v44 = vld [vmem:[%s4527_s4 + $0x190] sm:$0xff]  ;;  %v3713_v37 = vld [vmem:[%s4106_s9 + $0x38] sm:$0xff] }
  0x46   : > { %1234 = vmatpush.bf16.msrb.mxu3 %v3715_v48  ;;  %1460 = vmatpush.bf16.msrb.mxu0 %v3731_v49  ;;  %v914_v48 = vshrl.u32 %v3694_v30, 16  ;;  %v918_v49 = vshll.u32 %v3695_v43, 16 }
  0x48   : > { %1009 = vmatpush.bf16.msrb.mxu2 %v3698_v50  ;;  %710 = vmatpush.bf16.msrb.mxu1 %v3682_v51  ;;  %v916_v50 = vor.u32 %v914_v48, %v912_v38  ;;  %v920_v51 = vrot.slane %v918_v49, 1  ;;  %v3729_v38 = vld [vmem:[%s4112_s12 + $0x38] sm:$0xff]  ;;  %v3594_v49 = vld [vmem:[%s3979_s29 + $0x4] sm:$0xe] }
  0x4a   : > { %1235 = vmatpush.bf16.msrb.mxu3 %v3714_v56  ;;  %1461 = vmatpush.bf16.msrb.mxu0 %v3730_v57  ;;  %v3696_v56 = vld [vmem:[%s3979_s29 + $0x30] sm:$0xff]  ;;  %v3763_v57 = vld [vmem:[%s4527_s4 + $0x188] sm:$0xff] }
  0x4b   : > { %711 = vmatmul.bf16.vlgmr.msrb.gmra.mxu1 %v3674_v60  ;;  %1010 = vmatmul.bf16.vlgmr.msrb.gmra.mxu2 %v889_v61  ;;  %v922_v60 = vshrl.u32 %v3695_v43, 16  ;;  %v926_v61 = vshll.u32 %v3696_v56, 16  ;;  %v930_v9 = vshrl.u32 %v3696_v56, 16  ;;  %v4268_v43 = vld [vmem:[%s4106_s9 + $0x8] sm:$0xff] }
  0x4c   : > { %2050 = vmatpush.bf16.msra.mxu2 %v3769_v52  ;;  %1752 = vmatpush.bf16.msra.mxu1 %v3753_v53  ;;  %v3678_v52 = vld [vmem:[%s4094_s20 + $0x20] sm:$0xff]  ;;  %v921_v53 = vsel %vm877_vm0, %v916_v50, %v920_v51  ;;  %v3786_v50 = vld [vmem:[%s3979_s29 + $0x4] sm:$0xf0] }
  0x4d   : > { %1236 = vmatmul.bf16.vlgmr.msrb.gmra.mxu3 %v3706_v62  ;;  %1462 = vmatmul.bf16.vlgmr.msrb.gmra.mxu0 %v3722_v63  ;;  %v3795_v62 = vld [vmem:[%s4527_s4 + $0x208] sm:$0xff]  ;;  %v924_v63 = vor.u32 %v922_v60, %v920_v51 }
  0x4e   : > { %2348 = vmatpush.bf16.msra.mxu3 %v3785_v58  ;;  %2596 = vmatpush.bf16.msra.mxu0 %v3801_v59  ;;  %v3779_v58 = vld [vmem:[%s4527_s4 + $0x1c8] sm:$0xff] }
  0x4f   : > { %v3747_v59 = vld [vmem:[%s4527_s4 + $0x148] sm:$0xff] }
  0x50   : > { %2051 = vmatpush.bf16.msra.mxu2 %v3768_v0  ;;  %1753 = vmatpush.bf16.msra.mxu1 %v3752_v1  ;;  %v928_v0 = vrot.slane %v926_v61, 1  ;;  %v3679_v1 = vld [vmem:[%s4094_s20 + $0x28] sm:$0xff] }
  0x52   : > { %2349 = vmatpush.bf16.msra.mxu3 %v3784_v2  ;;  %2597 = vmatpush.bf16.msra.mxu0 %v3800_v3  ;;  %v929_v2 = vsel %vm877_vm0, %v924_v63, %v928_v0  ;;  %v3711_v3 = vld [vmem:[%s4106_s9 + $0x28] sm:$0xff]  ;;  %v932_v12 = vor.u32 %v930_v9, %v928_v0  ;;  %v3595_v0 = vor.u32 %v3786_v50, %v3594_v49 }
  0x53   : > { %v3787_v63 = vld [vmem:[%s3979_s29 + $0xc] sm:$0xff] }
  0x54   : > { %2052 = vmatpush.bf16.msra.mxu2 %v3767_v5  ;;  %1754 = vmatpush.bf16.msra.mxu1 %v3751_v6  ;;  %v3697_v5 = vld [vmem:[%s3979_s29 + $0x38] sm:$0xff]  ;;  %v3762_v6 = vld [vmem:[%s4527_s4 + $0x180] sm:$0xff] }
  0x55   : > { %v934_v10 = vshll.u32 %v3697_v5, 16 }
  0x56   : > { %2350 = vmatpush.bf16.msra.mxu3 %v3783_v7  ;;  %2598 = vmatpush.bf16.msra.mxu0 %v3799_v8  ;;  %v3778_v7 = vld [vmem:[%s4527_s4 + $0x1c0] sm:$0xff] }
  0x57   : > { %v3746_v8 = vld [vmem:[%s4527_s4 + $0x140] sm:$0xff] }
  0x58   : > { %2053 = vmatpush.bf16.msra.mxu2 %v3766_v18  ;;  %1755 = vmatpush.bf16.msra.mxu1 %v3750_v20  ;;  %v3712_v18 = vld [vmem:[%s4106_s9 + $0x30] sm:$0xff] }
  0x5a   : > { %2351 = vmatpush.bf16.msra.mxu3 %v3782_v19  ;;  %2599 = vmatpush.bf16.msra.mxu0 %v3798_v21  ;;  %v3728_v19 = vld [vmem:[%s4112_s12 + $0x30] sm:$0xff] }
  0x5b   : > { %716 = vmatmul.bf16.gmra.mxu1 %v3675_v13  ;;  %1015 = vmatmul.bf16.gmra.mxu2 %v897_v14  ;;  %v936_v13 = vrot.slane %v934_v10, 1  ;;  %v816_v14 = vld [vmem:[%s3979_s29 + $0x40] sm:$0x1] }
  0x5c   : > { %2054 = vmatpush.bf16.msra.mxu2 %v3765_v31  ;;  %1756 = vmatpush.bf16.msra.mxu1 %v3749_v33  ;;  %v867_v20 = vunpack.c.l.b16 %v816_v14  ;;  %v3681_v33 = vld [vmem:[%s4094_s20 + $0x38] sm:$0xff] }
  0x5d   : > { %1241 = vmatmul.bf16.gmra.mxu3 %v3707_v15  ;;  %1467 = vmatmul.bf16.gmra.mxu0 %v3723_v16  ;;  %v3680_v15 = vld [vmem:[%s4094_s20 + $0x30] sm:$0xff]  ;;  %v937_v17 = vsel %vm877_vm0, %v932_v12, %v936_v13 }
  0x5e   : > { %2352 = vmatpush.bf16.msra.mxu3 %v3781_v32  ;;  %2600 = vmatpush.bf16.msra.mxu0 %v3797_v34  ;;  %v876_v22 = vpack.c.b16 %v867_v20, %v867_v20  ;;  %v3738_v34 = vld [vmem:[%s4106_s9] sm:$0xff]  ;;  %v3756_v20 = vld [vmem:[%s3979_s29 + $0x14] sm:$0xff] }
  0x60   : > { %2055 = vmatpush.bf16.msra.mxu2 %v3764_v44  ;;  %1757 = vmatpush.bf16.msra.mxu1 %v3748_v46  ;;  %v4271_v44 = vld [vmem:[%s3979_s29 + $0xc] sm:$0xff] }
  0x61   : > { %v4274_v46 = vld [vmem:[%s4094_s20 + $0xc] sm:$0xff] }
  0x62   : > { %2353 = vmatpush.bf16.msra.mxu3 %v3780_v45  ;;  %2601 = vmatpush.bf16.msra.mxu0 %v3796_v47 }
  0x64   : > { %2056 = vmatpush.bf16.msra.mxu2 %v3763_v57  ;;  %1758 = vmatpush.bf16.msra.mxu1 %v3747_v59 }
  0x66   : > { %2354 = vmatpush.bf16.msra.mxu3 %v3779_v58  ;;  %2602 = vmatpush.bf16.msra.mxu0 %v3795_v62  ;;  %v1934_v58 = vshll.u32 %v4271_v44, 16  ;;  %v2232_v62 = vshll.u32 %v4274_v46, 16 }
  0x68   : > { %2057 = vmatpush.bf16.msra.mxu2 %v3762_v6  ;;  %1759 = vmatpush.bf16.msra.mxu1 %v3746_v8  ;;  %v2234_v6 = vrot.slane %v2232_v62, 1  ;;  %v2524_v8 = vrot.slane %v3787_v63, 1 }
  0x6a   : > { %2355 = vmatpush.bf16.msra.mxu3 %v3778_v7  ;;  %2603 = vmatpush.bf16.msra.mxu0 %v3794_v11  ;;  %v2523_v7 = vrot.slane %v3595_v0, 1 }
  0x6b   : > { %721 = vmatmul.bf16.gmra.mxu1 %v3676_v26  ;;  %1020 = vmatmul.bf16.gmra.mxu2 %v905_v27  ;;  %v938_v26 = vshrl.u32 %v3697_v5, 16  ;;  %v942_v27 = vshll.u32 %v876_v22, 16  ;;  %v3772_v22 = vld [vmem:[%s4094_s20 + $0x14] sm:$0xff] }
  0x6d   : > { %1246 = vmatmul.bf16.gmra.mxu3 %v3708_v28  ;;  %1472 = vmatmul.bf16.gmra.mxu0 %v3724_v29  ;;  %v940_v29 = vor.u32 %v938_v26, %v936_v13  ;;  %v944_v30 = vrot.slane %v942_v27, 1 }
  0x6f   : > { %v945_v36 = vsel %vm877_vm0, %v940_v29, %v944_v30 }
  0x7b   : > { %726 = vmatmul.bf16.gmra.mxu1 %v3677_v39  ;;  %1025 = vmatmul.bf16.gmra.mxu2 %v913_v40  ;;  %v3754_v39 = vld [vmem:[%s3979_s29 + $0x4] sm:$0xff] }
  0x7c   : > { %v1929_v45 = vshll.u32 %v3754_v39, 16  ;;  %v1927_v56 = vshrl.u32 %v3754_v39, 16 }
  0x7d   : > { %1251 = vmatmul.bf16.gmra.mxu3 %v3709_v41  ;;  %1477 = vmatmul.bf16.gmra.mxu0 %v3725_v42  ;;  %v3770_v41 = vld [vmem:[%s4094_s20 + $0x4] sm:$0xff]  ;;  %v1631_v42 = vshll.u32 %v3738_v34, 16 }
  0x7e   : > { %v2227_v47 = vshll.u32 %v3770_v41, 16  ;;  %v1931_v57 = vrot.slane %v1929_v45, 1  ;;  %v2225_v60 = vshrl.u32 %v3770_v41, 16  ;;  %v2236_v41 = vshrl.u32 %v4274_v46, 16  ;;  %v3788_v45 = vld [vmem:[%s3979_s29 + $0x14] sm:$0xff] }
  0x80   : > { %v2229_v61 = vrot.slane %v2227_v47, 1 }
  0x82   : > { %v2230_v5 = vor.u32 %v2229_v61, %v2225_v60 }
  0x8b   : > { %731 = vmatmul.bf16.gmra.mxu1 %v3678_v52  ;;  %1030 = vmatmul.bf16.gmra.mxu2 %v921_v53  ;;  %v1629_v52 = vshrl.u32 %v3738_v34, 16  ;;  %v1633_v53 = vrot.slane %v1631_v42, 1  ;;  %v1938_v34 = vshrl.u32 %v4271_v44, 16  ;;  %v2240_v42 = vshll.u32 %v3772_v22, 16 }
  0x8d   : > { %1256 = vmatmul.bf16.gmra.mxu3 %v3710_v54  ;;  %1482 = vmatmul.bf16.gmra.mxu0 %v3726_v55  ;;  %v1636_v55 = vshll.u32 %v4268_v43, 16 }
  0x9b   : > { %736 = vmatmul.bf16.gmra.mxu1 %v3679_v1  ;;  %1035 = vmatmul.bf16.gmra.mxu2 %v929_v2  ;;  %v1634_v1 = vor.u32 %v1633_v53, %v1629_v52  ;;  %v1638_v2 = vrot.slane %v1636_v55, 1  ;;  %v2238_v55 = vor.u32 %v2236_v41, %v2234_v6 }
  0x9d   : > { %1261 = vmatmul.bf16.gmra.mxu3 %v3711_v3  ;;  %1487 = vmatmul.bf16.gmra.mxu0 %v3727_v4  ;;  %v1932_v3 = vor.u32 %v1931_v57, %v1927_v56  ;;  %v1936_v4 = vrot.slane %v1934_v58, 1  ;;  %v1639_v12 = vsel %vm877_vm0, %v1634_v1, %v1638_v2  ;;  %v2526_v56 = vrot.slane %v3788_v45, 1 }
  0x9f   : > { %v1937_v13 = vsel %vm877_vm0, %v1932_v3, %v1936_v4  ;;  %v1940_v52 = vor.u32 %v1938_v34, %v1936_v4  ;;  %v2527_v1 = vsel %vm2522_vm1, %v2524_v8, %v2526_v56  ;;  %v3741_v3 = vld [vmem:[%s4106_s9 + $0x18] sm:$0xff] }
  0xa0   : > { %v3757_v4 = vld [vmem:[%s3979_s29 + $0x1c] sm:$0xff] }
  0xa8   : > { %v4237_v16 = vpop.f32.mrf.mxu1 }
  0xaa   : > { %v4242_v21 = vpop.f32.mrf.mxu0 }
  0xab   : > { %741 = vmatmul.bf16.gmra.mxu1 %v3680_v15  ;;  %1040 = vmatmul.bf16.gmra.mxu2 %v937_v17  ;;  %v2235_v17 = vsel %vm877_vm0, %v2230_v5, %v2234_v6  ;;  %v3773_v5 = vld [vmem:[%s4094_s20 + $0x1c] sm:$0xff] }
  0xad   : > { %1266 = vmatmul.bf16.gmra.mxu3 %v3712_v18  ;;  %1492 = vmatmul.bf16.gmra.mxu0 %v3728_v19  ;;  %v2525_v18 = vsel %vm2522_vm1, %v2523_v7, %v2524_v8  ;;  %v3740_v19 = vld [vmem:[%s4106_s9 + $0x10] sm:$0xff] }
  0xae   : > { %v4244_v23 = vpop.f32.mrf.mxu2 }
  0xb0   : > { %v4246_v24 = vpop.f32.mrf.mxu3  ;;  %v4248_v25 = vpop.f32.mrf.mxu1 }
  0xb2   : > { %v4250_v28 = vpop.f32.mrf.mxu0 }
  0xb6   : > { %v4252_v31 = vpop.f32.mrf.mxu2 }
  0xb8   : > { %v4254_v32 = vpop.f32.mrf.mxu3  ;;  %v4258_v35 = vpop.f32.mrf.mxu1 }
  0xba   : > { %v4264_v40 = vpop.f32.mrf.mxu0 }
  0xbb   : > { %746 = vmatmul.bf16.gmra.mxu1 %v3681_v33  ;;  %1045 = vmatmul.bf16.gmra.mxu2 %v945_v36  ;;  %v1640_v33 = vshrl.u32 %v4268_v43, 16  ;;  %v1942_v36 = vshll.u32 %v3756_v20, 16  ;;  %v2242_v43 = vrot.slane %v2240_v42, 1 }
  0xbd   : > { %1271 = vmatmul.bf16.gmra.mxu3 %v3713_v37  ;;  %1497 = vmatmul.bf16.gmra.mxu0 %v3729_v38  ;;  %v1642_v49 = vor.u32 %v1640_v33, %v1638_v2  ;;  %v1944_v53 = vrot.slane %v1942_v36, 1  ;;  %v2243_v0 = vsel %vm877_vm0, %v2238_v55, %v2242_v43 }
  0xbe   : > { %v4276_v48 = vpop.f32.mrf.mxu2 }
  0xbf   : > { %v1945_v60 = vsel %vm877_vm0, %v1940_v52, %v1944_v53 }
  0xc0   : > { %v4280_v51 = vpop.f32.mrf.mxu3  ;;  %v4282_v54 = vpop.f32.mrf.mxu1 }
  0xc2   : > { %v4286_v59 = vpop.f32.mrf.mxu0 }
  0xc6   : > { %v4290_v9 = vpop.f32.mrf.mxu2 }
  0xc8   : > { %v4292_v10 = vpop.f32.mrf.mxu3  ;;  %v712_v11 = vpop.f32.mrf.mxu1 }
  0xc9   : > { %v768_v14 = vadd.f32 %v712_v11, %v4242_v21  ;;  %v1644_v21 = vshll.u32 %v3740_v19, 16 }
  0xca   : > { %v1463_v15 = vpop.f32.mrf.mxu0 }
  0xcb   : > { %1760 = vmatmul.bf16.vlgmr.msra.gmra.mxu1 %v1639_v12  ;;  %2058 = vmatmul.bf16.vlgmr.msra.gmra.mxu2 %v1937_v13  ;;  %v1646_v50 = vrot.slane %v1644_v21, 1  ;;  %v1652_v13 = vshll.u32 %v3741_v3, 16 }
  0xcd   : > { %2356 = vmatmul.bf16.vlgmr.msra.gmra.mxu3 %v2235_v17  ;;  %2604 = vmatmul.bf16.vlgmr.msra.gmra.mxu0 %v2525_v18  ;;  %v1647_v46 = vsel %vm877_vm0, %v1642_v49, %v1646_v50  ;;  %v1654_v21 = vrot.slane %v1652_v13, 1 }
  0xce   : > { %v1011_v26 = vpop.f32.mrf.mxu2 }
  0xcf   : > { %v1067_v27 = vadd.f32 %v1011_v26, %v768_v14  ;;  %v1946_v14 = vshrl.u32 %v3756_v20, 16  ;;  %v2244_v26 = vshrl.u32 %v3772_v22, 16 }
  0xd0   : > { %v1237_v29 = vpop.f32.mrf.mxu3  ;;  %v714_v30 = vpop.f32.mrf.mxu1 }
  0xd1   : > { %v1293_v37 = vadd.f32 %v1237_v29, %v1067_v27  ;;  %v769_v38 = vadd.f32 %v714_v30, %v4250_v28  ;;  %v2248_v27 = vshll.u32 %v3773_v5, 16  ;;  %v3789_v29 = vld [vmem:[%s3979_s29 + $0x1c] sm:$0xff]  ;;  %v1948_v34 = vor.u32 %v1946_v14, %v1944_v53 }
  0xd2   : > { %v1465_v39 = vpop.f32.mrf.mxu0 }
  0xd3   : > { %v4307_v47 = vadd.f32 %v1463_v15, %v1293_v37  ;;  %v1950_v15 = vshll.u32 %v3757_v4, 16  ;;  %v2246_v37 = vor.u32 %v2244_v26, %v2242_v43  ;;  %v3742_v43 = vld [vmem:[%s4106_s9 + $0x20] sm:$0xff] }
  0xd5   : > { %v1952_v36 = vrot.slane %v1950_v15, 1 }
  0xd6   : > { %v1013_v57 = vpop.f32.mrf.mxu2 }
  0xd7   : > { %v1068_v44 = vadd.f32 %v1013_v57, %v769_v38  ;;  %v2250_v38 = vrot.slane %v2248_v27, 1  ;;  %v1953_v42 = vsel %vm877_vm0, %v1948_v34, %v1952_v36  ;;  %v3758_v57 = vld [vmem:[%s3979_s29 + $0x24] sm:$0xff] }
  0xd8   : > { %v1239_v58 = vpop.f32.mrf.mxu3  ;;  %v717_v28 = vpop.f32.mrf.mxu1 }
  0xd9   : > { %v1294_v61 = vadd.f32 %v1239_v58, %v1068_v44  ;;  %v770_v62 = vadd.f32 %v717_v28, %v4264_v40  ;;  %v1648_v40 = vshrl.u32 %v3740_v19, 16  ;;  %v2251_v52 = vsel %vm877_vm0, %v2246_v37, %v2250_v38  ;;  %v3774_v44 = vld [vmem:[%s4094_s20 + $0x24] sm:$0xff] }
  0xda   : > { %v1468_v63 = vpop.f32.mrf.mxu0 }
  0xdb   : > { %1765 = vmatmul.bf16.gmra.mxu1 %v1647_v46  ;;  %2063 = vmatmul.bf16.gmra.mxu2 %v1945_v60  ;;  %v4314_v2 = vadd.f32 %v1465_v39, %v1294_v61  ;;  %v1650_v33 = vor.u32 %v1648_v40, %v1646_v50  ;;  %v2528_v39 = vrot.slane %v3789_v29, 1  ;;  %v1660_v61 = vshll.u32 %v3742_v43, 16 }
  0xdd   : > { %2361 = vmatmul.bf16.gmra.mxu3 %v2243_v0  ;;  %2609 = vmatmul.bf16.gmra.mxu0 %v2527_v1  ;;  %v1655_v22 = vsel %vm877_vm0, %v1650_v33, %v1654_v21  ;;  %v2529_v53 = vsel %vm2522_vm1, %v2526_v56, %v2528_v39  ;;  %v1662_v13 = vrot.slane %v1660_v61, 1 }
  0xde   : > { %v1016_v6 = vpop.f32.mrf.mxu2 }
  0xdf   : > { %v1069_v7 = vadd.f32 %v1016_v6, %v770_v62  ;;  %v1954_v62 = vshrl.u32 %v3757_v4, 16  ;;  %v2252_v6 = vshrl.u32 %v3773_v5, 16 }
  0xe0   : > { %v1242_v11 = vpop.f32.mrf.mxu3  ;;  %v719_v12 = vpop.f32.mrf.mxu1 }
  0xe1   : > { %v1295_v17 = vadd.f32 %v1242_v11, %v1069_v7  ;;  %v771_v8 = vadd.f32 %v719_v12, %v4286_v59  ;;  %v2256_v7 = vshll.u32 %v3774_v44, 16  ;;  %v3790_v11 = vld [vmem:[%s3979_s29 + $0x24] sm:$0xff]  ;;  %v1956_v14 = vor.u32 %v1954_v62, %v1952_v36 }
  0xe2   : > { %v1470_v18 = vpop.f32.mrf.mxu0 }
  0xe3   : > { %v4321_v30 = vadd.f32 %v1468_v63, %v1295_v17  ;;  %v1958_v63 = vshll.u32 %v3758_v57, 16  ;;  %v2254_v17 = vor.u32 %v2252_v6, %v2250_v38  ;;  %v3743_v38 = vld [vmem:[%s4106_s9 + $0x28] sm:$0xff] }
  0xe5   : > { %v1960_v15 = vrot.slane %v1958_v63, 1 }
  0xe6   : > { %v1018_v19 = vpop.f32.mrf.mxu2 }
  0xe7   : > { %v1070_v20 = vadd.f32 %v1018_v19, %v771_v8  ;;  %v2258_v8 = vrot.slane %v2256_v7, 1  ;;  %v1961_v27 = vsel %vm877_vm0, %v1956_v14, %v1960_v15  ;;  %v3759_v19 = vld [vmem:[%s3979_s29 + $0x2c] sm:$0xff] }
  0xe8   : > { %v1244_v41 = vpop.f32.mrf.mxu3  ;;  %v722_v59 = vpop.f32.mrf.mxu1 }
  0xe9   : > { %v1296_v45 = vadd.f32 %v1244_v41, %v1070_v20  ;;  %v772_v49 = vadd.f32 %v722_v59, %v4237_v16  ;;  %v1656_v16 = vshrl.u32 %v3741_v3, 16  ;;  %v2259_v34 = vsel %vm877_vm0, %v2254_v17, %v2258_v8  ;;  %v3775_v20 = vld [vmem:[%s4094_s20 + $0x2c] sm:$0xff] }
  0xea   : > { %v1473_v50 = vpop.f32.mrf.mxu0  ;;  %v3744_v17 = vld [vmem:[%s4106_s9 + $0x30] sm:$0xff] }
  0xeb   : > { %1770 = vmatmul.bf16.gmra.mxu1 %v1655_v22  ;;  %2068 = vmatmul.bf16.gmra.mxu2 %v1953_v42  ;;  %v4328_v55 = vadd.f32 %v1470_v18, %v1296_v45  ;;  %v1658_v40 = vor.u32 %v1656_v16, %v1654_v21  ;;  %v2530_v18 = vrot.slane %v3790_v11, 1  ;;  %v1668_v45 = vshll.u32 %v3743_v38, 16 }
  0xed   : > { %2366 = vmatmul.bf16.gmra.mxu3 %v2251_v52  ;;  %2614 = vmatmul.bf16.gmra.mxu0 %v2529_v53  ;;  %v1663_v5 = vsel %vm877_vm0, %v1658_v40, %v1662_v13  ;;  %v2531_v36 = vsel %vm2522_vm1, %v2528_v39, %v2530_v18  ;;  %v1670_v61 = vrot.slane %v1668_v45, 1 }
  0xee   : > { %v1021_v58 = vpop.f32.mrf.mxu2 }
  0xef   : > { %v1071_v28 = vadd.f32 %v1021_v58, %v772_v49  ;;  %v1962_v49 = vshrl.u32 %v3758_v57, 16  ;;  %v2260_v58 = vshrl.u32 %v3774_v44, 16 }
  0xf0   : > { %v1247_v46 = vpop.f32.mrf.mxu3  ;;  %v724_v60 = vpop.f32.mrf.mxu1 }
  0xf1   : > { %v1297_v0 = vadd.f32 %v1247_v46, %v1071_v28  ;;  %v773_v56 = vadd.f32 %v724_v60, %v4248_v25  ;;  %v2264_v28 = vshll.u32 %v3775_v20, 16  ;;  %v3791_v46 = vld [vmem:[%s3979_s29 + $0x2c] sm:$0xff]  ;;  %v1964_v62 = vor.u32 %v1962_v49, %v1960_v15 }
  0xf2   : > { %v1475_v1 = vpop.f32.mrf.mxu0 }
  0xf3   : > { %v4335_v12 = vadd.f32 %v1473_v50, %v1297_v0  ;;  %v1966_v50 = vshll.u32 %v3759_v19, 16  ;;  %v2262_v0 = vor.u32 %v2260_v58, %v2258_v8  ;;  %v3760_v8 = vld [vmem:[%s3979_s29 + $0x34] sm:$0xff] }
  0xf5   : > { %v1968_v63 = vrot.slane %v1966_v50, 1 }
  0xf6   : > { %v1023_v3 = vpop.f32.mrf.mxu2 }
  0xf7   : > { %v1072_v4 = vadd.f32 %v1023_v3, %v773_v56  ;;  %v2266_v56 = vrot.slane %v2264_v28, 1  ;;  %v1969_v7 = vsel %vm877_vm0, %v1964_v62, %v1968_v63 }
  0xf8   : > { %v1249_v26 = vpop.f32.mrf.mxu3  ;;  %v727_v25 = vpop.f32.mrf.mxu1 }
  0xf9   : > { %v1298_v29 = vadd.f32 %v1249_v26, %v1072_v4  ;;  %v774_v33 = vadd.f32 %v727_v25, %v4258_v35  ;;  %v1664_v35 = vshrl.u32 %v3742_v43, 16  ;;  %v3776_v4 = vld [vmem:[%s4094_s20 + $0x34] sm:$0xff] }
  0xfa   : > { %v1478_v21 = vpop.f32.mrf.mxu0 }
  0xfb   : > { %1775 = vmatmul.bf16.gmra.mxu1 %v1663_v5  ;;  %2073 = vmatmul.bf16.gmra.mxu2 %v1961_v27  ;;  %v4342_v37 = vadd.f32 %v1475_v1, %v1298_v29  ;;  %v1666_v16 = vor.u32 %v1664_v35, %v1662_v13  ;;  %v2532_v1 = vrot.slane %v3791_v46, 1  ;;  %v2267_v13 = vsel %vm877_vm0, %v2262_v0, %v2266_v56  ;;  %v4375_v0 = vld [vmem:[%s4106_s9 + $0x38] sm:$0xff] }
  0xfc   : > { %v1672_v29 = vshrl.u32 %v3743_v38, 16 }
  0xfd   : > { %2371 = vmatmul.bf16.gmra.mxu3 %v2259_v34  ;;  %2619 = vmatmul.bf16.gmra.mxu0 %v2531_v36  ;;  %v1671_v44 = vsel %vm877_vm0, %v1666_v16, %v1670_v61  ;;  %v2533_v14 = vsel %vm2522_vm1, %v2530_v18, %v2532_v1  ;;  %v1974_v18 = vshll.u32 %v3760_v8, 16 }
  0xfe   : > { %v1026_v41 = vpop.f32.mrf.mxu2  ;;  %v1674_v35 = vor.u32 %v1672_v29, %v1670_v61 }
  0xff   : > { %v1073_v59 = vadd.f32 %v1026_v41, %v774_v33  ;;  %v1676_v33 = vshll.u32 %v3744_v17, 16  ;;  %v2268_v41 = vshrl.u32 %v3775_v20, 16  ;;  %v1976_v49 = vrot.slane %v1974_v18, 1 }
 0x100   : > { %v1252_v22 = vpop.f32.mrf.mxu3  ;;  %v729_v42 = vpop.f32.mrf.mxu1 }
 0x101   : > { %v1299_v52 = vadd.f32 %v1252_v22, %v1073_v59  ;;  %v775_v39 = vadd.f32 %v729_v42, %v4282_v54  ;;  %v2272_v59 = vshll.u32 %v3776_v4, 16  ;;  %v4362_v22 = vld [vmem:[%s3979_s29 + $0x34] sm:$0xff]  ;;  %v1678_v45 = vrot.slane %v1676_v33, 1 }
 0x102   : > { %v1480_v53 = vpop.f32.mrf.mxu0  ;;  %v2534_v38 = vrot.slane %v4362_v22, 1 }
 0x103   : > { %v4349_v60 = vadd.f32 %v1478_v21, %v1299_v52  ;;  %v1970_v21 = vshrl.u32 %v3759_v19, 16  ;;  %v2270_v52 = vor.u32 %v2268_v41, %v2266_v56  ;;  %v1679_v28 = vsel %vm877_vm0, %v1674_v35, %v1678_v45  ;;  %v4378_v56 = vld [vmem:[%s3979_s29 + $0x3c] sm:$0xff]  ;;  %v1865_v41 = vld [vmem:[%s3979_s29 + $0x44] sm:$0x1] }
 0x106   : > { %v1028_v43 = vpop.f32.mrf.mxu2 }
 0x107   : > { %v1074_v57 = vadd.f32 %v1028_v43, %v775_v39  ;;  %v2274_v39 = vrot.slane %v2272_v59, 1  ;;  %v2163_v59 = vld [vmem:[%s4094_s20 + $0x44] sm:$0x1] }
 0x108   : > { %v1254_v6 = vpop.f32.mrf.mxu3  ;;  %v732_v54 = vpop.f32.mrf.mxu1 }
 0x109   : > { %v1300_v11 = vadd.f32 %v1254_v6, %v1074_v57  ;;  %v776_v3 = vadd.f32 %v732_v54, %v4244_v23  ;;  %v1972_v23 = vor.u32 %v1970_v21, %v1968_v63  ;;  %v2275_v62 = vsel %vm877_vm0, %v2270_v52, %v2274_v39  ;;  %v4382_v57 = vld [vmem:[%s4094_s20 + $0x3c] sm:$0xff] }
 0x10a   : > { %v1483_v40 = vpop.f32.mrf.mxu0  ;;  %v1916_v52 = vunpack.c.l.b16 %v1865_v41 }
 0x10b   : > { %1780 = vmatmul.bf16.gmra.mxu1 %v1671_v44  ;;  %2078 = vmatmul.bf16.gmra.mxu2 %v1969_v7  ;;  %v4355_v15 = vadd.f32 %v1480_v53, %v1300_v11  ;;  %v1977_v46 = vsel %vm877_vm0, %v1972_v23, %v1976_v49  ;;  %v1684_v11 = vshll.u32 %v4375_v0, 16 }
 0x10d   : > { %2376 = vmatmul.bf16.gmra.mxu3 %v2267_v13  ;;  %2624 = vmatmul.bf16.gmra.mxu0 %v2533_v14  ;;  %v1982_v13 = vshll.u32 %v4378_v56, 16  ;;  %v1686_v29 = vrot.slane %v1684_v11, 1 }
 0x10e   : > { %v1031_v26 = vpop.f32.mrf.mxu2 }
 0x10f   : > { %v1075_v25 = vadd.f32 %v1031_v26, %v776_v3  ;;  %v2276_v26 = vshrl.u32 %v3776_v4, 16  ;;  %v1984_v33 = vrot.slane %v1982_v13, 1 }
 0x110   : > { %v1257_v5 = vpop.f32.mrf.mxu3  ;;  %v734_v27 = vpop.f32.mrf.mxu1 }
 0x111   : > { %v1301_v34 = vadd.f32 %v1257_v5, %v1075_v25  ;;  %v777_v50 = vadd.f32 %v734_v27, %v4252_v31  ;;  %v2535_v31 = vsel %vm2522_vm1, %v2532_v1, %v2534_v38  ;;  %v1680_v1 = vshrl.u32 %v3744_v17, 16  ;;  %v4388_v25 = vld [vmem:[%s3979_s29 + $0x3c] sm:$0xff] }
 0x112   : > { %v1485_v36 = vpop.f32.mrf.mxu0  ;;  %v2278_v21 = vor.u32 %v2276_v26, %v2274_v39 }
 0x113   : > { %v4364_v42 = vadd.f32 %v1483_v40, %v1301_v34  ;;  %v1978_v40 = vshrl.u32 %v3760_v8, 16  ;;  %v1682_v27 = vor.u32 %v1680_v1, %v1678_v45  ;;  %v2536_v34 = vrot.slane %v4388_v25, 1 }
 0x114   : > { %v1986_v1 = vshrl.u32 %v4378_v56, 16 }
 0x115   : > { %v1980_v17 = vor.u32 %v1978_v40, %v1976_v49 }
 0x116   : > { %v1033_v19 = vpop.f32.mrf.mxu2 }
 0x117   : > { %v1076_v53 = vadd.f32 %v1033_v19, %v777_v50  ;;  %v1687_v50 = vsel %vm877_vm0, %v1682_v27, %v1686_v29  ;;  %v1985_v45 = vsel %vm877_vm0, %v1980_v17, %v1984_v33  ;;  %v1988_v27 = vor.u32 %v1986_v1, %v1984_v33 }
 0x118   : > { %v1259_v20 = vpop.f32.mrf.mxu3  ;;  %v737_v58 = vpop.f32.mrf.mxu1 }
 0x119   : > { %v1302_v16 = vadd.f32 %v1259_v20, %v1076_v53  ;;  %v778_v43 = vadd.f32 %v737_v58, %v4276_v48  ;;  %v2280_v48 = vshll.u32 %v4382_v57, 16  ;;  %v2537_v53 = vsel %vm2522_vm1, %v2534_v38, %v2536_v34  ;;  %v2461_v58 = vld [vmem:[%s3979_s29 + $0x44] sm:$0x1]  ;;  %s2948_s29 = sshll.u32 %s3943_s28, 4 }
 0x11a   : > { %v1488_v61 = vpop.f32.mrf.mxu0  ;;  %v2214_v20 = vunpack.c.l.b16 %v2163_v59  ;;  %v1688_v38 = vshrl.u32 %v4375_v0, 16  ;;  %p370_p4 = scmp.lt.s32.totalorder %s2948_s29, 31 }
 0x11b   : > { %1785 = vmatmul.bf16.gmra.mxu1 %v1679_v28  ;;  %2083 = vmatmul.bf16.gmra.mxu2 %v1977_v46  ;;  %v4372_v63 = vadd.f32 %v1485_v36, %v1302_v16  ;;  %v2282_v18 = vrot.slane %v2280_v48, 1  ;;  %v1567_v36 = vld [vmem:[%s4106_s9 + $0x40] sm:$0x1]  ;;  %v1925_v16 = vpack.c.b16 %v1916_v52, %v1916_v52 }
 0x11c   : > { %v1618_v49 = vunpack.c.l.b16 %v1567_v36  ;;  %s4533_s29 = smov (!%p370_p4, %s2948_s29), 31 }
 0x11d   : > { %2381 = vmatmul.bf16.gmra.mxu3 %v2275_v62  ;;  %2629 = vmatmul.bf16.gmra.mxu0 %v2535_v31  ;;  %v2283_v39 = vsel %vm877_vm0, %v2278_v21, %v2282_v18  ;;  %v2223_v62 = vpack.c.b16 %v2214_v20, %v2214_v20  ;;  %v2512_v31 = vunpack.c.l.b16 %v2461_v58  ;;  %v1990_v11 = vshll.u32 %v1925_v16, 16  ;;  %s2951_s28 = sshll.u32 %s4533_s29, 3  ;;  %s2949_s13 = sshll.u32 %s4533_s29, 2 }
 0x11e   : > { %v1036_v6 = vpop.f32.mrf.mxu2  ;;  %v1627_v46 = vpack.c.b16 %v1618_v49, %v1618_v49  ;;  %s4443_s11 = scalar_lea.vmem %s4531_s8, %s2951_s28  ;;  %s4455_s16 = scalar_lea.vmem %s4530_s7, %s2949_s13 }
 0x11f   : > { %v1077_v54 = vadd.f32 %v1036_v6, %v778_v43  ;;  %v2521_v26 = vpack.c.b16 %v2512_v31, %v2512_v31  ;;  %v1992_v17 = vrot.slane %v1990_v11, 1 }
 0x120   : > { %v1262_v44 = vpop.f32.mrf.mxu3  ;;  %v739_v7 = vpop.f32.mrf.mxu1 }
 0x121   : > { %v1303_v14 = vadd.f32 %v1262_v44, %v1077_v54  ;;  %v779_v8 = vadd.f32 %v739_v7, %v4290_v9  ;;  %v1692_v7 = vshll.u32 %v1627_v46, 16  ;;  %v2538_v36 = vrot.slane %v2521_v26, 1 }
 0x122   : > { %v1490_v3 = vpop.f32.mrf.mxu0 }
 0x123   : > { %v4390_v5 = vadd.f32 %v1488_v61, %v1303_v14  ;;  %v2284_v14 = vshrl.u32 %v4382_v57, 16  ;;  %v1694_v25 = vrot.slane %v1692_v7, 1  ;;  %v1993_v57 = vsel %vm877_vm0, %v1988_v27, %v1992_v17 }
 0x124   : > { %v2539_v33 = vsel %vm2522_vm1, %v2536_v34, %v2538_v36 }
 0x125   : > { %v2286_v21 = vor.u32 %v2284_v14, %v2282_v18 }
 0x126   : > { %v1038_v4 = vpop.f32.mrf.mxu2 }
 0x127   : > { %v1078_v22 = vadd.f32 %v1038_v4, %v779_v8 }
 0x128   : > { %v1264_v35 = vpop.f32.mrf.mxu3  ;;  %v742_v23 = vpop.f32.mrf.mxu1 }
 0x129   : > { %v1304_v19 = vadd.f32 %v1264_v35, %v1078_v22  ;;  %v780_v61 = vadd.f32 %v742_v23, %v4246_v24  ;;  %v1690_v24 = vor.u32 %v1688_v38, %v1686_v29 }
 0x12a   : > { %v1493_v9 = vpop.f32.mrf.mxu0 }
 0x12b   : > { %1790 = vmatmul.bf16.gmra.mxu1 %v1687_v50  ;;  %2088 = vmatmul.bf16.gmra.mxu2 %v1985_v45  ;;  %v4402_v28 = vadd.f32 %v1490_v3, %v1304_v19  ;;  %v2288_v3 = vshll.u32 %v2223_v62, 16  ;;  %v1695_v22 = vsel %vm877_vm0, %v1690_v24, %v1694_v25 }
 0x12d   : > { %2386 = vmatmul.bf16.gmra.mxu3 %v2283_v39  ;;  %2634 = vmatmul.bf16.gmra.mxu0 %v2537_v53  ;;  %v2290_v0 = vrot.slane %v2288_v3, 1 }
 0x12e   : > { %v1041_v43 = vpop.f32.mrf.mxu2 }
 0x12f   : > { %v1079_v6 = vadd.f32 %v1041_v43, %v780_v61  ;;  %v2291_v29 = vsel %vm877_vm0, %v2286_v21, %v2290_v0 }
 0x130   : > { %v1267_v54 = vpop.f32.mrf.mxu3  ;;  %v744_v44 = vpop.f32.mrf.mxu1 }
 0x131   : > { %v1305_v40 = vadd.f32 %v1267_v54, %v1079_v6  ;;  %v781_v8 = vadd.f32 %v744_v44, %v4254_v32  ;;  %v4430_v44 = vld [vmem:[%s4528_s5] ss:$0 sm:$0xff] }
 0x132   : > { %v1495_v13 = vpop.f32.mrf.mxu0 }
 0x133   : > { %v4408_v48 = vadd.f32 %v1493_v9, %v1305_v40 }
 0x136   : > { %v1043_v41 = vpop.f32.mrf.mxu2 }
 0x137   : > { %v1080_v56 = vadd.f32 %v1043_v41, %v781_v8 }
 0x138   : > { %v1269_v4 = vpop.f32.mrf.mxu3  ;;  %v747_v59 = vpop.f32.mrf.mxu1 }
 0x139   : > { %v1306_v35 = vadd.f32 %v1269_v4, %v1080_v56  ;;  %v782_v18 = vadd.f32 %v747_v59, %v4280_v51 }
 0x13a   : > { %v1498_v23 = vpop.f32.mrf.mxu0 }
 0x13b   : > { %1795 = vmatmul.bf16.gmra.mxu1 %v1695_v22  ;;  %2093 = vmatmul.bf16.gmra.mxu2 %v1993_v57  ;;  %v4415_v32 = vadd.f32 %v1495_v13, %v1306_v35 }
 0x13d   : > { %2391 = vmatmul.bf16.gmra.mxu3 %v2291_v29  ;;  %2639 = vmatmul.bf16.gmra.mxu0 %v2539_v33 }
 0x13e   : > { %v1046_v50 = vpop.f32.mrf.mxu2 }
 0x13f   : > { %v1081_v45 = vadd.f32 %v1046_v50, %v782_v18 }
 0x140   : > { %v1272_v49 = vpop.f32.mrf.mxu3  ;;  %v749_v52 = vpop.f32.mrf.mxu1 }
 0x141   : > { %v1307_v19 = vadd.f32 %v1272_v49, %v1081_v45  ;;  %v783_v53 = vadd.f32 %v749_v52, %v4292_v10 }
 0x142   : > { %v1500_v9 = vpop.f32.mrf.mxu0 }
 0x143   : > { %v4418_v39 = vadd.f32 %v1498_v23, %v1307_v19 }
 0x146   : > { %v1048_v34 = vpop.f32.mrf.mxu2 }
 0x147   : > { %v1082_v20 = vadd.f32 %v1048_v34, %v783_v53 }
 0x148   : > { %v1274_v58 = vpop.f32.mrf.mxu3  ;;  %v1761_v46 = vpop.f32.mrf.mxu1 }
 0x149   : > { %v1308_v16 = vadd.f32 %v1274_v58, %v1082_v20  ;;  %v1817_v51 = vadd.f32 %v1761_v46, %v4307_v47  ;;  %v4436_v47 = vld [vmem:[%s4529_s6] ss:$0 sm:$0xff] }
 0x14a   : > { %v2605_v61 = vpop.f32.mrf.mxu0 }
 0x14b   : > { %v4422_v62 = vadd.f32 %v1500_v9, %v1308_v16 }
 0x14e   : > { %v2059_v31 = vpop.f32.mrf.mxu2 }
 0x14f   : > { %v2115_v43 = vadd.f32 %v2059_v31, %v1817_v51 }
 0x150   : > { %v2357_v6 = vpop.f32.mrf.mxu3  ;;  %v1763_v54 = vpop.f32.mrf.mxu1 }
 0x151   : > { %v2413_v10 = vadd.f32 %v2357_v6, %v2115_v43  ;;  %v1818_v11 = vadd.f32 %v1763_v54, %v4314_v2 }
 0x152   : > { %v2607_v38 = vpop.f32.mrf.mxu0 }
 0x153   : > { %v2661_v7 = vadd.f32 %v2605_v61, %v2413_v10 }
 0x155   : > { %v2713_v1 = vmul.f32 %v4430_v44, %v2661_v7 }
 0x156   : > { %v2061_v40 = vpop.f32.mrf.mxu2 }
 0x157   : > { %v2733_v13 = vadd.f32 %v4436_v47, %v2713_v1  ;;  %v2116_v14 = vadd.f32 %v2061_v40, %v1818_v11 }
 0x158   : > { %v2359_v3 = vpop.f32.mrf.mxu3  ;;  %v1766_v26 = vpop.f32.mrf.mxu1 }
 0x159   : > { %2749 = vst [vmem:[%s4443_s11] sm:$0xff] %v2733_v13  ;;  %v2414_v24 = vadd.f32 %v2359_v3, %v2116_v14  ;;  %v1819_v2 = vadd.f32 %v1766_v26, %v4321_v30  ;;  %v2765_v56 = vmax.f32 %v2733_v13, 0.0 }
 0x15a   : > { %v2610_v25 = vpop.f32.mrf.mxu0 }
 0x15b   : > { %v2662_v27 = vadd.f32 %v2607_v38, %v2414_v24 }
 0x15d   : > { %v2714_v17 = vmul.f32 %v4430_v44, %v2662_v27 }
 0x15e   : > { %v2064_v8 = vpop.f32.mrf.mxu2 }
 0x15f   : > { %v2734_v21 = vadd.f32 %v4436_v47, %v2714_v17  ;;  %v2117_v0 = vadd.f32 %v2064_v8, %v1819_v2 }
 0x160   : > { %v2362_v36 = vpop.f32.mrf.mxu3  ;;  %v1768_v41 = vpop.f32.mrf.mxu1 }
 0x161   : > { %2750 = vst [vmem:[%s4443_s11 + $0x8] sm:$0xff] %v2734_v21  ;;  %v2766_v4 = vmax.f32 %v2734_v21, 0.0  ;;  %v2415_v59 = vadd.f32 %v2362_v36, %v2117_v0  ;;  %v1820_v23 = vadd.f32 %v1768_v41, %v4328_v55 }
 0x162   : > { %v2612_v22 = vpop.f32.mrf.mxu0 }
 0x163   : > { %v3805_v30 = vpack.c.bf16 %v2766_v4, %v2765_v56  ;;  %v2663_v57 = vadd.f32 %v2610_v25, %v2415_v59 }
 0x165   : > { %3806 = vst [vmem:[%s4455_s16] sm:$0xff] %v3805_v30   ;;  %v2715_v35 = vmul.f32 %v4430_v44, %v2663_v57 }
 0x166   : > { %v2066_v29 = vpop.f32.mrf.mxu2 }
 0x167   : > { %v2735_v33 = vadd.f32 %v4436_v47, %v2715_v35  ;;  %v2118_v18 = vadd.f32 %v2066_v29, %v1820_v23 }
 0x168   : > { %v2364_v50 = vpop.f32.mrf.mxu3  ;;  %v1771_v45 = vpop.f32.mrf.mxu1 }
 0x169   : > { %2751 = vst [vmem:[%s4443_s11 + $0x10] sm:$0xff] %v2735_v33  ;;  %v2416_v49 = vadd.f32 %v2364_v50, %v2118_v18  ;;  %v1821_v53 = vadd.f32 %v1771_v45, %v4335_v12  ;;  %v2767_v16 = vmax.f32 %v2735_v33, 0.0 }
 0x16a   : > { %v2615_v52 = vpop.f32.mrf.mxu0 }
 0x16b   : > { %v2664_v19 = vadd.f32 %v2612_v22, %v2416_v49 }
 0x16d   : > { %v2716_v9 = vmul.f32 %v4430_v44, %v2664_v19 }
 0x16e   : > { %v2069_v34 = vpop.f32.mrf.mxu2 }
 0x16f   : > { %v2736_v20 = vadd.f32 %v4436_v47, %v2716_v9  ;;  %v2119_v55 = vadd.f32 %v2069_v34, %v1821_v53 }
 0x170   : > { %v2367_v58 = vpop.f32.mrf.mxu3  ;;  %v1773_v46 = vpop.f32.mrf.mxu1 }
 0x171   : > { %2752 = vst [vmem:[%s4443_s11 + $0x18] sm:$0xff] %v2736_v20  ;;  %v2768_v61 = vmax.f32 %v2736_v20, 0.0  ;;  %v2417_v51 = vadd.f32 %v2367_v58, %v2119_v55  ;;  %v1822_v10 = vadd.f32 %v1773_v46, %v4342_v37 }
 0x172   : > { %v2617_v31 = vpop.f32.mrf.mxu0 }
 0x173   : > { %v3810_v43 = vpack.c.bf16 %v2768_v61, %v2767_v16  ;;  %v2665_v6 = vadd.f32 %v2615_v52, %v2417_v51 }
 0x175   : > { %3842 = vst [vmem:[%s4455_s16 + $0x8] sm:$0xff] %v3810_v43   ;;  %v2717_v54 = vmul.f32 %v4430_v44, %v2665_v6 }
 0x176   : > { %v2071_v12 = vpop.f32.mrf.mxu2 }
 0x177   : > { %v2737_v38 = vadd.f32 %v4436_v47, %v2717_v54  ;;  %v2120_v7 = vadd.f32 %v2071_v12, %v1822_v10 }
 0x178   : > { %v2369_v1 = vpop.f32.mrf.mxu3  ;;  %v1776_v11 = vpop.f32.mrf.mxu1 }
 0x179   : > { %2753 = vst [vmem:[%s4443_s11 + $0x20] sm:$0xff] %v2737_v38  ;;  %v2418_v40 = vadd.f32 %v2369_v1, %v2120_v7  ;;  %v1823_v26 = vadd.f32 %v1776_v11, %v4349_v60  ;;  %v2769_v2 = vmax.f32 %v2737_v38, 0.0 }
 0x17a   : > { %v2620_v13 = vpop.f32.mrf.mxu0 }
 0x17b   : > { %v2666_v14 = vadd.f32 %v2617_v31, %v2418_v40 }
 0x17d   : > { %v2718_v3 = vmul.f32 %v4430_v44, %v2666_v14 }
 0x17e   : > { %v2074_v24 = vpop.f32.mrf.mxu2 }
 0x17f   : > { %v2738_v25 = vadd.f32 %v4436_v47, %v2718_v3  ;;  %v2121_v37 = vadd.f32 %v2074_v24, %v1823_v26 }
 0x180   : > { %v2372_v27 = vpop.f32.mrf.mxu3  ;;  %v1778_v17 = vpop.f32.mrf.mxu1 }
 0x181   : > { %2754 = vst [vmem:[%s4443_s11 + $0x28] sm:$0xff] %v2738_v25  ;;  %v2770_v8 = vmax.f32 %v2738_v25, 0.0  ;;  %v2419_v21 = vadd.f32 %v2372_v27, %v2121_v37  ;;  %v1824_v4 = vadd.f32 %v1778_v17, %v4355_v15 }
 0x182   : > { %v2622_v0 = vpop.f32.mrf.mxu0 }
 0x183   : > { %v3815_v36 = vpack.c.bf16 %v2770_v8, %v2769_v2  ;;  %v2667_v41 = vadd.f32 %v2620_v13, %v2419_v21 }
 0x185   : > { %3843 = vst [vmem:[%s4455_s16 + $0x10] sm:$0xff] %v3815_v36   ;;  %v2719_v56 = vmul.f32 %v4430_v44, %v2667_v41 }
 0x186   : > { %v2076_v60 = vpop.f32.mrf.mxu2 }
 0x187   : > { %v2739_v59 = vadd.f32 %v4436_v47, %v2719_v56  ;;  %v2122_v22 = vadd.f32 %v2076_v60, %v1824_v4 }
 0x188   : > { %v2374_v30 = vpop.f32.mrf.mxu3  ;;  %v1781_v57 = vpop.f32.mrf.mxu1 }
 0x189   : > { %2755 = vst [vmem:[%s4443_s11 + $0x30] sm:$0xff] %v2739_v59  ;;  %v2420_v35 = vadd.f32 %v2374_v30, %v2122_v22  ;;  %v1825_v18 = vadd.f32 %v1781_v57, %v4364_v42  ;;  %v2771_v19 = vmax.f32 %v2739_v59, 0.0 }
 0x18a   : > { %v2625_v23 = vpop.f32.mrf.mxu0 }
 0x18b   : > { %v2668_v29 = vadd.f32 %v2622_v0, %v2420_v35 }
 0x18d   : > { %v2720_v33 = vmul.f32 %v4430_v44, %v2668_v29 }
 0x18e   : > { %v2079_v50 = vpop.f32.mrf.mxu2 }
 0x18f   : > { %v2740_v45 = vadd.f32 %v4436_v47, %v2720_v33  ;;  %v2123_v15 = vadd.f32 %v2079_v50, %v1825_v18 }
 0x190   : > { %v2377_v49 = vpop.f32.mrf.mxu3  ;;  %v1783_v52 = vpop.f32.mrf.mxu1 }
 0x191   : > { %2756 = vst [vmem:[%s4443_s11 + $0x38] sm:$0xff] %v2740_v45  ;;  %v2772_v9 = vmax.f32 %v2740_v45, 0.0  ;;  %v2421_v53 = vadd.f32 %v2377_v49, %v2123_v15  ;;  %v1826_v46 = vadd.f32 %v1783_v52, %v4372_v63 }
 0x192   : > { %v2627_v34 = vpop.f32.mrf.mxu0 }
 0x193   : > { %v3820_v20 = vpack.c.bf16 %v2772_v9, %v2771_v19  ;;  %v2669_v55 = vadd.f32 %v2625_v23, %v2421_v53 }
 0x195   : > { %3844 = vst [vmem:[%s4455_s16 + $0x18] sm:$0xff] %v3820_v20   ;;  %v2721_v58 = vmul.f32 %v4430_v44, %v2669_v55 }
 0x196   : > { %v2081_v42 = vpop.f32.mrf.mxu2 }
 0x197   : > { %v2741_v16 = vadd.f32 %v4436_v47, %v2721_v58  ;;  %v2124_v61 = vadd.f32 %v2081_v42, %v1826_v46 }
 0x198   : > { %v2379_v51 = vpop.f32.mrf.mxu3  ;;  %v1786_v31 = vpop.f32.mrf.mxu1 }
 0x199   : > { %2757 = vst [vmem:[%s4443_s11 + $0x40] sm:$0xff] %v2741_v16  ;;  %v2422_v43 = vadd.f32 %v2379_v51, %v2124_v61  ;;  %v1827_v12 = vadd.f32 %v1786_v31, %v4390_v5  ;;  %v2773_v40 = vmax.f32 %v2741_v16, 0.0 }
 0x19a   : > { %v2630_v6 = vpop.f32.mrf.mxu0 }
 0x19b   : > { %v2670_v54 = vadd.f32 %v2627_v34, %v2422_v43 }
 0x19d   : > { %v2722_v10 = vmul.f32 %v4430_v44, %v2670_v54 }
 0x19e   : > { %v2084_v38 = vpop.f32.mrf.mxu2 }
 0x19f   : > { %v2742_v7 = vadd.f32 %v4436_v47, %v2722_v10  ;;  %v2125_v63 = vadd.f32 %v2084_v38, %v1827_v12 }
 0x1a0   : > { %v2382_v1 = vpop.f32.mrf.mxu3  ;;  %v1788_v11 = vpop.f32.mrf.mxu1 }
 0x1a1   : > { %2758 = vst [vmem:[%s4443_s11 + $0x48] sm:$0xff] %v2742_v7  ;;  %v2774_v13 = vmax.f32 %v2742_v7, 0.0  ;;  %v2423_v14 = vadd.f32 %v2382_v1, %v2125_v63  ;;  %v1828_v37 = vadd.f32 %v1788_v11, %v4402_v28 }
 0x1a2   : > { %v2632_v3 = vpop.f32.mrf.mxu0 }
 0x1a3   : > { %v3825_v26 = vpack.c.bf16 %v2774_v13, %v2773_v40  ;;  %v2671_v24 = vadd.f32 %v2630_v6, %v2423_v14 }
 0x1a5   : > { %3845 = vst [vmem:[%s4455_s16 + $0x20] sm:$0xff] %v3825_v26   ;;  %v2723_v25 = vmul.f32 %v4430_v44, %v2671_v24 }
 0x1a6   : > { %v2086_v5 = vpop.f32.mrf.mxu2 }
 0x1a7   : > { %v2743_v27 = vadd.f32 %v4436_v47, %v2723_v25  ;;  %v2126_v17 = vadd.f32 %v2086_v5, %v1828_v37 }
 0x1a8   : > { %v2384_v2 = vpop.f32.mrf.mxu3  ;;  %v1791_v8 = vpop.f32.mrf.mxu1 }
 0x1a9   : > { %2759 = vst [vmem:[%s4443_s11 + $0x50] sm:$0xff] %v2743_v27  ;;  %v2424_v21 = vadd.f32 %v2384_v2, %v2126_v17  ;;  %v1829_v56 = vadd.f32 %v1791_v8, %v4408_v48  ;;  %v2775_v30 = vmax.f32 %v2743_v27, 0.0 }
 0x1aa   : > { %v2635_v36 = vpop.f32.mrf.mxu0 }
 0x1ab   : > { %v2672_v0 = vadd.f32 %v2632_v3, %v2424_v21 }
 0x1ad   : > { %v2724_v41 = vmul.f32 %v4430_v44, %v2672_v0 }
 0x1ae   : > { %v2089_v4 = vpop.f32.mrf.mxu2 }
 0x1af   : > { %v2744_v60 = vadd.f32 %v4436_v47, %v2724_v41  ;;  %v2127_v28 = vadd.f32 %v2089_v4, %v1829_v56 }
 0x1b0   : > { %v2387_v59 = vpop.f32.mrf.mxu3  ;;  %v1793_v22 = vpop.f32.mrf.mxu1 }
 0x1b1   : > { %2760 = vst [vmem:[%s4443_s11 + $0x58] sm:$0xff] %v2744_v60  ;;  %v2776_v57 = vmax.f32 %v2744_v60, 0.0  ;;  %v2425_v35 = vadd.f32 %v2387_v59, %v2127_v28  ;;  %v1830_v18 = vadd.f32 %v1793_v22, %v4415_v32 }
 0x1b2   : > { %v2637_v50 = vpop.f32.mrf.mxu0 }
 0x1b3   : > { %v3830_v23 = vpack.c.bf16 %v2776_v57, %v2775_v30  ;;  %v2673_v29 = vadd.f32 %v2635_v36, %v2425_v35 }
 0x1b5   : > { %3846 = vst [vmem:[%s4455_s16 + $0x28] sm:$0xff] %v3830_v23   ;;  %v2725_v33 = vmul.f32 %v4430_v44, %v2673_v29 }
 0x1b6   : > { %v2091_v48 = vpop.f32.mrf.mxu2 }
 0x1b7   : > { %v2745_v45 = vadd.f32 %v4436_v47, %v2725_v33  ;;  %v2128_v15 = vadd.f32 %v2091_v48, %v1830_v18 }
 0x1b8   : > { %v2389_v49 = vpop.f32.mrf.mxu3  ;;  %v1796_v52 = vpop.f32.mrf.mxu1 }
 0x1b9   : > { %2761 = vst [vmem:[%s4443_s11 + $0x60] sm:$0xff] %v2745_v45  ;;  %v2426_v19 = vadd.f32 %v2389_v49, %v2128_v15  ;;  %v1831_v34 = vadd.f32 %v1796_v52, %v4418_v39  ;;  %v2777_v42 = vmax.f32 %v2745_v45, 0.0 }
 0x1ba   : > { %v2640_v46 = vpop.f32.mrf.mxu0 }
 0x1bb   : > { %v2674_v9 = vadd.f32 %v2637_v50, %v2426_v19 }
 0x1bd   : > { %v2726_v53 = vmul.f32 %v4430_v44, %v2674_v9 }
 0x1be   : > { %v2094_v20 = vpop.f32.mrf.mxu2 }
 0x1bf   : > { %v2746_v55 = vadd.f32 %v4436_v47, %v2726_v53  ;;  %v2129_v32 = vadd.f32 %v2094_v20, %v1831_v34 }
 0x1c0   : > { %v2392_v58 = vpop.f32.mrf.mxu3  ;;  %v1798_v51 = vpop.f32.mrf.mxu1 }
 0x1c1   : > { %2762 = vst [vmem:[%s4443_s11 + $0x68] sm:$0xff] %v2746_v55  ;;  %v2778_v16 = vmax.f32 %v2746_v55, 0.0  ;;  %v2427_v61 = vadd.f32 %v2392_v58, %v2129_v32  ;;  %v1832_v39 = vadd.f32 %v1798_v51, %v4422_v62 }
 0x1c2   : > { %v2642_v63 = vpop.f32.mrf.mxu0 }
 0x1c3   : > { %v3835_v31 = vpack.c.bf16 %v2778_v16, %v2777_v42  ;;  %v2675_v43 = vadd.f32 %v2640_v46, %v2427_v61 }
 0x1c5   : > { %3847 = vst [vmem:[%s4455_s16 + $0x30] sm:$0xff] %v3835_v31   ;;  %v2727_v6 = vmul.f32 %v4430_v44, %v2675_v43 }
 0x1c6   : > { %v2096_v54 = vpop.f32.mrf.mxu2 }
 0x1c7   : > { %v2747_v10 = vadd.f32 %v4436_v47, %v2727_v6  ;;  %v2130_v12 = vadd.f32 %v2096_v54, %v1832_v39 }
 0x1c8   : > { %v2394_v38 = vpop.f32.mrf.mxu3 }
 0x1c9   : > { %2763 = vst [vmem:[%s4443_s11 + $0x70] sm:$0xff] %v2747_v10  ;;  %v2428_v7 = vadd.f32 %v2394_v38, %v2130_v12  ;;  %v2779_v13 = vmax.f32 %v2747_v10, 0.0 }
 0x1cb   : > { %v2676_v1 = vadd.f32 %v2642_v63, %v2428_v7 }
 0x1cd   : > { %v2728_v11 = vmul.f32 %v4430_v44, %v2676_v1 }
 0x1cf   : > { %v2748_v40 = vadd.f32 %v4436_v47, %v2728_v11 }
 0x1d1   : > { %2764 = vst [vmem:[%s4443_s11 + $0x78] sm:$0xff] %v2748_v40  ;;  %v2780_v14 = vmax.f32 %v2748_v40, 0.0 }
 0x1d3   : > { %v3840_v3 = vpack.c.bf16 %v2780_v14, %v2779_v13 }
 0x1d5   : > { %3848 = vst [vmem:[%s4455_s16 + $0x38] sm:$0xff] %v3840_v3  }
 0x1d6 PF: > { %s19_s27 = sadd.s32 1, %s3890_s27  }
 0x1d7   : > { %p16_p5 = scmp.ge.s32.totalorder %s19_s27, 4  }
 0x1d9   :  { %18 = sbr.rel (!%p16_p5) target bundleno = 1 (0x1), region = 107 }

// kernel: network_block_forward.5
= control target key start
LH: loop header
LB: loop body
LE: loop exit
PB: predicated region body
PF: predicated region fallthrough
CT: control target
= control target key end

     0   :  { %s3599_s12 = smov 0   ;;  %s4141_s0 = inlined_call_operand.vmem [shape: bf16[2,160,128], index: 0, kind: input, shape index: {}]   ;;  %s4142_s1 = inlined_call_operand.vmem [shape: bf16[9,128,128], index: 1, kind: input, shape index: {}]   ;;  %s4143_s2 = inlined_call_operand.vmem [shape: f32[256,128], index: 2, kind: input, shape index: {}]   ;;  %s4144_s3 = inlined_call_operand.vmem [shape: f32[256,128], index: 3, kind: output, shape index: {}]  }
   0x1 LB: > { %s3605_s13 = sadd.s32 4294967295, %s3577_s12   ;;  %p2682_p0 = scmp.ge.s32.totalorder %s3577_s12, 1  ;;  %s3577_s12 = sphi %s3599_s12, %s13_s12  }
   0x2   : > { %p148_p1 = scmp.lt.s32.totalorder %s3577_s12, 3 }
   0x4   : > { %p149_p2 = pnand %p2682_p0, %p148_p1 }
   0x5   : > { %p177_p3 = scmp.lt.s32.totalorder (!%p149_p2), %s3605_s13, 1 }
   0x6   : > { %152 = sbr.rel (%p149_p2) target bundleno = 464 (0x1d0), region = 32 }
   0xb   : > { %v3409_v0 = vld [vmem:[%s4142_s1 + $0x38] sm:$0xff]  ;;  %v3408_v1 = vld [vmem:[%s4142_s1 + $0x30] sm:$0xff]  ;;  %v3407_v2 = vld [vmem:[%s4142_s1 + $0x28] sm:$0xff]  ;;  %s178_s26 = scalar_select %p177_p3, %s3605_s13, 1  ;;  %vm464_vm0 = vsmask.f32 7424 }
   0xc   : > { %3538 = vmatpush.bf16.msra.mxu1 %v3409_v0  ;;  %3539 = vmatpush.bf16.msra.mxu2 %v3409_v0  ;;  %v3406_v3 = vld [vmem:[%s4142_s1 + $0x20] sm:$0xff]  ;;  %v3405_v4 = vld [vmem:[%s4142_s1 + $0x18] sm:$0xff]  ;;  %v3404_v5 = vld [vmem:[%s4142_s1 + $0x10] sm:$0xff]  ;;  %vm763_vm1 = vcmask 1046528   ;;  %vm1258_vm2 = vsmask.f32 6400 }
   0xd   : > { %3540 = vmatpush.bf16.msra.mxu3 %v3409_v0  ;;  %322 = vmatpush.bf16.msra.mxu0 %v3409_v0  ;;  %v3403_v6 = vld [vmem:[%s4142_s1 + $0x8] sm:$0xff]  ;;  %s3562_s29 = smul.u32 80, %s178_s26  ;;  %v3402_v7 = vld [vmem:[%s4142_s1] sm:$0xff]  ;;  %v3441_v8 = vld [vmem:[%s4142_s1 + $0xb8] sm:$0xff]  ;;  %vm1569_vm3 = vcmask 1045504   ;;  %vm2375_vm5 = vcmask 1044480  }
   0xe   : > { %v3425_v9 = vld [vmem:[%s4142_s1 + $0x78] sm:$0xff]  ;;  %v3440_v16 = vld [vmem:[%s4142_s1 + $0xb0] sm:$0xff]  ;;  %v3439_v20 = vld [vmem:[%s4142_s1 + $0xa8] sm:$0xff]  ;;  %vm2064_vm4 = vsmask.f32 5376 }
   0xf   : > { %s3638_s7 = scalar_lea.vmem %s4141_s0, %s3562_s29  ;;  %v3457_v14 = vld [vmem:[%s4142_s1 + $0xf8] sm:$0xff]  ;;  %v3424_v17 = vld [vmem:[%s4142_s1 + $0x70] sm:$0xff]  ;;  %v3423_v21 = vld [vmem:[%s4142_s1 + $0x68] sm:$0xff] }
  0x10   : > { %3541 = vmatpush.bf16.msra.mxu1 %v3408_v1  ;;  %3542 = vmatpush.bf16.msra.mxu2 %v3408_v1  ;;  %v3396_v10 = vld [vmem:[%s3638_s7 + $0x10] sm:$0xff]  ;;  %v3398_v11 = vld [vmem:[%s3638_s7 + $0x20] sm:$0xff]  ;;  %v3473_v15 = vld [vmem:[%s4142_s1 + $0x138] sm:$0xff] }
  0x11   : > { %3543 = vmatpush.bf16.msra.mxu3 %v3408_v1  ;;  %323 = vmatpush.bf16.msra.mxu0 %v3408_v1  ;;  %v3400_v12 = vld [vmem:[%s3638_s7 + $0x30] sm:$0xff]  ;;  %v3394_v13 = vld [vmem:[%s3638_s7] sm:$0xff]  ;;  %v3455_v22 = vld [vmem:[%s4142_s1 + $0xe8] sm:$0xff] }
  0x12   : > { %v3456_v18 = vld [vmem:[%s4142_s1 + $0xf0] sm:$0xff]  ;;  %v3471_v23 = vld [vmem:[%s4142_s1 + $0x128] sm:$0xff]  ;;  %v3438_v24 = vld [vmem:[%s4142_s1 + $0xa0] sm:$0xff] }
  0x13   : > { %v3472_v19 = vld [vmem:[%s4142_s1 + $0x130] sm:$0xff]  ;;  %v3422_v25 = vld [vmem:[%s4142_s1 + $0x60] sm:$0xff]  ;;  %v3437_v28 = vld [vmem:[%s4142_s1 + $0x98] sm:$0xff] }
  0x14   : > { %3544 = vmatpush.bf16.msra.mxu1 %v3407_v2  ;;  %3545 = vmatpush.bf16.msra.mxu2 %v3407_v2  ;;  %v3454_v26 = vld [vmem:[%s4142_s1 + $0xe0] sm:$0xff]  ;;  %v3421_v29 = vld [vmem:[%s4142_s1 + $0x58] sm:$0xff]  ;;  %v3458_v31 = vld [vmem:[%s3638_s7 + $0x4] sm:$0xf0] }
  0x15   : > { %3546 = vmatpush.bf16.msra.mxu3 %v3407_v2  ;;  %324 = vmatpush.bf16.msra.mxu0 %v3407_v2  ;;  %v3470_v27 = vld [vmem:[%s4142_s1 + $0x120] sm:$0xff]  ;;  %v3397_v32 = vld [vmem:[%s3638_s7 + $0x18] sm:$0xff]  ;;  %v3399_v33 = vld [vmem:[%s3638_s7 + $0x28] sm:$0xff] }
  0x16   : > { %v3010_v30 = vld [vmem:[%s3638_s7 + $0x4] sm:$0xe]  ;;  %v3401_v35 = vld [vmem:[%s3638_s7 + $0x38] sm:$0xff]  ;;  %v3395_v36 = vld [vmem:[%s3638_s7 + $0x8] sm:$0xff] }
  0x17   : > { %v3410_v34 = vld [vmem:[%s3638_s7] sm:$0xff]  ;;  %v3453_v37 = vld [vmem:[%s4142_s1 + $0xd8] sm:$0xff]  ;;  %v3459_v39 = vld [vmem:[%s3638_s7 + $0xc] sm:$0xff]  ;;  %v3011_v40 = vor.u32 %v3458_v31, %v3010_v30 }
  0x18   : > { %3547 = vmatpush.bf16.msra.mxu1 %v3406_v3  ;;  %3548 = vmatpush.bf16.msra.mxu2 %v3406_v3  ;;  %v3469_v38 = vld [vmem:[%s4142_s1 + $0x118] sm:$0xff]  ;;  %v3436_v41 = vld [vmem:[%s4142_s1 + $0x90] sm:$0xff]  ;;  %v3725_v45 = vld [vmem:[%s3638_s7 + $0x8] sm:$0xff]  ;;  %v468_v46 = vshll.u32 %v3410_v34, 16  ;;  %v1268_v53 = vshrl.u32 %v3459_v39, 16  ;;  %v1271_v54 = vshll.u32 %v3459_v39, 16 }
  0x19   : > { %3549 = vmatpush.bf16.msra.mxu3 %v3406_v3  ;;  %325 = vmatpush.bf16.msra.mxu0 %v3406_v3  ;;  %v3420_v42 = vld [vmem:[%s4142_s1 + $0x50] sm:$0xff]  ;;  %v2850_v47 = vld [vmem:[%s3638_s7] sm:$0xe]  ;;  %v3426_v48 = vld [vmem:[%s3638_s7] sm:$0xf0]  ;;  %v1260_v51 = vshrl.u32 %v3011_v40, 16 }
  0x1a   : > { %v3452_v43 = vld [vmem:[%s4142_s1 + $0xd0] sm:$0xff]  ;;  %v2930_v49 = vld [vmem:[%s3638_s7 + $0x4] sm:$0xe]  ;;  %v3442_v50 = vld [vmem:[%s3638_s7 + $0x4] sm:$0xf0]  ;;  %v1263_v52 = vshll.u32 %v3011_v40, 16  ;;  %v2851_v62 = vor.u32 %v3426_v48, %v2850_v47 }
  0x1b   : > { %v3468_v44 = vld [vmem:[%s4142_s1 + $0x110] sm:$0xff]  ;;  %v3435_v55 = vld [vmem:[%s4142_s1 + $0x88] sm:$0xff]  ;;  %v466_v57 = vshrl.u32 %v3410_v34, 16  ;;  %v470_v58 = vrot.slane %v468_v46, 1  ;;  %v473_v60 = vshll.u32 %v3725_v45, 16  ;;  %v2931_v63 = vor.u32 %v3442_v50, %v2930_v49 }
  0x1c   : > { %3550 = vmatpush.bf16.msra.mxu1 %v3405_v4  ;;  %3551 = vmatpush.bf16.msra.mxu2 %v3405_v4  ;;  %v3419_v56 = vld [vmem:[%s4142_s1 + $0x48] sm:$0xff]  ;;  %v1262_v2 = vrot.slane %v1260_v51, 1  ;;  %v1265_v3 = vrot.slane %v1263_v52, 2  ;;  %v3536_v30 = vld [vmem:[%s4142_s1 + $0x230] sm:$0xff] }
  0x1d   : > { %3552 = vmatpush.bf16.msra.mxu3 %v3405_v4  ;;  %326 = vmatpush.bf16.msra.mxu0 %v3405_v4  ;;  %v3451_v59 = vld [vmem:[%s4142_s1 + $0xc8] sm:$0xff]  ;;  %v1270_v4 = vrot.slane %v1268_v53, 1  ;;  %v3412_v31 = vld [vmem:[%s3638_s7 + $0x10] sm:$0xff]  ;;  %v3461_v53 = vld [vmem:[%s3638_s7 + $0x1c] sm:$0xff] }
  0x1e   : > { %v3742_v61 = vld [vmem:[%s3638_s7 + $0x8] sm:$0xff]  ;;  %v481_v39 = vshll.u32 %v3412_v31, 16  ;;  %v3428_v40 = vld [vmem:[%s3638_s7 + $0x10] sm:$0xff] }
  0x1f   : > { %v3467_v0 = vld [vmem:[%s4142_s1 + $0x108] sm:$0xff]  ;;  %v767_v47 = vrot.slane %v3428_v40, 1 }
  0x20   : > { %3553 = vmatpush.bf16.msra.mxu1 %v3404_v5  ;;  %3554 = vmatpush.bf16.msra.mxu2 %v3404_v5  ;;  %v3748_v1 = vld [vmem:[%s3638_s7 + $0xc] sm:$0xff]  ;;  %v483_v46 = vrot.slane %v481_v39, 1 }
  0x21   : > { %3555 = vmatpush.bf16.msra.mxu3 %v3404_v5  ;;  %327 = vmatpush.bf16.msra.mxu0 %v3404_v5  ;;  %v1273_v5 = vrot.slane %v1271_v54, 2  ;;  %v3503_v34 = vld [vmem:[%s4142_s1 + $0x1a8] sm:$0xff]  ;;  %v3413_v54 = vld [vmem:[%s3638_s7 + $0x18] sm:$0xff]  ;;  %v3484_v39 = vld [vmem:[%s4142_s1 + $0x150] sm:$0xff] }
  0x24   : > { %3556 = vmatpush.bf16.msra.mxu1 %v3403_v6  ;;  %3557 = vmatpush.bf16.msra.mxu2 %v3403_v6 }
  0x25   : > { %3558 = vmatpush.bf16.msra.mxu3 %v3403_v6  ;;  %328 = vmatpush.bf16.msra.mxu0 %v3403_v6  ;;  %v3434_v6 = vld [vmem:[%s4142_s1 + $0x80] sm:$0xff] }
  0x28   : > { %3559 = vmatpush.bf16.msra.mxu1 %v3402_v7  ;;  %3560 = vmatpush.bf16.msra.mxu2 %v3402_v7 }
  0x29   : > { %3561 = vmatpush.bf16.msra.mxu3 %v3402_v7  ;;  %329 = vmatpush.bf16.msra.mxu0 %v3402_v7  ;;  %v3418_v7 = vld [vmem:[%s4142_s1 + $0x40] sm:$0xff] }
  0x2b   : > { %340 = vmatmul.bf16.vlgmr.msra.gmra.mxu1 %v3396_v10  ;;  %350 = vmatmul.bf16.vlgmr.msra.gmra.mxu2 %v3398_v11  ;;  %v3489_v10 = vld [vmem:[%s4142_s1 + $0x178] sm:$0xff]  ;;  %v475_v11 = vrot.slane %v473_v60, 1  ;;  %v3534_v60 = vld [vmem:[%s4142_s1 + $0x220] sm:$0xff] }
  0x2c   : > { %837 = vmatpush.bf16.msrb.mxu2 %v3441_v8  ;;  %589 = vmatpush.bf16.msrb.mxu1 %v3425_v9  ;;  %v471_v8 = vor.u32 %v470_v58, %v466_v57  ;;  %v3505_v9 = vld [vmem:[%s4142_s1 + $0x1b8] sm:$0xff]  ;;  %v3486_v57 = vld [vmem:[%s4142_s1 + $0x160] sm:$0xff]  ;;  %v1286_v58 = vshrl.u32 %v3461_v53, 16 }
  0x2d   : > { %360 = vmatmul.bf16.vlgmr.msra.gmra.mxu3 %v3400_v12  ;;  %330 = vmatmul.bf16.vlgmr.msra.gmra.mxu0 %v3394_v13  ;;  %v764_v12 = vrot.slane %v2851_v62, 1  ;;  %v765_v13 = vrot.slane %v3742_v61, 1  ;;  %v485_v61 = vshrl.u32 %v3412_v31, 16  ;;  %v489_v62 = vshll.u32 %v3413_v54, 16 }
  0x2e   : > { %1084 = vmatpush.bf16.msrb.mxu3 %v3457_v14  ;;  %1395 = vmatpush.bf16.msrb.mxu0 %v3473_v15  ;;  %v3450_v14 = vld [vmem:[%s4142_s1 + $0xc0] sm:$0xff] }
  0x2f   : > { %v3466_v15 = vld [vmem:[%s4142_s1 + $0x100] sm:$0xff] }
  0x30   : > { %838 = vmatpush.bf16.msrb.mxu2 %v3440_v16  ;;  %590 = vmatpush.bf16.msrb.mxu1 %v3424_v17  ;;  %v1011_v16 = vrot.slane %v2931_v63, 1  ;;  %v1012_v17 = vrot.slane %v3748_v1, 1  ;;  %v3429_v63 = vld [vmem:[%s3638_s7 + $0x18] sm:$0xff]  ;;  %v1288_v1 = vrot.slane %v1286_v58, 1 }
  0x31   : > { %v3464_v58 = vld [vmem:[%s3638_s7 + $0x34] sm:$0xff] }
  0x32   : > { %1085 = vmatpush.bf16.msrb.mxu3 %v3456_v18  ;;  %1396 = vmatpush.bf16.msrb.mxu0 %v3472_v19  ;;  %v1266_v18 = vor.u32 %v1265_v3, %v1262_v2  ;;  %v1274_v19 = vor.u32 %v1273_v5, %v1270_v4  ;;  %v487_v3 = vor.u32 %v485_v61, %v483_v46  ;;  %v491_v4 = vrot.slane %v489_v62, 1  ;;  %v3515_v61 = vld [vmem:[%s4142_s1 + $0x1c8] sm:$0xff] }
  0x33   : > { %v769_v5 = vrot.slane %v3429_v63, 1  ;;  %v1313_v62 = vshrl.u32 %v3464_v58, 16  ;;  %v1316_v63 = vshll.u32 %v3464_v58, 16 }
  0x34   : > { %839 = vmatpush.bf16.msrb.mxu2 %v3439_v20  ;;  %591 = vmatpush.bf16.msrb.mxu1 %v3423_v21  ;;  %v3521_v20 = vld [vmem:[%s4142_s1 + $0x1f8] sm:$0xff] }
  0x35   : > { %v3537_v21 = vld [vmem:[%s4142_s1 + $0x238] sm:$0xff] }
  0x36   : > { %1086 = vmatpush.bf16.msrb.mxu3 %v3455_v22  ;;  %1397 = vmatpush.bf16.msrb.mxu0 %v3471_v23  ;;  %v476_v22 = vsel %vm464_vm0, %v471_v8, %v475_v11  ;;  %v766_v23 = vsel %vm763_vm1, %v764_v12, %v765_v13  ;;  %v492_v8 = vsel %vm464_vm0, %v487_v3, %v491_v4  ;;  %v3462_v12 = vld [vmem:[%s3638_s7 + $0x24] sm:$0xff]  ;;  %v3432_v3 = vld [vmem:[%s3638_s7 + $0x30] sm:$0xff] }
  0x38   : > { %840 = vmatpush.bf16.msrb.mxu2 %v3438_v24  ;;  %592 = vmatpush.bf16.msrb.mxu1 %v3422_v25  ;;  %v1013_v24 = vsel %vm763_vm1, %v1011_v16, %v1012_v17  ;;  %v1275_v25 = vsel %vm1258_vm2, %v1266_v18, %v1274_v19  ;;  %v3485_v16 = vld [vmem:[%s4142_s1 + $0x158] sm:$0xff]  ;;  %v1298_v18 = vshll.u32 %v3462_v12, 16 }
  0x3a   : > { %1087 = vmatpush.bf16.msrb.mxu3 %v3454_v26  ;;  %1398 = vmatpush.bf16.msrb.mxu0 %v3470_v27  ;;  %v3504_v26 = vld [vmem:[%s4142_s1 + $0x1b0] sm:$0xff] }
  0x3b   : > { %345 = vmatmul.bf16.gmra.mxu1 %v3397_v32  ;;  %355 = vmatmul.bf16.gmra.mxu2 %v3399_v33  ;;  %v3460_v27 = vld [vmem:[%s3638_s7 + $0x14] sm:$0xff] }
  0x3c   : > { %841 = vmatpush.bf16.msrb.mxu2 %v3437_v28  ;;  %593 = vmatpush.bf16.msrb.mxu1 %v3421_v29  ;;  %v3488_v28 = vld [vmem:[%s4142_s1 + $0x170] sm:$0xff]  ;;  %v1277_v32 = vshrl.u32 %v3460_v27, 16  ;;  %v1280_v33 = vshll.u32 %v3460_v27, 16 }
  0x3d   : > { %365 = vmatmul.bf16.gmra.mxu3 %v3401_v35  ;;  %335 = vmatmul.bf16.gmra.mxu0 %v3395_v36  ;;  %v3520_v29 = vld [vmem:[%s4142_s1 + $0x1f0] sm:$0xff]  ;;  %v3487_v35 = vld [vmem:[%s4142_s1 + $0x168] sm:$0xff] }
  0x3e   : > { %1088 = vmatpush.bf16.msrb.mxu3 %v3453_v37  ;;  %1399 = vmatpush.bf16.msrb.mxu0 %v3469_v38  ;;  %v3519_v36 = vld [vmem:[%s4142_s1 + $0x1e8] sm:$0xff]  ;;  %v477_v38 = vshrl.u32 %v3725_v45, 16  ;;  %v768_v45 = vsel %vm763_vm1, %v765_v13, %v767_v47  ;;  %v3414_v13 = vld [vmem:[%s3638_s7 + $0x20] sm:$0xff] }
  0x3f   : > { %v3535_v37 = vld [vmem:[%s4142_s1 + $0x228] sm:$0xff] }
  0x40   : > { %842 = vmatpush.bf16.msrb.mxu2 %v3436_v41  ;;  %594 = vmatpush.bf16.msrb.mxu1 %v3420_v42  ;;  %v3444_v41 = vld [vmem:[%s3638_s7 + $0x14] sm:$0xff]  ;;  %v1279_v42 = vrot.slane %v1277_v32, 1 }
  0x41   : > { %v1014_v48 = vrot.slane %v3444_v41, 1 }
  0x42   : > { %1089 = vmatpush.bf16.msrb.mxu3 %v3452_v43  ;;  %1400 = vmatpush.bf16.msrb.mxu0 %v3468_v44  ;;  %v1282_v43 = vrot.slane %v1280_v33, 2  ;;  %v479_v44 = vor.u32 %v477_v38, %v475_v11  ;;  %v3516_v38 = vld [vmem:[%s4142_s1 + $0x1d0] sm:$0xff] }
  0x43   : > { %v1015_v51 = vsel %vm763_vm1, %v1012_v17, %v1014_v48  ;;  %v1295_v17 = vshrl.u32 %v3462_v12, 16 }
  0x44   : > { %843 = vmatpush.bf16.msrb.mxu2 %v3435_v55  ;;  %595 = vmatpush.bf16.msrb.mxu1 %v3419_v56  ;;  %v1283_v49 = vor.u32 %v1282_v43, %v1279_v42  ;;  %v484_v50 = vsel %vm464_vm0, %v479_v44, %v483_v46  ;;  %v3502_v55 = vld [vmem:[%s4142_s1 + $0x1a0] sm:$0xff]  ;;  %v3532_v42 = vld [vmem:[%s4142_s1 + $0x210] sm:$0xff]  ;;  %v501_v43 = vshrl.u32 %v3414_v13, 16  ;;  %v3431_v46 = vld [vmem:[%s3638_s7 + $0x28] sm:$0xff] }
  0x45   : > { %v3518_v56 = vld [vmem:[%s4142_s1 + $0x1e0] sm:$0xff] }
  0x46   : > { %1090 = vmatpush.bf16.msrb.mxu3 %v3451_v59  ;;  %1401 = vmatpush.bf16.msrb.mxu0 %v3467_v0  ;;  %v1284_v52 = vsel %vm1258_vm2, %v1274_v19, %v1283_v49  ;;  %v1289_v59 = vshll.u32 %v3461_v53, 16  ;;  %v3445_v0 = vld [vmem:[%s3638_s7 + $0x1c] sm:$0xff] }
  0x47   : > { %v3533_v19 = vld [vmem:[%s4142_s1 + $0x218] sm:$0xff] }
  0x48   : > { %844 = vmatpush.bf16.msrb.mxu2 %v3434_v6  ;;  %596 = vmatpush.bf16.msrb.mxu1 %v3418_v7  ;;  %v1291_v2 = vrot.slane %v1289_v59, 2  ;;  %v1016_v6 = vrot.slane %v3445_v0, 1  ;;  %v3416_v59 = vld [vmem:[%s3638_s7 + $0x30] sm:$0xff]  ;;  %v3483_v0 = vld [vmem:[%s4142_s1 + $0x148] sm:$0xff] }
  0x4a   : > { %1091 = vmatpush.bf16.msrb.mxu3 %v3450_v14  ;;  %1402 = vmatpush.bf16.msrb.mxu0 %v3466_v15  ;;  %v1292_v7 = vor.u32 %v1291_v2, %v1288_v1  ;;  %v3501_v14 = vld [vmem:[%s4142_s1 + $0x198] sm:$0xff]  ;;  %v513_v2 = vshll.u32 %v3416_v59, 16 }
  0x4b   : > { %597 = vmatmul.bf16.vlgmr.msrb.gmra.mxu1 %v476_v22  ;;  %845 = vmatmul.bf16.vlgmr.msrb.gmra.mxu2 %v766_v23  ;;  %v3517_v15 = vld [vmem:[%s4142_s1 + $0x1d8] sm:$0xff]  ;;  %v3430_v22 = vld [vmem:[%s3638_s7 + $0x20] sm:$0xff] }
  0x4c   : > { %1890 = vmatpush.bf16.msra.mxu2 %v3505_v9  ;;  %1643 = vmatpush.bf16.msra.mxu1 %v3489_v10  ;;  %v770_v9 = vsel %vm763_vm1, %v767_v47, %v769_v5  ;;  %v1017_v10 = vsel %vm763_vm1, %v1014_v48, %v1016_v6  ;;  %v1293_v11 = vsel %vm1258_vm2, %v1283_v49, %v1292_v7  ;;  %v3446_v23 = vld [vmem:[%s3638_s7 + $0x24] sm:$0xff]  ;;  %v3447_v47 = vld [vmem:[%s3638_s7 + $0x2c] sm:$0xff] }
  0x4d   : > { %1092 = vmatmul.bf16.vlgmr.msrb.gmra.mxu3 %v1013_v24  ;;  %1403 = vmatmul.bf16.vlgmr.msrb.gmra.mxu0 %v1275_v25  ;;  %v1297_v24 = vrot.slane %v1295_v17, 1  ;;  %v1300_v25 = vrot.slane %v1298_v18, 2  ;;  %v3465_v17 = vld [vmem:[%s3638_s7 + $0x3c] sm:$0xff] }
  0x4e   : > { %2201 = vmatpush.bf16.msra.mxu3 %v3521_v20  ;;  %2449 = vmatpush.bf16.msra.mxu0 %v3537_v21  ;;  %v493_v20 = vshrl.u32 %v3413_v54, 16  ;;  %v497_v21 = vshll.u32 %v3414_v13, 16  ;;  %v3417_v18 = vld [vmem:[%s3638_s7 + $0x38] sm:$0xff] }
  0x50   : > { %1891 = vmatpush.bf16.msra.mxu2 %v3504_v26  ;;  %1644 = vmatpush.bf16.msra.mxu1 %v3488_v28  ;;  %v495_v26 = vor.u32 %v493_v20, %v491_v4  ;;  %v499_v27 = vrot.slane %v497_v21, 1  ;;  %v771_v28 = vrot.slane %v3430_v22, 1  ;;  %v3448_v4 = vld [vmem:[%s3638_s7 + $0x34] sm:$0xff]  ;;  %v3514_v20 = vld [vmem:[%s4142_s1 + $0x1c0] sm:$0xff]  ;;  %v1322_v21 = vshrl.u32 %v3465_v17, 16 }
  0x51   : > { %v1325_v22 = vshll.u32 %v3465_v17, 16  ;;  %v3090_v17 = vld [vmem:[%s3638_s7 + $0x4] sm:$0xc] }
  0x52   : > { %2202 = vmatpush.bf16.msra.mxu3 %v3520_v29  ;;  %2450 = vmatpush.bf16.msra.mxu0 %v3536_v30  ;;  %v1018_v29 = vrot.slane %v3446_v23, 1  ;;  %v1301_v30 = vor.u32 %v1300_v25, %v1297_v24  ;;  %v500_v31 = vsel %vm464_vm0, %v495_v26, %v499_v27  ;;  %v772_v32 = vsel %vm763_vm1, %v769_v5, %v771_v28  ;;  %v3482_v23 = vld [vmem:[%s4142_s1 + $0x140] sm:$0xff]  ;;  %v3433_v26 = vld [vmem:[%s3638_s7 + $0x38] sm:$0xff] }
  0x53   : > { %v1315_v5 = vrot.slane %v1313_v62, 1  ;;  %v517_v24 = vshrl.u32 %v3416_v59, 16  ;;  %v521_v25 = vshll.u32 %v3417_v18, 16 }
  0x54   : > { %1892 = vmatpush.bf16.msra.mxu2 %v3503_v34  ;;  %1645 = vmatpush.bf16.msra.mxu1 %v3487_v35  ;;  %v1019_v33 = vsel %vm763_vm1, %v1016_v6, %v1018_v29  ;;  %v1302_v34 = vsel %vm1258_vm2, %v1292_v7, %v1301_v30  ;;  %v3463_v35 = vld [vmem:[%s3638_s7 + $0x2c] sm:$0xff]  ;;  %v1318_v6 = vrot.slane %v1316_v63, 2 }
  0x55   : > { %v1304_v40 = vshrl.u32 %v3463_v35, 16  ;;  %v1307_v41 = vshll.u32 %v3463_v35, 16  ;;  %v3531_v7 = vld [vmem:[%s4142_s1 + $0x208] sm:$0xff] }
  0x56   : > { %2203 = vmatpush.bf16.msra.mxu3 %v3519_v36  ;;  %2451 = vmatpush.bf16.msra.mxu0 %v3535_v37  ;;  %v3415_v36 = vld [vmem:[%s3638_s7 + $0x28] sm:$0xff]  ;;  %v3500_v37 = vld [vmem:[%s4142_s1 + $0x190] sm:$0xff]  ;;  %v1319_v12 = vor.u32 %v1318_v6, %v1315_v5 }
  0x57   : > { %v505_v44 = vshll.u32 %v3415_v36, 16  ;;  %v1306_v48 = vrot.slane %v1304_v40, 1  ;;  %v1309_v49 = vrot.slane %v1307_v41, 2  ;;  %v509_v1 = vshrl.u32 %v3415_v36, 16  ;;  %v3250_v5 = vld [vmem:[%s3638_s7 + $0x8] sm:$0xc] }
  0x58   : > { %1893 = vmatpush.bf16.msra.mxu2 %v3502_v55  ;;  %1646 = vmatpush.bf16.msra.mxu1 %v3486_v57  ;;  %v3506_v6 = vld [vmem:[%s3638_s7 + $0x8] sm:$0xf0] }
  0x59   : > { %v1310_v53 = vor.u32 %v1309_v49, %v1306_v48  ;;  %v950_v49 = vld [vmem:[%s3638_s7 + $0x44] sm:$0x1] }
  0x5a   : > { %2204 = vmatpush.bf16.msra.mxu3 %v3518_v56  ;;  %2452 = vmatpush.bf16.msra.mxu0 %v3534_v60  ;;  %v3499_v60 = vld [vmem:[%s4142_s1 + $0x188] sm:$0xff] }
  0x5b   : > { %602 = vmatmul.bf16.gmra.mxu1 %v484_v50  ;;  %850 = vmatmul.bf16.gmra.mxu2 %v768_v45  ;;  %v503_v50 = vor.u32 %v501_v43, %v499_v27  ;;  %v507_v45 = vrot.slane %v505_v44, 1  ;;  %v1311_v57 = vsel %vm1258_vm2, %v1301_v30, %v1310_v53  ;;  %v3449_v27 = vld [vmem:[%s3638_s7 + $0x3c] sm:$0xff] }
  0x5c   : > { %1894 = vmatpush.bf16.msra.mxu2 %v3501_v14  ;;  %1647 = vmatpush.bf16.msra.mxu1 %v3485_v16  ;;  %v1320_v16 = vsel %vm1258_vm2, %v1310_v53, %v1319_v12  ;;  %v3530_v30 = vld [vmem:[%s4142_s1 + $0x200] sm:$0xff]  ;;  %v1024_v35 = vrot.slane %v3449_v27, 1  ;;  %v3522_v27 = vld [vmem:[%s3638_s7 + $0x8] sm:$0xf0] }
  0x5d   : > { %1097 = vmatmul.bf16.gmra.mxu3 %v1015_v51  ;;  %1408 = vmatmul.bf16.gmra.mxu0 %v1284_v52  ;;  %v773_v51 = vrot.slane %v3431_v46, 1  ;;  %v1020_v52 = vrot.slane %v3447_v47, 1  ;;  %v508_v54 = vsel %vm464_vm0, %v503_v50, %v507_v45  ;;  %v702_v47 = vld [vmem:[%s3638_s7 + $0x40] sm:$0x1] }
  0x5e   : > { %2205 = vmatpush.bf16.msra.mxu3 %v3517_v15  ;;  %2453 = vmatpush.bf16.msra.mxu0 %v3533_v19  ;;  %v3498_v19 = vld [vmem:[%s4142_s1 + $0x180] sm:$0xff] }
  0x5f   : > { %v774_v55 = vsel %vm763_vm1, %v771_v28, %v773_v51  ;;  %v1021_v56 = vsel %vm763_vm1, %v1018_v29, %v1020_v52  ;;  %v1324_v28 = vrot.slane %v1322_v21, 1  ;;  %v1327_v29 = vrot.slane %v1325_v22, 2  ;;  %v3474_v22 = vld [vmem:[%s3638_s7 + $0x4] sm:$0xf0] }
  0x60   : > { %1895 = vmatpush.bf16.msra.mxu2 %v3500_v37  ;;  %1648 = vmatpush.bf16.msra.mxu1 %v3484_v39  ;;  %v403_v37 = vld [vmem:[%s3638_s7 + $0x40] sm:$0x1] }
  0x61   : > { %v1328_v36 = vor.u32 %v1327_v29, %v1324_v28 }
  0x62   : > { %2206 = vmatpush.bf16.msra.mxu3 %v3516_v38  ;;  %2454 = vmatpush.bf16.msra.mxu0 %v3532_v42  ;;  %v454_v42 = vunpack.c.l.b16 %v403_v37 }
  0x63   : > { %v1329_v46 = vsel %vm1258_vm2, %v1319_v12, %v1328_v36  ;;  %v3507_v12 = vld [vmem:[%s3638_s7 + $0x10] sm:$0xff] }
  0x64   : > { %1896 = vmatpush.bf16.msra.mxu2 %v3499_v60  ;;  %1649 = vmatpush.bf16.msra.mxu1 %v3483_v0  ;;  %v463_v50 = vpack.c.b16 %v454_v42, %v454_v42  ;;  %v2077_v21 = vshll.u32 %v3507_v12, 16 }
  0x66   : > { %2207 = vmatpush.bf16.msra.mxu3 %v3515_v61  ;;  %2455 = vmatpush.bf16.msra.mxu0 %v3531_v7  ;;  %v529_v58 = vshll.u32 %v463_v50, 16 }
  0x68   : > { %1897 = vmatpush.bf16.msra.mxu2 %v3498_v19  ;;  %1650 = vmatpush.bf16.msra.mxu1 %v3482_v23  ;;  %v3170_v23 = vld [vmem:[%s3638_s7 + $0x8] sm:$0xc] }
  0x6a   : > { %2208 = vmatpush.bf16.msra.mxu3 %v3514_v20  ;;  %2456 = vmatpush.bf16.msra.mxu0 %v3530_v30  ;;  %v2074_v20 = vshrl.u32 %v3507_v12, 16  ;;  %v3475_v30 = vld [vmem:[%s3638_s7 + $0xc] sm:$0xff] }
  0x6b   : > { %607 = vmatmul.bf16.gmra.mxu1 %v492_v8  ;;  %855 = vmatmul.bf16.gmra.mxu2 %v770_v9  ;;  %v511_v8 = vor.u32 %v509_v1, %v507_v45  ;;  %v515_v9 = vrot.slane %v513_v2, 1  ;;  %v753_v45 = vunpack.c.l.b16 %v702_v47  ;;  %v531_v1 = vrot.slane %v529_v58, 1 }
  0x6c   : > { %v2076_v37 = vrot.slane %v2074_v20, 2 }
  0x6d   : > { %1102 = vmatmul.bf16.gmra.mxu3 %v1017_v10  ;;  %1413 = vmatmul.bf16.gmra.mxu0 %v1293_v11  ;;  %v775_v10 = vrot.slane %v3432_v3, 1  ;;  %v1022_v11 = vrot.slane %v3448_v4, 1  ;;  %v516_v13 = vsel %vm464_vm0, %v511_v8, %v515_v9  ;;  %v762_v59 = vpack.c.b16 %v753_v45, %v753_v45 }
  0x6f   : > { %v776_v14 = vsel %vm763_vm1, %v773_v51, %v775_v10  ;;  %v1023_v15 = vsel %vm763_vm1, %v1020_v52, %v1022_v11  ;;  %v1025_v44 = vsel %vm763_vm1, %v1022_v11, %v1024_v35  ;;  %v1001_v51 = vunpack.c.l.b16 %v950_v49 }
  0x70   : > { %v779_v2 = vrot.slane %v762_v59, 1 }
  0x71   : > { %v1010_v61 = vpack.c.b16 %v1001_v51, %v1001_v51 }
  0x73   : > { %v1026_v3 = vrot.slane %v1010_v61, 1 }
  0x7b   : > { %612 = vmatmul.bf16.gmra.mxu1 %v500_v31  ;;  %860 = vmatmul.bf16.gmra.mxu2 %v772_v32  ;;  %v1197_v31 = vld [vmem:[%s3638_s7 + $0x44] sm:$0x3]  ;;  %v519_v32 = vor.u32 %v517_v24, %v515_v9  ;;  %v3490_v24 = vld [vmem:[%s3638_s7 + $0x8] sm:$0xf0] }
  0x7c   : > { %v1248_v38 = vunpack.c.l.b16 %v1197_v31  ;;  %v3091_v31 = vor.u32 %v3474_v22, %v3090_v17  ;;  %v3524_v17 = vld [vmem:[%s3638_s7 + $0x18] sm:$0xff] }
  0x7d   : > { %1107 = vmatmul.bf16.gmra.mxu3 %v1019_v33  ;;  %1418 = vmatmul.bf16.gmra.mxu0 %v1302_v34  ;;  %v523_v33 = vrot.slane %v521_v25, 1  ;;  %v777_v34 = vrot.slane %v3433_v26, 1  ;;  %v3330_v26 = vld [vmem:[%s3638_s7 + $0x8] sm:$0x8]  ;;  %v2379_v22 = vrot.slane %v3524_v17, 3 }
  0x7e   : > { %v1257_v48 = vpack.c.b16 %v1248_v38, %v1248_v38  ;;  %v2079_v38 = vrot.slane %v2077_v21, 3  ;;  %v1570_v42 = vrot.slane %v3091_v31, 2 }
  0x7f   : > { %v524_v40 = vsel %vm464_vm0, %v519_v32, %v523_v33  ;;  %v778_v41 = vsel %vm763_vm1, %v775_v10, %v777_v34  ;;  %v780_v11 = vsel %vm763_vm1, %v777_v34, %v779_v2  ;;  %v3491_v32 = vld [vmem:[%s3638_s7 + $0x10] sm:$0xff] }
  0x80   : > { %v1331_v52 = vshrl.u32 %v1257_v48, 16  ;;  %v1334_v53 = vshll.u32 %v1257_v48, 16  ;;  %v1818_v47 = vrot.slane %v3491_v32, 2  ;;  %v2080_v49 = vor.u32 %v2079_v38, %v2076_v37  ;;  %v3509_v37 = vld [vmem:[%s3638_s7 + $0x20] sm:$0xff] }
  0x82   : > { %v1333_v62 = vrot.slane %v1331_v52, 1  ;;  %v1336_v63 = vrot.slane %v1334_v53, 2 }
  0x84   : > { %v1337_v4 = vor.u32 %v1336_v63, %v1333_v62 }
  0x8b   : > { %617 = vmatmul.bf16.gmra.mxu1 %v508_v54  ;;  %865 = vmatmul.bf16.gmra.mxu2 %v774_v55 }
  0x8d   : > { %1112 = vmatmul.bf16.gmra.mxu3 %v1021_v56  ;;  %1423 = vmatmul.bf16.gmra.mxu0 %v1311_v57  ;;  %v525_v57 = vshrl.u32 %v3417_v18, 16 }
  0x8f   : > { %v527_v0 = vor.u32 %v525_v57, %v523_v33  ;;  %v3171_v33 = vor.u32 %v3490_v24, %v3170_v23 }
  0x91   : > { %v532_v10 = vsel %vm464_vm0, %v527_v0, %v531_v1  ;;  %v3508_v0 = vld [vmem:[%s3638_s7 + $0x18] sm:$0xff] }
  0x92   : > { %v2083_v1 = vshrl.u32 %v3508_v0, 16  ;;  %v2086_v2 = vshll.u32 %v3508_v0, 16 }
  0x9b   : > { %622 = vmatmul.bf16.gmra.mxu1 %v516_v13  ;;  %870 = vmatmul.bf16.gmra.mxu2 %v776_v14  ;;  %v3251_v13 = vor.u32 %v3506_v6, %v3250_v5 }
  0x9d   : > { %1117 = vmatmul.bf16.gmra.mxu3 %v1023_v15  ;;  %1428 = vmatmul.bf16.gmra.mxu0 %v1320_v16  ;;  %v1027_v15 = vsel %vm763_vm1, %v1024_v35, %v1026_v3  ;;  %v1338_v16 = vsel %vm1258_vm2, %v1328_v36, %v1337_v4  ;;  %v2066_v18 = vshrl.u32 %v3251_v13, 16  ;;  %v2069_v19 = vshll.u32 %v3251_v13, 16 }
  0x9f   : > { %v2068_v34 = vrot.slane %v2066_v18, 2  ;;  %v2071_v36 = vrot.slane %v2069_v19, 3 }
  0xa1   : > { %v2072_v48 = vor.u32 %v2071_v36, %v2068_v34 }
  0xa3   : > { %v2081_v62 = vsel %vm2064_vm4, %v2072_v48, %v2080_v49  ;;  %v3493_v48 = vld [vmem:[%s3638_s7 + $0x20] sm:$0xff] }
  0xa8   : > { %v3911_v39 = vpop.f32.mrf.mxu1 }
  0xaa   : > { %v3915_v43 = vpop.f32.mrf.mxu0 }
  0xab   : > { %627 = vmatmul.bf16.gmra.mxu1 %v524_v40  ;;  %875 = vmatmul.bf16.gmra.mxu2 %v778_v41  ;;  %v3523_v40 = vld [vmem:[%s3638_s7 + $0x10] sm:$0xff]  ;;  %v3331_v41 = vor.u32 %v3522_v27, %v3330_v26 }
  0xac   : > { %v2377_v45 = vrot.slane %v3523_v40, 3  ;;  %v2092_v40 = vshrl.u32 %v3509_v37, 16 }
  0xad   : > { %1122 = vmatmul.bf16.gmra.mxu3 %v1025_v44  ;;  %1433 = vmatmul.bf16.gmra.mxu0 %v1329_v46  ;;  %v1571_v44 = vrot.slane %v3475_v30, 2  ;;  %v1817_v46 = vrot.slane %v3171_v33, 2  ;;  %v2376_v50 = vrot.slane %v3331_v41, 3  ;;  %v2095_v41 = vshll.u32 %v3509_v37, 16 }
  0xae   : > { %v3921_v54 = vpop.f32.mrf.mxu2  ;;  %v2380_v36 = vsel %vm2375_vm5, %v2377_v45, %v2379_v22 }
  0xaf   : > { %v1572_v57 = vsel %vm1569_vm3, %v1570_v42, %v1571_v44  ;;  %v1819_v58 = vsel %vm1569_vm3, %v1817_v46, %v1818_v47  ;;  %v2378_v63 = vsel %vm2375_vm5, %v2376_v50, %v2377_v45 }
  0xb0   : > { %v3923_v55 = vpop.f32.mrf.mxu3  ;;  %v3925_v56 = vpop.f32.mrf.mxu1 }
  0xb2   : > { %v3927_v60 = vpop.f32.mrf.mxu0 }
  0xb6   : > { %v3931_v7 = vpop.f32.mrf.mxu2 }
  0xb8   : > { %v3933_v8 = vpop.f32.mrf.mxu3  ;;  %v3935_v9 = vpop.f32.mrf.mxu1 }
  0xba   : > { %v3940_v14 = vpop.f32.mrf.mxu0 }
  0xbb   : > { %632 = vmatmul.bf16.gmra.mxu1 %v532_v10  ;;  %880 = vmatmul.bf16.gmra.mxu2 %v780_v11  ;;  %v3476_v10 = vld [vmem:[%s3638_s7 + $0x14] sm:$0xff] }
  0xbc   : > { %v1573_v19 = vrot.slane %v3476_v10, 2 }
  0xbd   : > { %1127 = vmatmul.bf16.gmra.mxu3 %v1027_v15  ;;  %1438 = vmatmul.bf16.gmra.mxu0 %v1338_v16  ;;  %v2085_v15 = vrot.slane %v2083_v1, 2  ;;  %v2088_v16 = vrot.slane %v2086_v2, 3 }
  0xbe   : > { %v3948_v25 = vpop.f32.mrf.mxu2  ;;  %v1574_v30 = vsel %vm1569_vm3, %v1571_v44, %v1573_v19 }
  0xbf   : > { %v2089_v21 = vor.u32 %v2088_v16, %v2085_v15 }
  0xc0   : > { %v3952_v28 = vpop.f32.mrf.mxu3  ;;  %v3954_v29 = vpop.f32.mrf.mxu1 }
  0xc1   : > { %v2090_v34 = vsel %vm2064_vm4, %v2080_v49, %v2089_v21 }
  0xc2   : > { %v3958_v35 = vpop.f32.mrf.mxu0 }
  0xc6   : > { %v3961_v51 = vpop.f32.mrf.mxu2 }
  0xc8   : > { %v3963_v52 = vpop.f32.mrf.mxu3  ;;  %v598_v53 = vpop.f32.mrf.mxu1 }
  0xc9   : > { %v654_v59 = vadd.f32 %v598_v53, %v3915_v43  ;;  %v3492_v43 = vld [vmem:[%s3638_s7 + $0x18] sm:$0xff]  ;;  %v2094_v53 = vrot.slane %v2092_v40, 2 }
  0xca   : > { %v1404_v61 = vpop.f32.mrf.mxu0  ;;  %v1820_v20 = vrot.slane %v3492_v43, 2 }
  0xcb   : > { %1651 = vmatmul.bf16.vlgmr.msra.gmra.mxu1 %v1572_v57  ;;  %1898 = vmatmul.bf16.vlgmr.msra.gmra.mxu2 %v1819_v58  ;;  %v2097_v57 = vrot.slane %v2095_v41, 3  ;;  %v3525_v58 = vld [vmem:[%s3638_s7 + $0x20] sm:$0xff] }
  0xcc   : > { %v1821_v31 = vsel %vm1569_vm3, %v1818_v47, %v1820_v20  ;;  %v3477_v47 = vld [vmem:[%s3638_s7 + $0x1c] sm:$0xff]  ;;  %v2381_v0 = vrot.slane %v3525_v58, 3 }
  0xcd   : > { %2209 = vmatmul.bf16.vlgmr.msra.gmra.mxu3 %v2081_v62  ;;  %2457 = vmatmul.bf16.vlgmr.msra.gmra.mxu0 %v2378_v63  ;;  %v1822_v62 = vrot.slane %v3493_v48, 2  ;;  %v2098_v63 = vor.u32 %v2097_v57, %v2094_v53 }
  0xce   : > { %v846_v3 = vpop.f32.mrf.mxu2 }
  0xcf   : > { %v902_v4 = vadd.f32 %v846_v3, %v654_v59 }
  0xd0   : > { %v1093_v5 = vpop.f32.mrf.mxu3  ;;  %v600_v6 = vpop.f32.mrf.mxu1 }
  0xd1   : > { %v1149_v11 = vadd.f32 %v1093_v5, %v902_v4  ;;  %v655_v12 = vadd.f32 %v600_v6, %v3927_v60  ;;  %v1823_v6 = vsel %vm1569_vm3, %v1820_v20, %v1822_v62 }
  0xd2   : > { %v1406_v13 = vpop.f32.mrf.mxu0 }
  0xd3   : > { %v3975_v18 = vadd.f32 %v1404_v61, %v1149_v11  ;;  %v1575_v61 = vrot.slane %v3477_v47, 2  ;;  %v2099_v11 = vsel %vm2064_vm4, %v2089_v21, %v2098_v63 }
  0xd5   : > { %v1576_v5 = vsel %vm1569_vm3, %v1573_v19, %v1575_v61 }
  0xd6   : > { %v848_v23 = vpop.f32.mrf.mxu2 }
  0xd7   : > { %v903_v24 = vadd.f32 %v848_v23, %v655_v12  ;;  %v2382_v12 = vsel %vm2375_vm5, %v2379_v22, %v2381_v0 }
  0xd8   : > { %v1095_v26 = vpop.f32.mrf.mxu3  ;;  %v603_v27 = vpop.f32.mrf.mxu1 }
  0xd9   : > { %v1150_v60 = vadd.f32 %v1095_v26, %v903_v24  ;;  %v656_v32 = vadd.f32 %v603_v27, %v3940_v14  ;;  %v3478_v24 = vld [vmem:[%s3638_s7 + $0x24] sm:$0xff] }
  0xda   : > { %v1409_v33 = vpop.f32.mrf.mxu0  ;;  %v3494_v26 = vld [vmem:[%s3638_s7 + $0x28] sm:$0xff] }
  0xdb   : > { %1656 = vmatmul.bf16.gmra.mxu1 %v1574_v30  ;;  %1903 = vmatmul.bf16.gmra.mxu2 %v1821_v31  ;;  %v3983_v38 = vadd.f32 %v1406_v13, %v1150_v60  ;;  %v3510_v13 = vld [vmem:[%s3638_s7 + $0x28] sm:$0xff] }
  0xdc   : > { %v2101_v16 = vshrl.u32 %v3510_v13, 16  ;;  %v2104_v17 = vshll.u32 %v3510_v13, 16  ;;  %v3526_v60 = vld [vmem:[%s3638_s7 + $0x28] sm:$0xff] }
  0xdd   : > { %2214 = vmatmul.bf16.gmra.mxu3 %v2090_v34  ;;  %2462 = vmatmul.bf16.gmra.mxu0 %v2380_v36  ;;  %v1824_v34 = vrot.slane %v3494_v26, 2  ;;  %v2383_v37 = vrot.slane %v3526_v60, 3 }
  0xde   : > { %v851_v42 = vpop.f32.mrf.mxu2  ;;  %v2103_v30 = vrot.slane %v2101_v16, 2  ;;  %v2106_v31 = vrot.slane %v2104_v17, 3 }
  0xdf   : > { %v904_v44 = vadd.f32 %v851_v42, %v656_v32 }
  0xe0   : > { %v1098_v14 = vpop.f32.mrf.mxu3  ;;  %v605_v46 = vpop.f32.mrf.mxu1  ;;  %v2107_v36 = vor.u32 %v2106_v31, %v2103_v30 }
  0xe1   : > { %v1151_v50 = vadd.f32 %v1098_v14, %v904_v44  ;;  %v657_v49 = vadd.f32 %v605_v46, %v3958_v35  ;;  %v1825_v46 = vsel %vm1569_vm3, %v1822_v62, %v1824_v34 }
  0xe2   : > { %v1411_v45 = vpop.f32.mrf.mxu0 }
  0xe3   : > { %v3989_v59 = vadd.f32 %v1409_v33, %v1151_v50  ;;  %v1577_v33 = vrot.slane %v3478_v24, 2  ;;  %v2108_v50 = vsel %vm2064_vm4, %v2098_v63, %v2107_v36 }
  0xe5   : > { %v1578_v14 = vsel %vm1569_vm3, %v1575_v61, %v1577_v33 }
  0xe6   : > { %v853_v1 = vpop.f32.mrf.mxu2 }
  0xe7   : > { %v905_v2 = vadd.f32 %v853_v1, %v657_v49  ;;  %v2384_v49 = vsel %vm2375_vm5, %v2381_v0, %v2383_v37 }
  0xe8   : > { %v1100_v3 = vpop.f32.mrf.mxu3  ;;  %v608_v4 = vpop.f32.mrf.mxu1 }
  0xe9   : > { %v1152_v35 = vadd.f32 %v1100_v3, %v905_v2  ;;  %v658_v10 = vadd.f32 %v608_v4, %v3911_v39  ;;  %v3479_v2 = vld [vmem:[%s3638_s7 + $0x2c] sm:$0xff] }
  0xea   : > { %v1414_v43 = vpop.f32.mrf.mxu0  ;;  %v3495_v3 = vld [vmem:[%s3638_s7 + $0x30] sm:$0xff] }
  0xeb   : > { %1661 = vmatmul.bf16.gmra.mxu1 %v1576_v5  ;;  %1908 = vmatmul.bf16.gmra.mxu2 %v1823_v6  ;;  %v3997_v15 = vadd.f32 %v1411_v45, %v1152_v35  ;;  %v3511_v45 = vld [vmem:[%s3638_s7 + $0x30] sm:$0xff] }
  0xec   : > { %v2110_v57 = vshrl.u32 %v3511_v45, 16  ;;  %v2113_v58 = vshll.u32 %v3511_v45, 16  ;;  %v3527_v35 = vld [vmem:[%s3638_s7 + $0x30] sm:$0xff] }
  0xed   : > { %2219 = vmatmul.bf16.gmra.mxu3 %v2099_v11  ;;  %2467 = vmatmul.bf16.gmra.mxu0 %v2382_v12  ;;  %v1826_v11 = vrot.slane %v3495_v3, 2  ;;  %v2385_v13 = vrot.slane %v3527_v35, 3 }
  0xee   : > { %v856_v19 = vpop.f32.mrf.mxu2  ;;  %v2112_v5 = vrot.slane %v2110_v57, 2  ;;  %v2115_v6 = vrot.slane %v2113_v58, 3 }
  0xef   : > { %v906_v20 = vadd.f32 %v856_v19, %v658_v10 }
  0xf0   : > { %v1103_v39 = vpop.f32.mrf.mxu3  ;;  %v610_v23 = vpop.f32.mrf.mxu1  ;;  %v2116_v12 = vor.u32 %v2115_v6, %v2112_v5 }
  0xf1   : > { %v1153_v27 = vadd.f32 %v1103_v39, %v906_v20  ;;  %v659_v21 = vadd.f32 %v610_v23, %v3925_v56  ;;  %v1827_v23 = vsel %vm1569_vm3, %v1824_v34, %v1826_v11 }
  0xf2   : > { %v1416_v22 = vpop.f32.mrf.mxu0  ;;  %v2117_v26 = vsel %vm2064_vm4, %v2107_v36, %v2116_v12  ;;  %v3480_v36 = vld [vmem:[%s3638_s7 + $0x34] sm:$0xff] }
  0xf3   : > { %v4003_v32 = vadd.f32 %v1414_v43, %v1153_v27  ;;  %v1579_v43 = vrot.slane %v3479_v2, 2  ;;  %v2386_v27 = vsel %vm2375_vm5, %v2383_v37, %v2385_v13 }
  0xf5   : > { %v1580_v39 = vsel %vm1569_vm3, %v1577_v33, %v1579_v43 }
  0xf6   : > { %v858_v40 = vpop.f32.mrf.mxu2 }
  0xf7   : > { %v907_v41 = vadd.f32 %v858_v40, %v659_v21  ;;  %v3512_v21 = vld [vmem:[%s3638_s7 + $0x38] sm:$0xff] }
  0xf8   : > { %v1105_v42 = vpop.f32.mrf.mxu3  ;;  %v613_v44 = vpop.f32.mrf.mxu1  ;;  %v2119_v31 = vshrl.u32 %v3512_v21, 16  ;;  %v2122_v60 = vshll.u32 %v3512_v21, 16 }
  0xf9   : > { %v1154_v56 = vadd.f32 %v1105_v42, %v907_v41  ;;  %v660_v47 = vadd.f32 %v613_v44, %v3935_v9  ;;  %v3496_v42 = vld [vmem:[%s3638_s7 + $0x38] sm:$0xff] }
  0xfa   : > { %v1419_v48 = vpop.f32.mrf.mxu0 }
  0xfb   : > { %1666 = vmatmul.bf16.gmra.mxu1 %v1578_v14  ;;  %1913 = vmatmul.bf16.gmra.mxu2 %v1825_v46  ;;  %v4011_v53 = vadd.f32 %v1416_v22, %v1154_v56  ;;  %v2121_v14 = vrot.slane %v2119_v31, 2  ;;  %v2124_v46 = vrot.slane %v2122_v60, 3  ;;  %v3528_v56 = vld [vmem:[%s3638_s7 + $0x38] sm:$0xff] }
  0xfc   : > { %v2387_v45 = vrot.slane %v3528_v56, 3  ;;  %v1508_v56 = vld [vmem:[%s3638_s7 + $0x44] sm:$0x3] }
  0xfd   : > { %2224 = vmatmul.bf16.gmra.mxu3 %v2108_v50  ;;  %2472 = vmatmul.bf16.gmra.mxu0 %v2384_v49  ;;  %v1828_v50 = vrot.slane %v3496_v42, 2  ;;  %v2125_v49 = vor.u32 %v2124_v46, %v2121_v14 }
  0xfe   : > { %v861_v61 = vpop.f32.mrf.mxu2 }
  0xff   : > { %v908_v62 = vadd.f32 %v861_v61, %v660_v47 }
 0x100   : > { %v1108_v9 = vpop.f32.mrf.mxu3  ;;  %v615_v1 = vpop.f32.mrf.mxu1 }
 0x101   : > { %v1155_v4 = vadd.f32 %v1108_v9, %v908_v62  ;;  %v661_v63 = vadd.f32 %v615_v1, %v3954_v29  ;;  %v1829_v1 = vsel %vm1569_vm3, %v1826_v11, %v1828_v50 }
 0x102   : > { %v1421_v0 = vpop.f32.mrf.mxu0 }
 0x103   : > { %v4017_v10 = vadd.f32 %v1419_v48, %v1155_v4  ;;  %v1581_v48 = vrot.slane %v3480_v36, 2  ;;  %v2126_v4 = vsel %vm2064_vm4, %v2116_v12, %v2125_v49 }
 0x105   : > { %v1582_v9 = vsel %vm1569_vm3, %v1579_v43, %v1581_v48 }
 0x106   : > { %v863_v16 = vpop.f32.mrf.mxu2 }
 0x107   : > { %v909_v17 = vadd.f32 %v863_v16, %v661_v63  ;;  %v2388_v63 = vsel %vm2375_vm5, %v2385_v13, %v2387_v45  ;;  %v4045_v13 = vld [vmem:[%s3638_s7 + $0x40] sm:$0xff] }
 0x108   : > { %v1110_v19 = vpop.f32.mrf.mxu3  ;;  %v618_v20 = vpop.f32.mrf.mxu1 }
 0x109   : > { %v1156_v29 = vadd.f32 %v1110_v19, %v909_v17  ;;  %v662_v30 = vadd.f32 %v618_v20, %v3921_v54  ;;  %v4042_v17 = vld [vmem:[%s3638_s7 + $0x3c] sm:$0xff] }
 0x10a   : > { %v1424_v24 = vpop.f32.mrf.mxu0 }
 0x10b   : > { %1671 = vmatmul.bf16.gmra.mxu1 %v1580_v39  ;;  %1918 = vmatmul.bf16.gmra.mxu2 %v1827_v23  ;;  %v4024_v22 = vadd.f32 %v1421_v0, %v1156_v29  ;;  %v3513_v0 = vld [vmem:[%s3638_s7 + $0x40] sm:$0xff] }
 0x10c   : > { %v2128_v6 = vshrl.u32 %v3513_v0, 16  ;;  %v2131_v35 = vshll.u32 %v3513_v0, 16  ;;  %v3529_v29 = vld [vmem:[%s3638_s7 + $0x40] sm:$0xff] }
 0x10d   : > { %2229 = vmatmul.bf16.gmra.mxu3 %v2117_v26  ;;  %2477 = vmatmul.bf16.gmra.mxu0 %v2386_v27  ;;  %v1830_v27 = vrot.slane %v4045_v13, 2  ;;  %v2389_v31 = vrot.slane %v3529_v29, 3 }
 0x10e   : > { %v866_v33 = vpop.f32.mrf.mxu2  ;;  %v2130_v39 = vrot.slane %v2128_v6, 2  ;;  %v2133_v23 = vrot.slane %v2131_v35, 3 }
 0x10f   : > { %v910_v34 = vadd.f32 %v866_v33, %v662_v30  ;;  %v1831_v42 = vsel %vm1569_vm3, %v1828_v50, %v1830_v27  ;;  %v2390_v46 = vsel %vm2375_vm5, %v2387_v45, %v2389_v31 }
 0x110   : > { %v1113_v40 = vpop.f32.mrf.mxu3  ;;  %v620_v41 = vpop.f32.mrf.mxu1  ;;  %v2134_v30 = vor.u32 %v2133_v23, %v2130_v39 }
 0x111   : > { %v1157_v44 = vadd.f32 %v1113_v40, %v910_v34  ;;  %v663_v54 = vadd.f32 %v620_v41, %v3931_v7 }
 0x112   : > { %v1426_v37 = vpop.f32.mrf.mxu0  ;;  %v2135_v14 = vsel %vm2064_vm4, %v2125_v49, %v2134_v30 }
 0x113   : > { %v4030_v47 = vadd.f32 %v1424_v24, %v1157_v44  ;;  %v2003_v24 = vld [vmem:[%s3638_s7 + $0x48] sm:$0x7] }
 0x114   : > { %v2054_v60 = vunpack.c.l.b16 %v2003_v24 }
 0x116   : > { %v868_v57 = vpop.f32.mrf.mxu2 }
 0x117   : > { %v911_v58 = vadd.f32 %v868_v57, %v663_v54  ;;  %v2063_v54 = vpack.c.b16 %v2054_v60, %v2054_v60  ;;  %v2314_v57 = vld [vmem:[%s3638_s7 + $0x48] sm:$0x7] }
 0x118   : > { %v1115_v61 = vpop.f32.mrf.mxu3  ;;  %v623_v62 = vpop.f32.mrf.mxu1 }
 0x119   : > { %v1158_v2 = vadd.f32 %v1115_v61, %v911_v58  ;;  %v664_v5 = vadd.f32 %v623_v62, %v3948_v25  ;;  %v1583_v25 = vrot.slane %v4042_v17, 2  ;;  %v1559_v61 = vunpack.c.l.b16 %v1508_v56 }
 0x11a   : > { %v1429_v3 = vpop.f32.mrf.mxu0  ;;  %v2137_v62 = vshrl.u32 %v2063_v54, 16 }
 0x11b   : > { %1676 = vmatmul.bf16.gmra.mxu1 %v1582_v9  ;;  %1923 = vmatmul.bf16.gmra.mxu2 %v1829_v1  ;;  %v4038_v7 = vadd.f32 %v1426_v37, %v1158_v2  ;;  %v1584_v36 = vsel %vm1569_vm3, %v1581_v48, %v1583_v25  ;;  %v2140_v9 = vshll.u32 %v2063_v54, 16  ;;  %v2365_v1 = vunpack.c.l.b16 %v2314_v57 }
 0x11c   : > { %v2139_v6 = vrot.slane %v2137_v62, 2 }
 0x11d   : > { %2234 = vmatmul.bf16.gmra.mxu3 %v2126_v4  ;;  %2482 = vmatmul.bf16.gmra.mxu0 %v2388_v63  ;;  %v1568_v4 = vpack.c.b16 %v1559_v61, %v1559_v61  ;;  %v2142_v35 = vrot.slane %v2140_v9, 3 }
 0x11e   : > { %v871_v43 = vpop.f32.mrf.mxu2 }
 0x11f   : > { %v912_v11 = vadd.f32 %v871_v43, %v664_v5  ;;  %v2374_v43 = vpack.c.b16 %v2365_v1, %v2365_v1  ;;  %v2143_v17 = vor.u32 %v2142_v35, %v2139_v6 }
 0x120   : > { %v1118_v16 = vpop.f32.mrf.mxu3  ;;  %v625_v12 = vpop.f32.mrf.mxu1 }
 0x121   : > { %v1159_v19 = vadd.f32 %v1118_v16, %v912_v11  ;;  %v665_v21 = vadd.f32 %v625_v12, %v3961_v51  ;;  %v1756_v51 = vld [vmem:[%s3638_s7 + $0x48] sm:$0x3]  ;;  %v1585_v16 = vrot.slane %v1568_v4, 2  ;;  %v2391_v13 = vrot.slane %v2374_v43, 3  ;;  %s2684_s7 = sshll.u32 %s3605_s13, 4 }
 0x122   : > { %v1431_v20 = vpop.f32.mrf.mxu0  ;;  %v1807_v48 = vunpack.c.l.b16 %v1756_v51  ;;  %p183_p4 = scmp.lt.s32.totalorder %s2684_s7, 31 }
 0x123   : > { %v4049_v26 = vadd.f32 %v1429_v3, %v1159_v19  ;;  %v1586_v29 = vsel %vm1569_vm3, %v1583_v25, %v1585_v16 }
 0x124   : > { %v1816_v63 = vpack.c.b16 %v1807_v48, %v1807_v48  ;;  %s4146_s7 = smov (!%p183_p4, %s2684_s7), 31 }
 0x125   : > { %s2685_s18 = sshll.u32 %s4146_s7, 3 }
 0x126   : > { %v873_v33 = vpop.f32.mrf.mxu2  ;;  %v1832_v12 = vrot.slane %v1816_v63, 2  ;;  %s4084_s20 = scalar_lea.vmem %s4143_s2, %s2685_s18  ;;  %s4090_s23 = scalar_lea.vmem %s4144_s3, %s2685_s18 }
 0x127   : > { %v913_v34 = vadd.f32 %v873_v33, %v665_v21  ;;  %v2144_v33 = vsel %vm2064_vm4, %v2134_v30, %v2143_v17  ;;  %v2562_v1 = vld [vmem:[%s4084_s20] sm:$0xff]  ;;  %v2563_v6 = vld [vmem:[%s4084_s20 + $0x8] sm:$0xff] }
 0x128   : > { %v1120_v40 = vpop.f32.mrf.mxu3  ;;  %v628_v41 = vpop.f32.mrf.mxu1  ;;  %v1833_v24 = vsel %vm1569_vm3, %v1830_v27, %v1832_v12 }
 0x129   : > { %v1160_v44 = vadd.f32 %v1120_v40, %v913_v34  ;;  %v666_v50 = vadd.f32 %v628_v41, %v3923_v55  ;;  %v2392_v34 = vsel %vm2375_vm5, %v2389_v31, %v2391_v13 }
 0x12a   : > { %v1434_v37 = vpop.f32.mrf.mxu0 }
 0x12b   : > { %1681 = vmatmul.bf16.gmra.mxu1 %v1584_v36  ;;  %1928 = vmatmul.bf16.gmra.mxu2 %v1831_v42  ;;  %v4061_v58 = vadd.f32 %v1431_v20, %v1160_v44 }
 0x12d   : > { %2239 = vmatmul.bf16.gmra.mxu3 %v2135_v14  ;;  %2487 = vmatmul.bf16.gmra.mxu0 %v2390_v46 }
 0x12e   : > { %v876_v49 = vpop.f32.mrf.mxu2 }
 0x12f   : > { %v914_v2 = vadd.f32 %v876_v49, %v666_v50 }
 0x130   : > { %v1123_v45 = vpop.f32.mrf.mxu3  ;;  %v630_v3 = vpop.f32.mrf.mxu1 }
 0x131   : > { %v1161_v0 = vadd.f32 %v1123_v45, %v914_v2  ;;  %v667_v55 = vadd.f32 %v630_v3, %v3933_v8 }
 0x132   : > { %v1436_v5 = vpop.f32.mrf.mxu0 }
 0x133   : > { %v4064_v11 = vadd.f32 %v1434_v37, %v1161_v0 }
 0x136   : > { %v878_v19 = vpop.f32.mrf.mxu2 }
 0x137   : > { %v915_v20 = vadd.f32 %v878_v19, %v667_v55 }
 0x138   : > { %v1125_v39 = vpop.f32.mrf.mxu3  ;;  %v633_v23 = vpop.f32.mrf.mxu1 }
 0x139   : > { %v1162_v21 = vadd.f32 %v1125_v39, %v915_v20  ;;  %v668_v40 = vadd.f32 %v633_v23, %v3952_v28  ;;  %v2564_v20 = vld [vmem:[%s4084_s20 + $0x10] sm:$0xff] }
 0x13a   : > { %v1439_v60 = vpop.f32.mrf.mxu0 }
 0x13b   : > { %1686 = vmatmul.bf16.gmra.mxu1 %v1586_v29  ;;  %1933 = vmatmul.bf16.gmra.mxu2 %v1833_v24  ;;  %v4071_v8 = vadd.f32 %v1436_v5, %v1162_v21 }
 0x13d   : > { %2244 = vmatmul.bf16.gmra.mxu3 %v2144_v33  ;;  %2492 = vmatmul.bf16.gmra.mxu0 %v2392_v34 }
 0x13e   : > { %v881_v41 = vpop.f32.mrf.mxu2 }
 0x13f   : > { %v916_v36 = vadd.f32 %v881_v41, %v668_v40  ;;  %v2565_v40 = vld [vmem:[%s4084_s20 + $0x18] sm:$0xff] }
 0x140   : > { %v1128_v25 = vpop.f32.mrf.mxu3  ;;  %v635_v42 = vpop.f32.mrf.mxu1 }
 0x141   : > { %v1163_v27 = vadd.f32 %v1128_v25, %v916_v36  ;;  %v669_v30 = vadd.f32 %v635_v42, %v3963_v52 }
 0x142   : > { %v1441_v44 = vpop.f32.mrf.mxu0 }
 0x143   : > { %v4075_v37 = vadd.f32 %v1439_v60, %v1163_v27 }
 0x146   : > { %v883_v31 = vpop.f32.mrf.mxu2 }
 0x147   : > { %v917_v14 = vadd.f32 %v883_v31, %v669_v30 }
 0x148   : > { %v1130_v46 = vpop.f32.mrf.mxu3  ;;  %v1652_v56 = vpop.f32.mrf.mxu1 }
 0x149   : > { %v1164_v51 = vadd.f32 %v1130_v46, %v917_v14  ;;  %v1708_v57 = vadd.f32 %v1652_v56, %v3975_v18  ;;  %v2566_v14 = vld [vmem:[%s4084_s20 + $0x20] sm:$0xff] }
 0x14a   : > { %v2458_v54 = vpop.f32.mrf.mxu0 }
 0x14b   : > { %v4078_v28 = vadd.f32 %v1441_v44, %v1164_v51 }
 0x14e   : > { %v1899_v61 = vpop.f32.mrf.mxu2 }
 0x14f   : > { %v1955_v48 = vadd.f32 %v1899_v61, %v1708_v57 }
 0x150   : > { %v2210_v52 = vpop.f32.mrf.mxu3  ;;  %v1654_v50 = vpop.f32.mrf.mxu1 }
 0x151   : > { %v2266_v62 = vadd.f32 %v2210_v52, %v1955_v48  ;;  %v1709_v2 = vadd.f32 %v1654_v50, %v3983_v38  ;;  %v2567_v50 = vld [vmem:[%s4084_s20 + $0x28] sm:$0xff] }
 0x152   : > { %v2460_v9 = vpop.f32.mrf.mxu0 }
 0x153   : > { %v2514_v49 = vadd.f32 %v2458_v54, %v2266_v62 }
 0x155   : > { %v2578_v18 = vadd.f32 %v2562_v1, %v2514_v49 }
 0x156   : > { %v1901_v45 = vpop.f32.mrf.mxu2 }
 0x157   : > { %2594 = vst [vmem:[%s4090_s23] sm:$0xff] %v2578_v18  ;;  %v1956_v3 = vadd.f32 %v1901_v45, %v1709_v2 }
 0x158   : > { %v2212_v4 = vpop.f32.mrf.mxu3  ;;  %v1657_v63 = vpop.f32.mrf.mxu1 }
 0x159   : > { %v2267_v0 = vadd.f32 %v2212_v4, %v1956_v3  ;;  %v1710_v16 = vadd.f32 %v1657_v63, %v3989_v59  ;;  %v2568_v4 = vld [vmem:[%s4084_s20 + $0x30] sm:$0xff] }
 0x15a   : > { %v2463_v5 = vpop.f32.mrf.mxu0 }
 0x15b   : > { %v2515_v35 = vadd.f32 %v2460_v9, %v2267_v0 }
 0x15d   : > { %v2579_v43 = vadd.f32 %v2563_v6, %v2515_v35 }
 0x15e   : > { %v1904_v12 = vpop.f32.mrf.mxu2 }
 0x15f   : > { %2595 = vst [vmem:[%s4090_s23 + $0x8] sm:$0xff] %v2579_v43  ;;  %v1957_v55 = vadd.f32 %v1904_v12, %v1710_v16 }
 0x160   : > { %v2215_v17 = vpop.f32.mrf.mxu3  ;;  %v1659_v38 = vpop.f32.mrf.mxu1 }
 0x161   : > { %v2268_v13 = vadd.f32 %v2215_v17, %v1957_v55  ;;  %v1711_v29 = vadd.f32 %v1659_v38, %v3997_v15  ;;  %v2569_v55 = vld [vmem:[%s4084_s20 + $0x38] sm:$0xff] }
 0x162   : > { %v2465_v19 = vpop.f32.mrf.mxu0 }
 0x163   : > { %v2516_v39 = vadd.f32 %v2463_v5, %v2268_v13 }
 0x165   : > { %v2580_v23 = vadd.f32 %v2564_v20, %v2516_v39 }
 0x166   : > { %v1906_v24 = vpop.f32.mrf.mxu2 }
 0x167   : > { %2596 = vst [vmem:[%s4090_s23 + $0x10] sm:$0xff] %v2580_v23  ;;  %v1958_v21 = vadd.f32 %v1906_v24, %v1711_v29  ;;  %v2570_v24 = vld [vmem:[%s4084_s20 + $0x40] sm:$0xff] }
 0x168   : > { %v2217_v60 = vpop.f32.mrf.mxu3  ;;  %v1662_v59 = vpop.f32.mrf.mxu1 }
 0x169   : > { %v2269_v33 = vadd.f32 %v2217_v60, %v1958_v21  ;;  %v1712_v25 = vadd.f32 %v1662_v59, %v4003_v32 }
 0x16a   : > { %v2468_v34 = vpop.f32.mrf.mxu0 }
 0x16b   : > { %v2517_v41 = vadd.f32 %v2465_v19, %v2269_v33 }
 0x16d   : > { %v2581_v36 = vadd.f32 %v2565_v40, %v2517_v41 }
 0x16e   : > { %v1909_v42 = vpop.f32.mrf.mxu2 }
 0x16f   : > { %2597 = vst [vmem:[%s4090_s23 + $0x18] sm:$0xff] %v2581_v36  ;;  %v1959_v27 = vadd.f32 %v1909_v42, %v1712_v25  ;;  %v2571_v25 = vld [vmem:[%s4084_s20 + $0x48] sm:$0xff] }
 0x170   : > { %v2220_v44 = vpop.f32.mrf.mxu3  ;;  %v1664_v15 = vpop.f32.mrf.mxu1 }
 0x171   : > { %v2270_v30 = vadd.f32 %v2220_v44, %v1959_v27  ;;  %v1713_v51 = vadd.f32 %v1664_v15, %v4011_v53 }
 0x172   : > { %v2470_v31 = vpop.f32.mrf.mxu0 }
 0x173   : > { %v2518_v46 = vadd.f32 %v2468_v34, %v2270_v30 }
 0x175   : > { %v2582_v56 = vadd.f32 %v2566_v14, %v2518_v46  ;;  %v2572_v46 = vld [vmem:[%s4084_s20 + $0x50] sm:$0xff] }
 0x176   : > { %v1911_v54 = vpop.f32.mrf.mxu2 }
 0x177   : > { %2598 = vst [vmem:[%s4090_s23 + $0x20] sm:$0xff] %v2582_v56  ;;  %v1960_v57 = vadd.f32 %v1911_v54, %v1713_v51 }
 0x178   : > { %v2222_v61 = vpop.f32.mrf.mxu3  ;;  %v1667_v32 = vpop.f32.mrf.mxu1 }
 0x179   : > { %v2271_v48 = vadd.f32 %v2222_v61, %v1960_v57  ;;  %v1714_v1 = vadd.f32 %v1667_v32, %v4017_v10 }
 0x17a   : > { %v2473_v52 = vpop.f32.mrf.mxu0 }
 0x17b   : > { %v2519_v62 = vadd.f32 %v2470_v31, %v2271_v48 }
 0x17d   : > { %v2583_v9 = vadd.f32 %v2567_v50, %v2519_v62  ;;  %v2573_v50 = vld [vmem:[%s4084_s20 + $0x58] sm:$0xff] }
 0x17e   : > { %v1914_v49 = vpop.f32.mrf.mxu2 }
 0x17f   : > { %2599 = vst [vmem:[%s4090_s23 + $0x28] sm:$0xff] %v2583_v9  ;;  %v1961_v18 = vadd.f32 %v1914_v49, %v1714_v1 }
 0x180   : > { %v2225_v2 = vpop.f32.mrf.mxu3  ;;  %v1669_v53 = vpop.f32.mrf.mxu1 }
 0x181   : > { %v2272_v45 = vadd.f32 %v2225_v2, %v1961_v18  ;;  %v1715_v5 = vadd.f32 %v1669_v53, %v4024_v22 }
 0x182   : > { %v2475_v3 = vpop.f32.mrf.mxu0 }
 0x183   : > { %v2520_v63 = vadd.f32 %v2473_v52, %v2272_v45 }
 0x185   : > { %v2584_v0 = vadd.f32 %v2568_v4, %v2520_v63 }
 0x186   : > { %v1916_v6 = vpop.f32.mrf.mxu2 }
 0x187   : > { %2600 = vst [vmem:[%s4090_s23 + $0x30] sm:$0xff] %v2584_v0  ;;  %v1962_v35 = vadd.f32 %v1916_v6, %v1715_v5 }
 0x188   : > { %v2227_v43 = vpop.f32.mrf.mxu3  ;;  %v1672_v10 = vpop.f32.mrf.mxu1 }
 0x189   : > { %v2273_v16 = vadd.f32 %v2227_v43, %v1962_v35  ;;  %v1716_v13 = vadd.f32 %v1672_v10, %v4030_v47 }
 0x18a   : > { %v2478_v12 = vpop.f32.mrf.mxu0 }
 0x18b   : > { %v2521_v17 = vadd.f32 %v2475_v3, %v2273_v16  ;;  %v2574_v3 = vld [vmem:[%s4084_s20 + $0x60] sm:$0xff]  ;;  %v2575_v16 = vld [vmem:[%s4084_s20 + $0x68] sm:$0xff] }
 0x18d   : > { %v2585_v38 = vadd.f32 %v2569_v55, %v2521_v17 }
 0x18e   : > { %v1919_v19 = vpop.f32.mrf.mxu2 }
 0x18f   : > { %2601 = vst [vmem:[%s4090_s23 + $0x38] sm:$0xff] %v2585_v38  ;;  %v1963_v20 = vadd.f32 %v1919_v19, %v1716_v13 }
 0x190   : > { %v2230_v39 = vpop.f32.mrf.mxu3  ;;  %v1674_v22 = vpop.f32.mrf.mxu1 }
 0x191   : > { %v2274_v23 = vadd.f32 %v2230_v39, %v1963_v20  ;;  %v1717_v59 = vadd.f32 %v1674_v22, %v4038_v7  ;;  %v2576_v39 = vld [vmem:[%s4084_s20 + $0x70] sm:$0xff] }
 0x192   : > { %v2480_v29 = vpop.f32.mrf.mxu0 }
 0x193   : > { %v2522_v21 = vadd.f32 %v2478_v12, %v2274_v23 }
 0x195   : > { %v2586_v60 = vadd.f32 %v2570_v24, %v2522_v21 }
 0x196   : > { %v1921_v33 = vpop.f32.mrf.mxu2 }
 0x197   : > { %2602 = vst [vmem:[%s4090_s23 + $0x40] sm:$0xff] %v2586_v60  ;;  %v1964_v34 = vadd.f32 %v1921_v33, %v1717_v59 }
 0x198   : > { %v2232_v40 = vpop.f32.mrf.mxu3  ;;  %v1677_v47 = vpop.f32.mrf.mxu1 }
 0x199   : > { %v2275_v41 = vadd.f32 %v2232_v40, %v1964_v34  ;;  %v1718_v44 = vadd.f32 %v1677_v47, %v4049_v26  ;;  %v2577_v34 = vld [vmem:[%s4084_s20 + $0x78] sm:$0xff] }
 0x19a   : > { %v2483_v36 = vpop.f32.mrf.mxu0 }
 0x19b   : > { %v2523_v42 = vadd.f32 %v2480_v29, %v2275_v41 }
 0x19d   : > { %v2587_v27 = vadd.f32 %v2571_v25, %v2523_v42 }
 0x19e   : > { %v1924_v15 = vpop.f32.mrf.mxu2 }
 0x19f   : > { %2603 = vst [vmem:[%s4090_s23 + $0x48] sm:$0xff] %v2587_v27  ;;  %v1965_v30 = vadd.f32 %v1924_v15, %v1718_v44 }
 0x1a0   : > { %v2235_v31 = vpop.f32.mrf.mxu3  ;;  %v1679_v7 = vpop.f32.mrf.mxu1 }
 0x1a1   : > { %v2276_v14 = vadd.f32 %v2235_v31, %v1965_v30  ;;  %v1719_v57 = vadd.f32 %v1679_v7, %v4061_v58 }
 0x1a2   : > { %v2485_v56 = vpop.f32.mrf.mxu0 }
 0x1a3   : > { %v2524_v51 = vadd.f32 %v2483_v36, %v2276_v14 }
 0x1a5   : > { %v2588_v54 = vadd.f32 %v2572_v46, %v2524_v51 }
 0x1a6   : > { %v1926_v61 = vpop.f32.mrf.mxu2 }
 0x1a7   : > { %2604 = vst [vmem:[%s4090_s23 + $0x50] sm:$0xff] %v2588_v54  ;;  %v1966_v32 = vadd.f32 %v1926_v61, %v1719_v57 }
 0x1a8   : > { %v2237_v48 = vpop.f32.mrf.mxu3  ;;  %v1682_v26 = vpop.f32.mrf.mxu1 }
 0x1a9   : > { %v2277_v52 = vadd.f32 %v2237_v48, %v1966_v32  ;;  %v1720_v49 = vadd.f32 %v1682_v26, %v4064_v11 }
 0x1aa   : > { %v2488_v9 = vpop.f32.mrf.mxu0 }
 0x1ab   : > { %v2525_v62 = vadd.f32 %v2485_v56, %v2277_v52 }
 0x1ad   : > { %v2589_v1 = vadd.f32 %v2573_v50, %v2525_v62 }
 0x1ae   : > { %v1929_v18 = vpop.f32.mrf.mxu2 }
 0x1af   : > { %2605 = vst [vmem:[%s4090_s23 + $0x58] sm:$0xff] %v2589_v1  ;;  %v1967_v2 = vadd.f32 %v1929_v18, %v1720_v49 }
 0x1b0   : > { %v2240_v53 = vpop.f32.mrf.mxu3  ;;  %v1684_v58 = vpop.f32.mrf.mxu1 }
 0x1b1   : > { %v2278_v45 = vadd.f32 %v2240_v53, %v1967_v2  ;;  %v1721_v0 = vadd.f32 %v1684_v58, %v4071_v8 }
 0x1b2   : > { %v2490_v5 = vpop.f32.mrf.mxu0 }
 0x1b3   : > { %v2526_v4 = vadd.f32 %v2488_v9, %v2278_v45 }
 0x1b5   : > { %v2590_v63 = vadd.f32 %v2574_v3, %v2526_v4 }
 0x1b6   : > { %v1931_v6 = vpop.f32.mrf.mxu2 }
 0x1b7   : > { %2606 = vst [vmem:[%s4090_s23 + $0x60] sm:$0xff] %v2590_v63  ;;  %v1968_v35 = vadd.f32 %v1931_v6, %v1721_v0 }
 0x1b8   : > { %v2242_v43 = vpop.f32.mrf.mxu3  ;;  %v1687_v11 = vpop.f32.mrf.mxu1 }
 0x1b9   : > { %v2279_v10 = vadd.f32 %v2242_v43, %v1968_v35  ;;  %v1722_v17 = vadd.f32 %v1687_v11, %v4075_v37 }
 0x1ba   : > { %v2493_v8 = vpop.f32.mrf.mxu0 }
 0x1bb   : > { %v2527_v12 = vadd.f32 %v2490_v5, %v2279_v10 }
 0x1bd   : > { %v2591_v55 = vadd.f32 %v2575_v16, %v2527_v12 }
 0x1be   : > { %v1934_v38 = vpop.f32.mrf.mxu2 }
 0x1bf   : > { %2607 = vst [vmem:[%s4090_s23 + $0x68] sm:$0xff] %v2591_v55  ;;  %v1969_v13 = vadd.f32 %v1934_v38, %v1722_v17 }
 0x1c0   : > { %v2245_v19 = vpop.f32.mrf.mxu3  ;;  %v1689_v22 = vpop.f32.mrf.mxu1 }
 0x1c1   : > { %v2280_v20 = vadd.f32 %v2245_v19, %v1969_v13  ;;  %v1723_v24 = vadd.f32 %v1689_v22, %v4078_v28 }
 0x1c2   : > { %v2495_v37 = vpop.f32.mrf.mxu0 }
 0x1c3   : > { %v2528_v23 = vadd.f32 %v2493_v8, %v2280_v20 }
 0x1c5   : > { %v2592_v29 = vadd.f32 %v2576_v39, %v2528_v23 }
 0x1c6   : > { %v1936_v21 = vpop.f32.mrf.mxu2 }
 0x1c7   : > { %2608 = vst [vmem:[%s4090_s23 + $0x70] sm:$0xff] %v2592_v29  ;;  %v1970_v60 = vadd.f32 %v1936_v21, %v1723_v24 }
 0x1c8   : > { %v2247_v59 = vpop.f32.mrf.mxu3 }
 0x1c9   : > { %v2281_v33 = vadd.f32 %v2247_v59, %v1970_v60 }
 0x1cb   : > { %v2529_v40 = vadd.f32 %v2495_v37, %v2281_v33 }
 0x1cd   : > { %v2593_v47 = vadd.f32 %v2577_v34, %v2529_v40 }
 0x1cf   : > { %2609 = vst [vmem:[%s4090_s23 + $0x78] sm:$0xff] %v2593_v47 }
 0x1d0 PF: > { %s13_s12 = sadd.s32 1, %s3577_s12  }
 0x1d1   : > { %p10_p5 = scmp.ge.s32.totalorder %s13_s12, 4  }
 0x1d3   :  { %12 = sbr.rel (!%p10_p5) target bundleno = 1 (0x1), region = 73 }

// kernel: network_block_forward.6
= control target key start
LH: loop header
LB: loop body
LE: loop exit
PB: predicated region body
PF: predicated region fallthrough
CT: control target
= control target key end

     0   :  { %s3684_s15 = smov 0   ;;  %s4239_s0 = inlined_call_operand.vmem [shape: bf16[2,160,128], index: 0, kind: input, shape index: {}]   ;;  %s4240_s1 = inlined_call_operand.vmem [shape: bf16[9,128,128], index: 1, kind: input, shape index: {}]   ;;  %s4241_s2 = inlined_call_operand.vmem [shape: f32[1,128], index: 2, kind: input, shape index: {}]   ;;  %s4242_s3 = inlined_call_operand.vmem [shape: f32[1,128], index: 3, kind: input, shape index: {}]   ;;  %s4243_s4 = inlined_call_operand.vmem [shape: bf16[256,128], index: 4, kind: output, shape index: {}]  }
   0x1 LB: > { %s3690_s16 = sadd.s32 4294967295, %s3657_s15   ;;  %p2715_p0 = scmp.ge.s32.totalorder %s3657_s15, 1  ;;  %s3657_s15 = sphi %s3684_s15, %s14_s15  }
   0x2   : > { %p162_p1 = scmp.lt.s32.totalorder %s3657_s15, 3 }
   0x4   : > { %p163_p2 = pnand %p2715_p0, %p162_p1 }
   0x5   : > { %p188_p3 = scmp.lt.s32.totalorder (!%p163_p2), %s3690_s16, 1 }
   0x6   : > { %166 = sbr.rel (%p163_p2) target bundleno = 470 (0x1d6), region = 36 }
   0xb   : > { %v3440_v0 = vld [vmem:[%s4240_s1 + $0x38] sm:$0xff]  ;;  %v3439_v1 = vld [vmem:[%s4240_s1 + $0x30] sm:$0xff]  ;;  %v3438_v2 = vld [vmem:[%s4240_s1 + $0x28] sm:$0xff]  ;;  %s189_s29 = scalar_select %p188_p3, %s3690_s16, 1  ;;  %vm469_vm0 = vsmask.f32 7424 }
   0xc   : > { %3616 = vmatpush.bf16.msra.mxu1 %v3440_v0  ;;  %3617 = vmatpush.bf16.msra.mxu2 %v3440_v0  ;;  %v3437_v3 = vld [vmem:[%s4240_s1 + $0x20] sm:$0xff]  ;;  %v3436_v4 = vld [vmem:[%s4240_s1 + $0x18] sm:$0xff]  ;;  %v3435_v5 = vld [vmem:[%s4240_s1 + $0x10] sm:$0xff]  ;;  %vm768_vm1 = vcmask 1046528   ;;  %vm1263_vm2 = vsmask.f32 6400 }
   0xd   : > { %3618 = vmatpush.bf16.msra.mxu3 %v3440_v0  ;;  %327 = vmatpush.bf16.msra.mxu0 %v3440_v0  ;;  %v3434_v6 = vld [vmem:[%s4240_s1 + $0x8] sm:$0xff]  ;;  %s3640_s6 = smul.u32 80, %s189_s29  ;;  %v3433_v7 = vld [vmem:[%s4240_s1] sm:$0xff]  ;;  %v3472_v8 = vld [vmem:[%s4240_s1 + $0xb8] sm:$0xff]  ;;  %vm1574_vm3 = vcmask 1045504   ;;  %vm2380_vm5 = vcmask 1044480  }
   0xe   : > { %v3456_v9 = vld [vmem:[%s4240_s1 + $0x78] sm:$0xff]  ;;  %v3471_v16 = vld [vmem:[%s4240_s1 + $0xb0] sm:$0xff]  ;;  %v3470_v20 = vld [vmem:[%s4240_s1 + $0xa8] sm:$0xff]  ;;  %vm2069_vm4 = vsmask.f32 5376 }
   0xf   : > { %s3723_s11 = scalar_lea.vmem %s4239_s0, %s3640_s6  ;;  %v3488_v14 = vld [vmem:[%s4240_s1 + $0xf8] sm:$0xff]  ;;  %v3455_v17 = vld [vmem:[%s4240_s1 + $0x70] sm:$0xff]  ;;  %v3454_v21 = vld [vmem:[%s4240_s1 + $0x68] sm:$0xff] }
  0x10   : > { %3619 = vmatpush.bf16.msra.mxu1 %v3439_v1  ;;  %3620 = vmatpush.bf16.msra.mxu2 %v3439_v1  ;;  %v3427_v10 = vld [vmem:[%s3723_s11 + $0x10] sm:$0xff]  ;;  %v3429_v11 = vld [vmem:[%s3723_s11 + $0x20] sm:$0xff]  ;;  %v3504_v15 = vld [vmem:[%s4240_s1 + $0x138] sm:$0xff] }
  0x11   : > { %3621 = vmatpush.bf16.msra.mxu3 %v3439_v1  ;;  %328 = vmatpush.bf16.msra.mxu0 %v3439_v1  ;;  %v3431_v12 = vld [vmem:[%s3723_s11 + $0x30] sm:$0xff]  ;;  %v3425_v13 = vld [vmem:[%s3723_s11] sm:$0xff]  ;;  %v3486_v22 = vld [vmem:[%s4240_s1 + $0xe8] sm:$0xff] }
  0x12   : > { %v3487_v18 = vld [vmem:[%s4240_s1 + $0xf0] sm:$0xff]  ;;  %v3502_v23 = vld [vmem:[%s4240_s1 + $0x128] sm:$0xff]  ;;  %v3469_v24 = vld [vmem:[%s4240_s1 + $0xa0] sm:$0xff] }
  0x13   : > { %v3503_v19 = vld [vmem:[%s4240_s1 + $0x130] sm:$0xff]  ;;  %v3453_v25 = vld [vmem:[%s4240_s1 + $0x60] sm:$0xff]  ;;  %v3468_v28 = vld [vmem:[%s4240_s1 + $0x98] sm:$0xff] }
  0x14   : > { %3622 = vmatpush.bf16.msra.mxu1 %v3438_v2  ;;  %3623 = vmatpush.bf16.msra.mxu2 %v3438_v2  ;;  %v3485_v26 = vld [vmem:[%s4240_s1 + $0xe0] sm:$0xff]  ;;  %v3452_v29 = vld [vmem:[%s4240_s1 + $0x58] sm:$0xff]  ;;  %v3489_v31 = vld [vmem:[%s3723_s11 + $0x4] sm:$0xf0] }
  0x15   : > { %3624 = vmatpush.bf16.msra.mxu3 %v3438_v2  ;;  %329 = vmatpush.bf16.msra.mxu0 %v3438_v2  ;;  %v3501_v27 = vld [vmem:[%s4240_s1 + $0x120] sm:$0xff]  ;;  %v3428_v32 = vld [vmem:[%s3723_s11 + $0x18] sm:$0xff]  ;;  %v3430_v33 = vld [vmem:[%s3723_s11 + $0x28] sm:$0xff] }
  0x16   : > { %v3041_v30 = vld [vmem:[%s3723_s11 + $0x4] sm:$0xe]  ;;  %v3432_v35 = vld [vmem:[%s3723_s11 + $0x38] sm:$0xff]  ;;  %v3426_v36 = vld [vmem:[%s3723_s11 + $0x8] sm:$0xff] }
  0x17   : > { %v3441_v34 = vld [vmem:[%s3723_s11] sm:$0xff]  ;;  %v3484_v37 = vld [vmem:[%s4240_s1 + $0xd8] sm:$0xff]  ;;  %v3490_v39 = vld [vmem:[%s3723_s11 + $0xc] sm:$0xff]  ;;  %v3042_v40 = vor.u32 %v3489_v31, %v3041_v30 }
  0x18   : > { %3625 = vmatpush.bf16.msra.mxu1 %v3437_v3  ;;  %3626 = vmatpush.bf16.msra.mxu2 %v3437_v3  ;;  %v3500_v38 = vld [vmem:[%s4240_s1 + $0x118] sm:$0xff]  ;;  %v3467_v41 = vld [vmem:[%s4240_s1 + $0x90] sm:$0xff]  ;;  %v3810_v45 = vld [vmem:[%s3723_s11 + $0x8] sm:$0xff]  ;;  %v473_v46 = vshll.u32 %v3441_v34, 16  ;;  %v1273_v53 = vshrl.u32 %v3490_v39, 16  ;;  %v1276_v54 = vshll.u32 %v3490_v39, 16 }
  0x19   : > { %3627 = vmatpush.bf16.msra.mxu3 %v3437_v3  ;;  %330 = vmatpush.bf16.msra.mxu0 %v3437_v3  ;;  %v3451_v42 = vld [vmem:[%s4240_s1 + $0x50] sm:$0xff]  ;;  %v2881_v47 = vld [vmem:[%s3723_s11] sm:$0xe]  ;;  %v3457_v48 = vld [vmem:[%s3723_s11] sm:$0xf0]  ;;  %v1265_v51 = vshrl.u32 %v3042_v40, 16 }
  0x1a   : > { %v3483_v43 = vld [vmem:[%s4240_s1 + $0xd0] sm:$0xff]  ;;  %v2961_v49 = vld [vmem:[%s3723_s11 + $0x4] sm:$0xe]  ;;  %v3473_v50 = vld [vmem:[%s3723_s11 + $0x4] sm:$0xf0]  ;;  %v1268_v52 = vshll.u32 %v3042_v40, 16  ;;  %v2882_v62 = vor.u32 %v3457_v48, %v2881_v47 }
  0x1b   : > { %v3499_v44 = vld [vmem:[%s4240_s1 + $0x110] sm:$0xff]  ;;  %v3466_v55 = vld [vmem:[%s4240_s1 + $0x88] sm:$0xff]  ;;  %v471_v57 = vshrl.u32 %v3441_v34, 16  ;;  %v475_v58 = vrot.slane %v473_v46, 1  ;;  %v478_v60 = vshll.u32 %v3810_v45, 16  ;;  %v2962_v63 = vor.u32 %v3473_v50, %v2961_v49 }
  0x1c   : > { %3628 = vmatpush.bf16.msra.mxu1 %v3436_v4  ;;  %3629 = vmatpush.bf16.msra.mxu2 %v3436_v4  ;;  %v3450_v56 = vld [vmem:[%s4240_s1 + $0x48] sm:$0xff]  ;;  %v1267_v2 = vrot.slane %v1265_v51, 1  ;;  %v1270_v3 = vrot.slane %v1268_v52, 2  ;;  %v3567_v30 = vld [vmem:[%s4240_s1 + $0x230] sm:$0xff] }
  0x1d   : > { %3630 = vmatpush.bf16.msra.mxu3 %v3436_v4  ;;  %331 = vmatpush.bf16.msra.mxu0 %v3436_v4  ;;  %v3482_v59 = vld [vmem:[%s4240_s1 + $0xc8] sm:$0xff]  ;;  %v1275_v4 = vrot.slane %v1273_v53, 1  ;;  %v3443_v31 = vld [vmem:[%s3723_s11 + $0x10] sm:$0xff]  ;;  %v3492_v53 = vld [vmem:[%s3723_s11 + $0x1c] sm:$0xff] }
  0x1e   : > { %v3827_v61 = vld [vmem:[%s3723_s11 + $0x8] sm:$0xff]  ;;  %v486_v39 = vshll.u32 %v3443_v31, 16  ;;  %v3459_v40 = vld [vmem:[%s3723_s11 + $0x10] sm:$0xff] }
  0x1f   : > { %v3498_v0 = vld [vmem:[%s4240_s1 + $0x108] sm:$0xff]  ;;  %v772_v47 = vrot.slane %v3459_v40, 1 }
  0x20   : > { %3631 = vmatpush.bf16.msra.mxu1 %v3435_v5  ;;  %3632 = vmatpush.bf16.msra.mxu2 %v3435_v5  ;;  %v3833_v1 = vld [vmem:[%s3723_s11 + $0xc] sm:$0xff]  ;;  %v488_v46 = vrot.slane %v486_v39, 1 }
  0x21   : > { %3633 = vmatpush.bf16.msra.mxu3 %v3435_v5  ;;  %332 = vmatpush.bf16.msra.mxu0 %v3435_v5  ;;  %v1278_v5 = vrot.slane %v1276_v54, 2  ;;  %v3534_v34 = vld [vmem:[%s4240_s1 + $0x1a8] sm:$0xff]  ;;  %v3444_v54 = vld [vmem:[%s3723_s11 + $0x18] sm:$0xff]  ;;  %v3515_v39 = vld [vmem:[%s4240_s1 + $0x150] sm:$0xff] }
  0x24   : > { %3634 = vmatpush.bf16.msra.mxu1 %v3434_v6  ;;  %3635 = vmatpush.bf16.msra.mxu2 %v3434_v6 }
  0x25   : > { %3636 = vmatpush.bf16.msra.mxu3 %v3434_v6  ;;  %333 = vmatpush.bf16.msra.mxu0 %v3434_v6  ;;  %v3465_v6 = vld [vmem:[%s4240_s1 + $0x80] sm:$0xff] }
  0x28   : > { %3637 = vmatpush.bf16.msra.mxu1 %v3433_v7  ;;  %3638 = vmatpush.bf16.msra.mxu2 %v3433_v7 }
  0x29   : > { %3639 = vmatpush.bf16.msra.mxu3 %v3433_v7  ;;  %334 = vmatpush.bf16.msra.mxu0 %v3433_v7  ;;  %v3449_v7 = vld [vmem:[%s4240_s1 + $0x40] sm:$0xff] }
  0x2b   : > { %345 = vmatmul.bf16.vlgmr.msra.gmra.mxu1 %v3427_v10  ;;  %355 = vmatmul.bf16.vlgmr.msra.gmra.mxu2 %v3429_v11  ;;  %v3520_v10 = vld [vmem:[%s4240_s1 + $0x178] sm:$0xff]  ;;  %v480_v11 = vrot.slane %v478_v60, 1  ;;  %v3565_v60 = vld [vmem:[%s4240_s1 + $0x220] sm:$0xff] }
  0x2c   : > { %842 = vmatpush.bf16.msrb.mxu2 %v3472_v8  ;;  %594 = vmatpush.bf16.msrb.mxu1 %v3456_v9  ;;  %v476_v8 = vor.u32 %v475_v58, %v471_v57  ;;  %v3536_v9 = vld [vmem:[%s4240_s1 + $0x1b8] sm:$0xff]  ;;  %v3517_v57 = vld [vmem:[%s4240_s1 + $0x160] sm:$0xff]  ;;  %v1291_v58 = vshrl.u32 %v3492_v53, 16 }
  0x2d   : > { %365 = vmatmul.bf16.vlgmr.msra.gmra.mxu3 %v3431_v12  ;;  %335 = vmatmul.bf16.vlgmr.msra.gmra.mxu0 %v3425_v13  ;;  %v769_v12 = vrot.slane %v2882_v62, 1  ;;  %v770_v13 = vrot.slane %v3827_v61, 1  ;;  %v490_v61 = vshrl.u32 %v3443_v31, 16  ;;  %v494_v62 = vshll.u32 %v3444_v54, 16 }
  0x2e   : > { %1089 = vmatpush.bf16.msrb.mxu3 %v3488_v14  ;;  %1400 = vmatpush.bf16.msrb.mxu0 %v3504_v15  ;;  %v3481_v14 = vld [vmem:[%s4240_s1 + $0xc0] sm:$0xff] }
  0x2f   : > { %v3497_v15 = vld [vmem:[%s4240_s1 + $0x100] sm:$0xff] }
  0x30   : > { %843 = vmatpush.bf16.msrb.mxu2 %v3471_v16  ;;  %595 = vmatpush.bf16.msrb.mxu1 %v3455_v17  ;;  %v1016_v16 = vrot.slane %v2962_v63, 1  ;;  %v1017_v17 = vrot.slane %v3833_v1, 1  ;;  %v3460_v63 = vld [vmem:[%s3723_s11 + $0x18] sm:$0xff]  ;;  %v1293_v1 = vrot.slane %v1291_v58, 1 }
  0x31   : > { %v3495_v58 = vld [vmem:[%s3723_s11 + $0x34] sm:$0xff] }
  0x32   : > { %1090 = vmatpush.bf16.msrb.mxu3 %v3487_v18  ;;  %1401 = vmatpush.bf16.msrb.mxu0 %v3503_v19  ;;  %v1271_v18 = vor.u32 %v1270_v3, %v1267_v2  ;;  %v1279_v19 = vor.u32 %v1278_v5, %v1275_v4  ;;  %v492_v3 = vor.u32 %v490_v61, %v488_v46  ;;  %v496_v4 = vrot.slane %v494_v62, 1  ;;  %v3546_v61 = vld [vmem:[%s4240_s1 + $0x1c8] sm:$0xff] }
  0x33   : > { %v774_v5 = vrot.slane %v3460_v63, 1  ;;  %v1318_v62 = vshrl.u32 %v3495_v58, 16  ;;  %v1321_v63 = vshll.u32 %v3495_v58, 16 }
  0x34   : > { %844 = vmatpush.bf16.msrb.mxu2 %v3470_v20  ;;  %596 = vmatpush.bf16.msrb.mxu1 %v3454_v21  ;;  %v3552_v20 = vld [vmem:[%s4240_s1 + $0x1f8] sm:$0xff] }
  0x35   : > { %v3568_v21 = vld [vmem:[%s4240_s1 + $0x238] sm:$0xff] }
  0x36   : > { %1091 = vmatpush.bf16.msrb.mxu3 %v3486_v22  ;;  %1402 = vmatpush.bf16.msrb.mxu0 %v3502_v23  ;;  %v481_v22 = vsel %vm469_vm0, %v476_v8, %v480_v11  ;;  %v771_v23 = vsel %vm768_vm1, %v769_v12, %v770_v13  ;;  %v497_v8 = vsel %vm469_vm0, %v492_v3, %v496_v4  ;;  %v3493_v12 = vld [vmem:[%s3723_s11 + $0x24] sm:$0xff]  ;;  %v3463_v3 = vld [vmem:[%s3723_s11 + $0x30] sm:$0xff] }
  0x38   : > { %845 = vmatpush.bf16.msrb.mxu2 %v3469_v24  ;;  %597 = vmatpush.bf16.msrb.mxu1 %v3453_v25  ;;  %v1018_v24 = vsel %vm768_vm1, %v1016_v16, %v1017_v17  ;;  %v1280_v25 = vsel %vm1263_vm2, %v1271_v18, %v1279_v19  ;;  %v3516_v16 = vld [vmem:[%s4240_s1 + $0x158] sm:$0xff]  ;;  %v1303_v18 = vshll.u32 %v3493_v12, 16 }
  0x3a   : > { %1092 = vmatpush.bf16.msrb.mxu3 %v3485_v26  ;;  %1403 = vmatpush.bf16.msrb.mxu0 %v3501_v27  ;;  %v3535_v26 = vld [vmem:[%s4240_s1 + $0x1b0] sm:$0xff] }
  0x3b   : > { %350 = vmatmul.bf16.gmra.mxu1 %v3428_v32  ;;  %360 = vmatmul.bf16.gmra.mxu2 %v3430_v33  ;;  %v3491_v27 = vld [vmem:[%s3723_s11 + $0x14] sm:$0xff] }
  0x3c   : > { %846 = vmatpush.bf16.msrb.mxu2 %v3468_v28  ;;  %598 = vmatpush.bf16.msrb.mxu1 %v3452_v29  ;;  %v3519_v28 = vld [vmem:[%s4240_s1 + $0x170] sm:$0xff]  ;;  %v1282_v32 = vshrl.u32 %v3491_v27, 16  ;;  %v1285_v33 = vshll.u32 %v3491_v27, 16 }
  0x3d   : > { %370 = vmatmul.bf16.gmra.mxu3 %v3432_v35  ;;  %340 = vmatmul.bf16.gmra.mxu0 %v3426_v36  ;;  %v3551_v29 = vld [vmem:[%s4240_s1 + $0x1f0] sm:$0xff]  ;;  %v3518_v35 = vld [vmem:[%s4240_s1 + $0x168] sm:$0xff] }
  0x3e   : > { %1093 = vmatpush.bf16.msrb.mxu3 %v3484_v37  ;;  %1404 = vmatpush.bf16.msrb.mxu0 %v3500_v38  ;;  %v3550_v36 = vld [vmem:[%s4240_s1 + $0x1e8] sm:$0xff]  ;;  %v482_v38 = vshrl.u32 %v3810_v45, 16  ;;  %v773_v45 = vsel %vm768_vm1, %v770_v13, %v772_v47  ;;  %v3445_v13 = vld [vmem:[%s3723_s11 + $0x20] sm:$0xff] }
  0x3f   : > { %v3566_v37 = vld [vmem:[%s4240_s1 + $0x228] sm:$0xff] }
  0x40   : > { %847 = vmatpush.bf16.msrb.mxu2 %v3467_v41  ;;  %599 = vmatpush.bf16.msrb.mxu1 %v3451_v42  ;;  %v3475_v41 = vld [vmem:[%s3723_s11 + $0x14] sm:$0xff]  ;;  %v1284_v42 = vrot.slane %v1282_v32, 1 }
  0x41   : > { %v1019_v48 = vrot.slane %v3475_v41, 1 }
  0x42   : > { %1094 = vmatpush.bf16.msrb.mxu3 %v3483_v43  ;;  %1405 = vmatpush.bf16.msrb.mxu0 %v3499_v44  ;;  %v1287_v43 = vrot.slane %v1285_v33, 2  ;;  %v484_v44 = vor.u32 %v482_v38, %v480_v11  ;;  %v3547_v38 = vld [vmem:[%s4240_s1 + $0x1d0] sm:$0xff] }
  0x43   : > { %v1020_v51 = vsel %vm768_vm1, %v1017_v17, %v1019_v48  ;;  %v1300_v17 = vshrl.u32 %v3493_v12, 16 }
  0x44   : > { %848 = vmatpush.bf16.msrb.mxu2 %v3466_v55  ;;  %600 = vmatpush.bf16.msrb.mxu1 %v3450_v56  ;;  %v1288_v49 = vor.u32 %v1287_v43, %v1284_v42  ;;  %v489_v50 = vsel %vm469_vm0, %v484_v44, %v488_v46  ;;  %v3533_v55 = vld [vmem:[%s4240_s1 + $0x1a0] sm:$0xff]  ;;  %v3563_v42 = vld [vmem:[%s4240_s1 + $0x210] sm:$0xff]  ;;  %v506_v43 = vshrl.u32 %v3445_v13, 16  ;;  %v3462_v46 = vld [vmem:[%s3723_s11 + $0x28] sm:$0xff] }
  0x45   : > { %v3549_v56 = vld [vmem:[%s4240_s1 + $0x1e0] sm:$0xff] }
  0x46   : > { %1095 = vmatpush.bf16.msrb.mxu3 %v3482_v59  ;;  %1406 = vmatpush.bf16.msrb.mxu0 %v3498_v0  ;;  %v1289_v52 = vsel %vm1263_vm2, %v1279_v19, %v1288_v49  ;;  %v1294_v59 = vshll.u32 %v3492_v53, 16  ;;  %v3476_v0 = vld [vmem:[%s3723_s11 + $0x1c] sm:$0xff] }
  0x47   : > { %v3564_v19 = vld [vmem:[%s4240_s1 + $0x218] sm:$0xff] }
  0x48   : > { %849 = vmatpush.bf16.msrb.mxu2 %v3465_v6  ;;  %601 = vmatpush.bf16.msrb.mxu1 %v3449_v7  ;;  %v1296_v2 = vrot.slane %v1294_v59, 2  ;;  %v1021_v6 = vrot.slane %v3476_v0, 1  ;;  %v3447_v59 = vld [vmem:[%s3723_s11 + $0x30] sm:$0xff]  ;;  %v3514_v0 = vld [vmem:[%s4240_s1 + $0x148] sm:$0xff] }
  0x4a   : > { %1096 = vmatpush.bf16.msrb.mxu3 %v3481_v14  ;;  %1407 = vmatpush.bf16.msrb.mxu0 %v3497_v15  ;;  %v1297_v7 = vor.u32 %v1296_v2, %v1293_v1  ;;  %v3532_v14 = vld [vmem:[%s4240_s1 + $0x198] sm:$0xff]  ;;  %v518_v2 = vshll.u32 %v3447_v59, 16 }
  0x4b   : > { %602 = vmatmul.bf16.vlgmr.msrb.gmra.mxu1 %v481_v22  ;;  %850 = vmatmul.bf16.vlgmr.msrb.gmra.mxu2 %v771_v23  ;;  %v3548_v15 = vld [vmem:[%s4240_s1 + $0x1d8] sm:$0xff]  ;;  %v3461_v22 = vld [vmem:[%s3723_s11 + $0x20] sm:$0xff] }
  0x4c   : > { %1895 = vmatpush.bf16.msra.mxu2 %v3536_v9  ;;  %1648 = vmatpush.bf16.msra.mxu1 %v3520_v10  ;;  %v775_v9 = vsel %vm768_vm1, %v772_v47, %v774_v5  ;;  %v1022_v10 = vsel %vm768_vm1, %v1019_v48, %v1021_v6  ;;  %v1298_v11 = vsel %vm1263_vm2, %v1288_v49, %v1297_v7  ;;  %v3477_v23 = vld [vmem:[%s3723_s11 + $0x24] sm:$0xff]  ;;  %v3478_v47 = vld [vmem:[%s3723_s11 + $0x2c] sm:$0xff] }
  0x4d   : > { %1097 = vmatmul.bf16.vlgmr.msrb.gmra.mxu3 %v1018_v24  ;;  %1408 = vmatmul.bf16.vlgmr.msrb.gmra.mxu0 %v1280_v25  ;;  %v1302_v24 = vrot.slane %v1300_v17, 1  ;;  %v1305_v25 = vrot.slane %v1303_v18, 2  ;;  %v3496_v17 = vld [vmem:[%s3723_s11 + $0x3c] sm:$0xff] }
  0x4e   : > { %2206 = vmatpush.bf16.msra.mxu3 %v3552_v20  ;;  %2454 = vmatpush.bf16.msra.mxu0 %v3568_v21  ;;  %v498_v20 = vshrl.u32 %v3444_v54, 16  ;;  %v502_v21 = vshll.u32 %v3445_v13, 16  ;;  %v3448_v18 = vld [vmem:[%s3723_s11 + $0x38] sm:$0xff] }
  0x50   : > { %1896 = vmatpush.bf16.msra.mxu2 %v3535_v26  ;;  %1649 = vmatpush.bf16.msra.mxu1 %v3519_v28  ;;  %v500_v26 = vor.u32 %v498_v20, %v496_v4  ;;  %v504_v27 = vrot.slane %v502_v21, 1  ;;  %v776_v28 = vrot.slane %v3461_v22, 1  ;;  %v3479_v4 = vld [vmem:[%s3723_s11 + $0x34] sm:$0xff]  ;;  %v3545_v20 = vld [vmem:[%s4240_s1 + $0x1c0] sm:$0xff]  ;;  %v1327_v21 = vshrl.u32 %v3496_v17, 16 }
  0x51   : > { %v1330_v22 = vshll.u32 %v3496_v17, 16  ;;  %v3121_v17 = vld [vmem:[%s3723_s11 + $0x4] sm:$0xc] }
  0x52   : > { %2207 = vmatpush.bf16.msra.mxu3 %v3551_v29  ;;  %2455 = vmatpush.bf16.msra.mxu0 %v3567_v30  ;;  %v1023_v29 = vrot.slane %v3477_v23, 1  ;;  %v1306_v30 = vor.u32 %v1305_v25, %v1302_v24  ;;  %v505_v31 = vsel %vm469_vm0, %v500_v26, %v504_v27  ;;  %v777_v32 = vsel %vm768_vm1, %v774_v5, %v776_v28  ;;  %v3513_v23 = vld [vmem:[%s4240_s1 + $0x140] sm:$0xff]  ;;  %v3464_v26 = vld [vmem:[%s3723_s11 + $0x38] sm:$0xff] }
  0x53   : > { %v1320_v5 = vrot.slane %v1318_v62, 1  ;;  %v522_v24 = vshrl.u32 %v3447_v59, 16  ;;  %v526_v25 = vshll.u32 %v3448_v18, 16 }
  0x54   : > { %1897 = vmatpush.bf16.msra.mxu2 %v3534_v34  ;;  %1650 = vmatpush.bf16.msra.mxu1 %v3518_v35  ;;  %v1024_v33 = vsel %vm768_vm1, %v1021_v6, %v1023_v29  ;;  %v1307_v34 = vsel %vm1263_vm2, %v1297_v7, %v1306_v30  ;;  %v3494_v35 = vld [vmem:[%s3723_s11 + $0x2c] sm:$0xff]  ;;  %v1323_v6 = vrot.slane %v1321_v63, 2 }
  0x55   : > { %v1309_v40 = vshrl.u32 %v3494_v35, 16  ;;  %v1312_v41 = vshll.u32 %v3494_v35, 16  ;;  %v3562_v7 = vld [vmem:[%s4240_s1 + $0x208] sm:$0xff] }
  0x56   : > { %2208 = vmatpush.bf16.msra.mxu3 %v3550_v36  ;;  %2456 = vmatpush.bf16.msra.mxu0 %v3566_v37  ;;  %v3446_v36 = vld [vmem:[%s3723_s11 + $0x28] sm:$0xff]  ;;  %v3531_v37 = vld [vmem:[%s4240_s1 + $0x190] sm:$0xff]  ;;  %v1324_v12 = vor.u32 %v1323_v6, %v1320_v5 }
  0x57   : > { %v510_v44 = vshll.u32 %v3446_v36, 16  ;;  %v1311_v48 = vrot.slane %v1309_v40, 1  ;;  %v1314_v49 = vrot.slane %v1312_v41, 2  ;;  %v514_v1 = vshrl.u32 %v3446_v36, 16  ;;  %v3281_v5 = vld [vmem:[%s3723_s11 + $0x8] sm:$0xc] }
  0x58   : > { %1898 = vmatpush.bf16.msra.mxu2 %v3533_v55  ;;  %1651 = vmatpush.bf16.msra.mxu1 %v3517_v57  ;;  %v3537_v6 = vld [vmem:[%s3723_s11 + $0x8] sm:$0xf0] }
  0x59   : > { %v1315_v53 = vor.u32 %v1314_v49, %v1311_v48  ;;  %v955_v49 = vld [vmem:[%s3723_s11 + $0x44] sm:$0x1] }
  0x5a   : > { %2209 = vmatpush.bf16.msra.mxu3 %v3549_v56  ;;  %2457 = vmatpush.bf16.msra.mxu0 %v3565_v60  ;;  %v3530_v60 = vld [vmem:[%s4240_s1 + $0x188] sm:$0xff] }
  0x5b   : > { %607 = vmatmul.bf16.gmra.mxu1 %v489_v50  ;;  %855 = vmatmul.bf16.gmra.mxu2 %v773_v45  ;;  %v508_v50 = vor.u32 %v506_v43, %v504_v27  ;;  %v512_v45 = vrot.slane %v510_v44, 1  ;;  %v1316_v57 = vsel %vm1263_vm2, %v1306_v30, %v1315_v53  ;;  %v3480_v27 = vld [vmem:[%s3723_s11 + $0x3c] sm:$0xff] }
  0x5c   : > { %1899 = vmatpush.bf16.msra.mxu2 %v3532_v14  ;;  %1652 = vmatpush.bf16.msra.mxu1 %v3516_v16  ;;  %v1325_v16 = vsel %vm1263_vm2, %v1315_v53, %v1324_v12  ;;  %v3561_v30 = vld [vmem:[%s4240_s1 + $0x200] sm:$0xff]  ;;  %v1029_v35 = vrot.slane %v3480_v27, 1  ;;  %v3553_v27 = vld [vmem:[%s3723_s11 + $0x8] sm:$0xf0] }
  0x5d   : > { %1102 = vmatmul.bf16.gmra.mxu3 %v1020_v51  ;;  %1413 = vmatmul.bf16.gmra.mxu0 %v1289_v52  ;;  %v778_v51 = vrot.slane %v3462_v46, 1  ;;  %v1025_v52 = vrot.slane %v3478_v47, 1  ;;  %v513_v54 = vsel %vm469_vm0, %v508_v50, %v512_v45  ;;  %v707_v47 = vld [vmem:[%s3723_s11 + $0x40] sm:$0x1] }
  0x5e   : > { %2210 = vmatpush.bf16.msra.mxu3 %v3548_v15  ;;  %2458 = vmatpush.bf16.msra.mxu0 %v3564_v19  ;;  %v3529_v19 = vld [vmem:[%s4240_s1 + $0x180] sm:$0xff] }
  0x5f   : > { %v779_v55 = vsel %vm768_vm1, %v776_v28, %v778_v51  ;;  %v1026_v56 = vsel %vm768_vm1, %v1023_v29, %v1025_v52  ;;  %v1329_v28 = vrot.slane %v1327_v21, 1  ;;  %v1332_v29 = vrot.slane %v1330_v22, 2  ;;  %v3505_v22 = vld [vmem:[%s3723_s11 + $0x4] sm:$0xf0] }
  0x60   : > { %1900 = vmatpush.bf16.msra.mxu2 %v3531_v37  ;;  %1653 = vmatpush.bf16.msra.mxu1 %v3515_v39  ;;  %v408_v37 = vld [vmem:[%s3723_s11 + $0x40] sm:$0x1] }
  0x61   : > { %v1333_v36 = vor.u32 %v1332_v29, %v1329_v28 }
  0x62   : > { %2211 = vmatpush.bf16.msra.mxu3 %v3547_v38  ;;  %2459 = vmatpush.bf16.msra.mxu0 %v3563_v42  ;;  %v459_v42 = vunpack.c.l.b16 %v408_v37 }
  0x63   : > { %v1334_v46 = vsel %vm1263_vm2, %v1324_v12, %v1333_v36  ;;  %v3538_v12 = vld [vmem:[%s3723_s11 + $0x10] sm:$0xff] }
  0x64   : > { %1901 = vmatpush.bf16.msra.mxu2 %v3530_v60  ;;  %1654 = vmatpush.bf16.msra.mxu1 %v3514_v0  ;;  %v468_v50 = vpack.c.b16 %v459_v42, %v459_v42  ;;  %v2082_v21 = vshll.u32 %v3538_v12, 16 }
  0x66   : > { %2212 = vmatpush.bf16.msra.mxu3 %v3546_v61  ;;  %2460 = vmatpush.bf16.msra.mxu0 %v3562_v7  ;;  %v534_v58 = vshll.u32 %v468_v50, 16 }
  0x68   : > { %1902 = vmatpush.bf16.msra.mxu2 %v3529_v19  ;;  %1655 = vmatpush.bf16.msra.mxu1 %v3513_v23  ;;  %v3201_v23 = vld [vmem:[%s3723_s11 + $0x8] sm:$0xc] }
  0x6a   : > { %2213 = vmatpush.bf16.msra.mxu3 %v3545_v20  ;;  %2461 = vmatpush.bf16.msra.mxu0 %v3561_v30  ;;  %v2079_v20 = vshrl.u32 %v3538_v12, 16  ;;  %v3506_v30 = vld [vmem:[%s3723_s11 + $0xc] sm:$0xff] }
  0x6b   : > { %612 = vmatmul.bf16.gmra.mxu1 %v497_v8  ;;  %860 = vmatmul.bf16.gmra.mxu2 %v775_v9  ;;  %v516_v8 = vor.u32 %v514_v1, %v512_v45  ;;  %v520_v9 = vrot.slane %v518_v2, 1  ;;  %v758_v45 = vunpack.c.l.b16 %v707_v47  ;;  %v536_v1 = vrot.slane %v534_v58, 1 }
  0x6c   : > { %v2081_v37 = vrot.slane %v2079_v20, 2 }
  0x6d   : > { %1107 = vmatmul.bf16.gmra.mxu3 %v1022_v10  ;;  %1418 = vmatmul.bf16.gmra.mxu0 %v1298_v11  ;;  %v780_v10 = vrot.slane %v3463_v3, 1  ;;  %v1027_v11 = vrot.slane %v3479_v4, 1  ;;  %v521_v13 = vsel %vm469_vm0, %v516_v8, %v520_v9  ;;  %v767_v59 = vpack.c.b16 %v758_v45, %v758_v45 }
  0x6f   : > { %v781_v14 = vsel %vm768_vm1, %v778_v51, %v780_v10  ;;  %v1028_v15 = vsel %vm768_vm1, %v1025_v52, %v1027_v11  ;;  %v1030_v44 = vsel %vm768_vm1, %v1027_v11, %v1029_v35  ;;  %v1006_v51 = vunpack.c.l.b16 %v955_v49 }
  0x70   : > { %v784_v2 = vrot.slane %v767_v59, 1 }
  0x71   : > { %v1015_v61 = vpack.c.b16 %v1006_v51, %v1006_v51 }
  0x73   : > { %v1031_v3 = vrot.slane %v1015_v61, 1 }
  0x7b   : > { %617 = vmatmul.bf16.gmra.mxu1 %v505_v31  ;;  %865 = vmatmul.bf16.gmra.mxu2 %v777_v32  ;;  %v1202_v31 = vld [vmem:[%s3723_s11 + $0x44] sm:$0x3]  ;;  %v524_v32 = vor.u32 %v522_v24, %v520_v9  ;;  %v3521_v24 = vld [vmem:[%s3723_s11 + $0x8] sm:$0xf0] }
  0x7c   : > { %v1253_v38 = vunpack.c.l.b16 %v1202_v31  ;;  %v3122_v31 = vor.u32 %v3505_v22, %v3121_v17  ;;  %v3555_v17 = vld [vmem:[%s3723_s11 + $0x18] sm:$0xff] }
  0x7d   : > { %1112 = vmatmul.bf16.gmra.mxu3 %v1024_v33  ;;  %1423 = vmatmul.bf16.gmra.mxu0 %v1307_v34  ;;  %v528_v33 = vrot.slane %v526_v25, 1  ;;  %v782_v34 = vrot.slane %v3464_v26, 1  ;;  %v3361_v26 = vld [vmem:[%s3723_s11 + $0x8] sm:$0x8]  ;;  %v2384_v22 = vrot.slane %v3555_v17, 3 }
  0x7e   : > { %v1262_v48 = vpack.c.b16 %v1253_v38, %v1253_v38  ;;  %v2084_v38 = vrot.slane %v2082_v21, 3  ;;  %v1575_v42 = vrot.slane %v3122_v31, 2 }
  0x7f   : > { %v529_v40 = vsel %vm469_vm0, %v524_v32, %v528_v33  ;;  %v783_v41 = vsel %vm768_vm1, %v780_v10, %v782_v34  ;;  %v785_v11 = vsel %vm768_vm1, %v782_v34, %v784_v2  ;;  %v3522_v32 = vld [vmem:[%s3723_s11 + $0x10] sm:$0xff] }
  0x80   : > { %v1336_v52 = vshrl.u32 %v1262_v48, 16  ;;  %v1339_v53 = vshll.u32 %v1262_v48, 16  ;;  %v1823_v47 = vrot.slane %v3522_v32, 2  ;;  %v2085_v49 = vor.u32 %v2084_v38, %v2081_v37  ;;  %v3540_v37 = vld [vmem:[%s3723_s11 + $0x20] sm:$0xff] }
  0x82   : > { %v1338_v62 = vrot.slane %v1336_v52, 1  ;;  %v1341_v63 = vrot.slane %v1339_v53, 2 }
  0x84   : > { %v1342_v4 = vor.u32 %v1341_v63, %v1338_v62 }
  0x8b   : > { %622 = vmatmul.bf16.gmra.mxu1 %v513_v54  ;;  %870 = vmatmul.bf16.gmra.mxu2 %v779_v55 }
  0x8d   : > { %1117 = vmatmul.bf16.gmra.mxu3 %v1026_v56  ;;  %1428 = vmatmul.bf16.gmra.mxu0 %v1316_v57  ;;  %v530_v57 = vshrl.u32 %v3448_v18, 16 }
  0x8f   : > { %v532_v0 = vor.u32 %v530_v57, %v528_v33  ;;  %v3202_v33 = vor.u32 %v3521_v24, %v3201_v23 }
  0x91   : > { %v537_v10 = vsel %vm469_vm0, %v532_v0, %v536_v1  ;;  %v3539_v0 = vld [vmem:[%s3723_s11 + $0x18] sm:$0xff] }
  0x92   : > { %v2088_v1 = vshrl.u32 %v3539_v0, 16  ;;  %v2091_v2 = vshll.u32 %v3539_v0, 16 }
  0x9b   : > { %627 = vmatmul.bf16.gmra.mxu1 %v521_v13  ;;  %875 = vmatmul.bf16.gmra.mxu2 %v781_v14  ;;  %v3282_v13 = vor.u32 %v3537_v6, %v3281_v5 }
  0x9d   : > { %1122 = vmatmul.bf16.gmra.mxu3 %v1028_v15  ;;  %1433 = vmatmul.bf16.gmra.mxu0 %v1325_v16  ;;  %v1032_v15 = vsel %vm768_vm1, %v1029_v35, %v1031_v3  ;;  %v1343_v16 = vsel %vm1263_vm2, %v1333_v36, %v1342_v4  ;;  %v2071_v18 = vshrl.u32 %v3282_v13, 16  ;;  %v2074_v19 = vshll.u32 %v3282_v13, 16 }
  0x9f   : > { %v2073_v34 = vrot.slane %v2071_v18, 2  ;;  %v2076_v36 = vrot.slane %v2074_v19, 3 }
  0xa1   : > { %v2077_v48 = vor.u32 %v2076_v36, %v2073_v34 }
  0xa3   : > { %v2086_v62 = vsel %vm2069_vm4, %v2077_v48, %v2085_v49  ;;  %v3524_v48 = vld [vmem:[%s3723_s11 + $0x20] sm:$0xff] }
  0xa8   : > { %v3996_v39 = vpop.f32.mrf.mxu1 }
  0xaa   : > { %v4000_v43 = vpop.f32.mrf.mxu0 }
  0xab   : > { %632 = vmatmul.bf16.gmra.mxu1 %v529_v40  ;;  %880 = vmatmul.bf16.gmra.mxu2 %v783_v41  ;;  %v3554_v40 = vld [vmem:[%s3723_s11 + $0x10] sm:$0xff]  ;;  %v3362_v41 = vor.u32 %v3553_v27, %v3361_v26 }
  0xac   : > { %v2382_v45 = vrot.slane %v3554_v40, 3  ;;  %v2097_v40 = vshrl.u32 %v3540_v37, 16 }
  0xad   : > { %1127 = vmatmul.bf16.gmra.mxu3 %v1030_v44  ;;  %1438 = vmatmul.bf16.gmra.mxu0 %v1334_v46  ;;  %v1576_v44 = vrot.slane %v3506_v30, 2  ;;  %v1822_v46 = vrot.slane %v3202_v33, 2  ;;  %v2381_v50 = vrot.slane %v3362_v41, 3  ;;  %v2100_v41 = vshll.u32 %v3540_v37, 16 }
  0xae   : > { %v4006_v54 = vpop.f32.mrf.mxu2  ;;  %v2385_v36 = vsel %vm2380_vm5, %v2382_v45, %v2384_v22 }
  0xaf   : > { %v1577_v57 = vsel %vm1574_vm3, %v1575_v42, %v1576_v44  ;;  %v1824_v58 = vsel %vm1574_vm3, %v1822_v46, %v1823_v47  ;;  %v2383_v63 = vsel %vm2380_vm5, %v2381_v50, %v2382_v45 }
  0xb0   : > { %v4008_v55 = vpop.f32.mrf.mxu3  ;;  %v4010_v56 = vpop.f32.mrf.mxu1 }
  0xb2   : > { %v4012_v60 = vpop.f32.mrf.mxu0 }
  0xb6   : > { %v4016_v7 = vpop.f32.mrf.mxu2 }
  0xb8   : > { %v4018_v8 = vpop.f32.mrf.mxu3  ;;  %v4020_v9 = vpop.f32.mrf.mxu1 }
  0xba   : > { %v4025_v14 = vpop.f32.mrf.mxu0 }
  0xbb   : > { %637 = vmatmul.bf16.gmra.mxu1 %v537_v10  ;;  %885 = vmatmul.bf16.gmra.mxu2 %v785_v11  ;;  %v3507_v10 = vld [vmem:[%s3723_s11 + $0x14] sm:$0xff] }
  0xbc   : > { %v1578_v19 = vrot.slane %v3507_v10, 2 }
  0xbd   : > { %1132 = vmatmul.bf16.gmra.mxu3 %v1032_v15  ;;  %1443 = vmatmul.bf16.gmra.mxu0 %v1343_v16  ;;  %v2090_v15 = vrot.slane %v2088_v1, 2  ;;  %v2093_v16 = vrot.slane %v2091_v2, 3 }
  0xbe   : > { %v4033_v25 = vpop.f32.mrf.mxu2  ;;  %v1579_v30 = vsel %vm1574_vm3, %v1576_v44, %v1578_v19 }
  0xbf   : > { %v2094_v21 = vor.u32 %v2093_v16, %v2090_v15 }
  0xc0   : > { %v4037_v28 = vpop.f32.mrf.mxu3  ;;  %v4039_v29 = vpop.f32.mrf.mxu1 }
  0xc1   : > { %v2095_v34 = vsel %vm2069_vm4, %v2085_v49, %v2094_v21 }
  0xc2   : > { %v4043_v35 = vpop.f32.mrf.mxu0 }
  0xc6   : > { %v4046_v51 = vpop.f32.mrf.mxu2 }
  0xc8   : > { %v4048_v52 = vpop.f32.mrf.mxu3  ;;  %v603_v53 = vpop.f32.mrf.mxu1 }
  0xc9   : > { %v659_v59 = vadd.f32 %v603_v53, %v4000_v43  ;;  %v3523_v43 = vld [vmem:[%s3723_s11 + $0x18] sm:$0xff]  ;;  %v2099_v53 = vrot.slane %v2097_v40, 2 }
  0xca   : > { %v1409_v61 = vpop.f32.mrf.mxu0  ;;  %v1825_v20 = vrot.slane %v3523_v43, 2 }
  0xcb   : > { %1656 = vmatmul.bf16.vlgmr.msra.gmra.mxu1 %v1577_v57  ;;  %1903 = vmatmul.bf16.vlgmr.msra.gmra.mxu2 %v1824_v58  ;;  %v2102_v57 = vrot.slane %v2100_v41, 3  ;;  %v3556_v58 = vld [vmem:[%s3723_s11 + $0x20] sm:$0xff] }
  0xcc   : > { %v1826_v31 = vsel %vm1574_vm3, %v1823_v47, %v1825_v20  ;;  %v3508_v47 = vld [vmem:[%s3723_s11 + $0x1c] sm:$0xff]  ;;  %v2386_v0 = vrot.slane %v3556_v58, 3 }
  0xcd   : > { %2214 = vmatmul.bf16.vlgmr.msra.gmra.mxu3 %v2086_v62  ;;  %2462 = vmatmul.bf16.vlgmr.msra.gmra.mxu0 %v2383_v63  ;;  %v1827_v62 = vrot.slane %v3524_v48, 2  ;;  %v2103_v63 = vor.u32 %v2102_v57, %v2099_v53 }
  0xce   : > { %v851_v3 = vpop.f32.mrf.mxu2 }
  0xcf   : > { %v907_v4 = vadd.f32 %v851_v3, %v659_v59 }
  0xd0   : > { %v1098_v5 = vpop.f32.mrf.mxu3  ;;  %v605_v6 = vpop.f32.mrf.mxu1 }
  0xd1   : > { %v1154_v11 = vadd.f32 %v1098_v5, %v907_v4  ;;  %v660_v12 = vadd.f32 %v605_v6, %v4012_v60  ;;  %v1828_v6 = vsel %vm1574_vm3, %v1825_v20, %v1827_v62 }
  0xd2   : > { %v1411_v13 = vpop.f32.mrf.mxu0 }
  0xd3   : > { %v4060_v18 = vadd.f32 %v1409_v61, %v1154_v11  ;;  %v1580_v61 = vrot.slane %v3508_v47, 2  ;;  %v2104_v11 = vsel %vm2069_vm4, %v2094_v21, %v2103_v63 }
  0xd5   : > { %v1581_v5 = vsel %vm1574_vm3, %v1578_v19, %v1580_v61 }
  0xd6   : > { %v853_v23 = vpop.f32.mrf.mxu2 }
  0xd7   : > { %v908_v24 = vadd.f32 %v853_v23, %v660_v12  ;;  %v2387_v12 = vsel %vm2380_vm5, %v2384_v22, %v2386_v0 }
  0xd8   : > { %v1100_v26 = vpop.f32.mrf.mxu3  ;;  %v608_v27 = vpop.f32.mrf.mxu1 }
  0xd9   : > { %v1155_v60 = vadd.f32 %v1100_v26, %v908_v24  ;;  %v661_v32 = vadd.f32 %v608_v27, %v4025_v14  ;;  %v3509_v24 = vld [vmem:[%s3723_s11 + $0x24] sm:$0xff] }
  0xda   : > { %v1414_v33 = vpop.f32.mrf.mxu0  ;;  %v3525_v26 = vld [vmem:[%s3723_s11 + $0x28] sm:$0xff] }
  0xdb   : > { %1661 = vmatmul.bf16.gmra.mxu1 %v1579_v30  ;;  %1908 = vmatmul.bf16.gmra.mxu2 %v1826_v31  ;;  %v4068_v38 = vadd.f32 %v1411_v13, %v1155_v60  ;;  %v3541_v13 = vld [vmem:[%s3723_s11 + $0x28] sm:$0xff] }
  0xdc   : > { %v2106_v16 = vshrl.u32 %v3541_v13, 16  ;;  %v2109_v17 = vshll.u32 %v3541_v13, 16  ;;  %v3557_v60 = vld [vmem:[%s3723_s11 + $0x28] sm:$0xff] }
  0xdd   : > { %2219 = vmatmul.bf16.gmra.mxu3 %v2095_v34  ;;  %2467 = vmatmul.bf16.gmra.mxu0 %v2385_v36  ;;  %v1829_v34 = vrot.slane %v3525_v26, 2  ;;  %v2388_v37 = vrot.slane %v3557_v60, 3 }
  0xde   : > { %v856_v42 = vpop.f32.mrf.mxu2  ;;  %v2108_v30 = vrot.slane %v2106_v16, 2  ;;  %v2111_v31 = vrot.slane %v2109_v17, 3 }
  0xdf   : > { %v909_v44 = vadd.f32 %v856_v42, %v661_v32 }
  0xe0   : > { %v1103_v14 = vpop.f32.mrf.mxu3  ;;  %v610_v46 = vpop.f32.mrf.mxu1  ;;  %v2112_v36 = vor.u32 %v2111_v31, %v2108_v30 }
  0xe1   : > { %v1156_v50 = vadd.f32 %v1103_v14, %v909_v44  ;;  %v662_v49 = vadd.f32 %v610_v46, %v4043_v35  ;;  %v1830_v46 = vsel %vm1574_vm3, %v1827_v62, %v1829_v34 }
  0xe2   : > { %v1416_v45 = vpop.f32.mrf.mxu0 }
  0xe3   : > { %v4074_v59 = vadd.f32 %v1414_v33, %v1156_v50  ;;  %v1582_v33 = vrot.slane %v3509_v24, 2  ;;  %v2113_v50 = vsel %vm2069_vm4, %v2103_v63, %v2112_v36 }
  0xe5   : > { %v1583_v14 = vsel %vm1574_vm3, %v1580_v61, %v1582_v33 }
  0xe6   : > { %v858_v1 = vpop.f32.mrf.mxu2 }
  0xe7   : > { %v910_v2 = vadd.f32 %v858_v1, %v662_v49  ;;  %v2389_v49 = vsel %vm2380_vm5, %v2386_v0, %v2388_v37 }
  0xe8   : > { %v1105_v3 = vpop.f32.mrf.mxu3  ;;  %v613_v4 = vpop.f32.mrf.mxu1 }
  0xe9   : > { %v1157_v35 = vadd.f32 %v1105_v3, %v910_v2  ;;  %v663_v10 = vadd.f32 %v613_v4, %v3996_v39  ;;  %v3510_v2 = vld [vmem:[%s3723_s11 + $0x2c] sm:$0xff] }
  0xea   : > { %v1419_v43 = vpop.f32.mrf.mxu0  ;;  %v3526_v3 = vld [vmem:[%s3723_s11 + $0x30] sm:$0xff] }
  0xeb   : > { %1666 = vmatmul.bf16.gmra.mxu1 %v1581_v5  ;;  %1913 = vmatmul.bf16.gmra.mxu2 %v1828_v6  ;;  %v4082_v15 = vadd.f32 %v1416_v45, %v1157_v35  ;;  %v3542_v45 = vld [vmem:[%s3723_s11 + $0x30] sm:$0xff] }
  0xec   : > { %v2115_v57 = vshrl.u32 %v3542_v45, 16  ;;  %v2118_v58 = vshll.u32 %v3542_v45, 16  ;;  %v3558_v35 = vld [vmem:[%s3723_s11 + $0x30] sm:$0xff] }
  0xed   : > { %2224 = vmatmul.bf16.gmra.mxu3 %v2104_v11  ;;  %2472 = vmatmul.bf16.gmra.mxu0 %v2387_v12  ;;  %v1831_v11 = vrot.slane %v3526_v3, 2  ;;  %v2390_v13 = vrot.slane %v3558_v35, 3 }
  0xee   : > { %v861_v19 = vpop.f32.mrf.mxu2  ;;  %v2117_v5 = vrot.slane %v2115_v57, 2  ;;  %v2120_v6 = vrot.slane %v2118_v58, 3 }
  0xef   : > { %v911_v20 = vadd.f32 %v861_v19, %v663_v10 }
  0xf0   : > { %v1108_v39 = vpop.f32.mrf.mxu3  ;;  %v615_v23 = vpop.f32.mrf.mxu1  ;;  %v2121_v12 = vor.u32 %v2120_v6, %v2117_v5 }
  0xf1   : > { %v1158_v27 = vadd.f32 %v1108_v39, %v911_v20  ;;  %v664_v21 = vadd.f32 %v615_v23, %v4010_v56  ;;  %v1832_v23 = vsel %vm1574_vm3, %v1829_v34, %v1831_v11 }
  0xf2   : > { %v1421_v22 = vpop.f32.mrf.mxu0  ;;  %v2122_v26 = vsel %vm2069_vm4, %v2112_v36, %v2121_v12  ;;  %v3511_v36 = vld [vmem:[%s3723_s11 + $0x34] sm:$0xff] }
  0xf3   : > { %v4088_v32 = vadd.f32 %v1419_v43, %v1158_v27  ;;  %v1584_v43 = vrot.slane %v3510_v2, 2  ;;  %v2391_v27 = vsel %vm2380_vm5, %v2388_v37, %v2390_v13 }
  0xf5   : > { %v1585_v39 = vsel %vm1574_vm3, %v1582_v33, %v1584_v43 }
  0xf6   : > { %v863_v40 = vpop.f32.mrf.mxu2 }
  0xf7   : > { %v912_v41 = vadd.f32 %v863_v40, %v664_v21  ;;  %v3543_v21 = vld [vmem:[%s3723_s11 + $0x38] sm:$0xff] }
  0xf8   : > { %v1110_v42 = vpop.f32.mrf.mxu3  ;;  %v618_v44 = vpop.f32.mrf.mxu1  ;;  %v2124_v31 = vshrl.u32 %v3543_v21, 16  ;;  %v2127_v60 = vshll.u32 %v3543_v21, 16 }
  0xf9   : > { %v1159_v56 = vadd.f32 %v1110_v42, %v912_v41  ;;  %v665_v47 = vadd.f32 %v618_v44, %v4020_v9  ;;  %v3527_v42 = vld [vmem:[%s3723_s11 + $0x38] sm:$0xff] }
  0xfa   : > { %v1424_v48 = vpop.f32.mrf.mxu0 }
  0xfb   : > { %1671 = vmatmul.bf16.gmra.mxu1 %v1583_v14  ;;  %1918 = vmatmul.bf16.gmra.mxu2 %v1830_v46  ;;  %v4096_v53 = vadd.f32 %v1421_v22, %v1159_v56  ;;  %v2126_v14 = vrot.slane %v2124_v31, 2  ;;  %v2129_v46 = vrot.slane %v2127_v60, 3  ;;  %v3559_v56 = vld [vmem:[%s3723_s11 + $0x38] sm:$0xff] }
  0xfc   : > { %v2392_v45 = vrot.slane %v3559_v56, 3  ;;  %v1513_v56 = vld [vmem:[%s3723_s11 + $0x44] sm:$0x3] }
  0xfd   : > { %2229 = vmatmul.bf16.gmra.mxu3 %v2113_v50  ;;  %2477 = vmatmul.bf16.gmra.mxu0 %v2389_v49  ;;  %v1833_v50 = vrot.slane %v3527_v42, 2  ;;  %v2130_v49 = vor.u32 %v2129_v46, %v2126_v14 }
  0xfe   : > { %v866_v61 = vpop.f32.mrf.mxu2 }
  0xff   : > { %v913_v62 = vadd.f32 %v866_v61, %v665_v47 }
 0x100   : > { %v1113_v9 = vpop.f32.mrf.mxu3  ;;  %v620_v1 = vpop.f32.mrf.mxu1 }
 0x101   : > { %v1160_v4 = vadd.f32 %v1113_v9, %v913_v62  ;;  %v666_v63 = vadd.f32 %v620_v1, %v4039_v29  ;;  %v1834_v1 = vsel %vm1574_vm3, %v1831_v11, %v1833_v50 }
 0x102   : > { %v1426_v0 = vpop.f32.mrf.mxu0 }
 0x103   : > { %v4102_v10 = vadd.f32 %v1424_v48, %v1160_v4  ;;  %v1586_v48 = vrot.slane %v3511_v36, 2  ;;  %v2131_v4 = vsel %vm2069_vm4, %v2121_v12, %v2130_v49 }
 0x105   : > { %v1587_v9 = vsel %vm1574_vm3, %v1584_v43, %v1586_v48 }
 0x106   : > { %v868_v16 = vpop.f32.mrf.mxu2 }
 0x107   : > { %v914_v17 = vadd.f32 %v868_v16, %v666_v63  ;;  %v2393_v63 = vsel %vm2380_vm5, %v2390_v13, %v2392_v45  ;;  %v4130_v13 = vld [vmem:[%s3723_s11 + $0x40] sm:$0xff] }
 0x108   : > { %v1115_v19 = vpop.f32.mrf.mxu3  ;;  %v623_v20 = vpop.f32.mrf.mxu1 }
 0x109   : > { %v1161_v29 = vadd.f32 %v1115_v19, %v914_v17  ;;  %v667_v30 = vadd.f32 %v623_v20, %v4006_v54  ;;  %v4127_v17 = vld [vmem:[%s3723_s11 + $0x3c] sm:$0xff] }
 0x10a   : > { %v1429_v24 = vpop.f32.mrf.mxu0 }
 0x10b   : > { %1676 = vmatmul.bf16.gmra.mxu1 %v1585_v39  ;;  %1923 = vmatmul.bf16.gmra.mxu2 %v1832_v23  ;;  %v4109_v22 = vadd.f32 %v1426_v0, %v1161_v29  ;;  %v3544_v0 = vld [vmem:[%s3723_s11 + $0x40] sm:$0xff] }
 0x10c   : > { %v2133_v6 = vshrl.u32 %v3544_v0, 16  ;;  %v2136_v35 = vshll.u32 %v3544_v0, 16  ;;  %v3560_v29 = vld [vmem:[%s3723_s11 + $0x40] sm:$0xff] }
 0x10d   : > { %2234 = vmatmul.bf16.gmra.mxu3 %v2122_v26  ;;  %2482 = vmatmul.bf16.gmra.mxu0 %v2391_v27  ;;  %v1835_v27 = vrot.slane %v4130_v13, 2  ;;  %v2394_v31 = vrot.slane %v3560_v29, 3 }
 0x10e   : > { %v871_v33 = vpop.f32.mrf.mxu2  ;;  %v2135_v39 = vrot.slane %v2133_v6, 2  ;;  %v2138_v23 = vrot.slane %v2136_v35, 3 }
 0x10f   : > { %v915_v34 = vadd.f32 %v871_v33, %v667_v30  ;;  %v1836_v42 = vsel %vm1574_vm3, %v1833_v50, %v1835_v27  ;;  %v2395_v46 = vsel %vm2380_vm5, %v2392_v45, %v2394_v31 }
 0x110   : > { %v1118_v40 = vpop.f32.mrf.mxu3  ;;  %v625_v41 = vpop.f32.mrf.mxu1  ;;  %v2139_v30 = vor.u32 %v2138_v23, %v2135_v39 }
 0x111   : > { %v1162_v44 = vadd.f32 %v1118_v40, %v915_v34  ;;  %v668_v54 = vadd.f32 %v625_v41, %v4016_v7 }
 0x112   : > { %v1431_v37 = vpop.f32.mrf.mxu0  ;;  %v2140_v14 = vsel %vm2069_vm4, %v2130_v49, %v2139_v30 }
 0x113   : > { %v4115_v47 = vadd.f32 %v1429_v24, %v1162_v44  ;;  %v2008_v24 = vld [vmem:[%s3723_s11 + $0x48] sm:$0x7] }
 0x114   : > { %v2059_v60 = vunpack.c.l.b16 %v2008_v24 }
 0x116   : > { %v873_v57 = vpop.f32.mrf.mxu2 }
 0x117   : > { %v916_v58 = vadd.f32 %v873_v57, %v668_v54  ;;  %v2068_v54 = vpack.c.b16 %v2059_v60, %v2059_v60  ;;  %v2319_v57 = vld [vmem:[%s3723_s11 + $0x48] sm:$0x7] }
 0x118   : > { %v1120_v61 = vpop.f32.mrf.mxu3  ;;  %v628_v62 = vpop.f32.mrf.mxu1 }
 0x119   : > { %v1163_v2 = vadd.f32 %v1120_v61, %v916_v58  ;;  %v669_v5 = vadd.f32 %v628_v62, %v4033_v25  ;;  %v1588_v25 = vrot.slane %v4127_v17, 2  ;;  %v1564_v61 = vunpack.c.l.b16 %v1513_v56 }
 0x11a   : > { %v1434_v3 = vpop.f32.mrf.mxu0  ;;  %v2142_v62 = vshrl.u32 %v2068_v54, 16 }
 0x11b   : > { %1681 = vmatmul.bf16.gmra.mxu1 %v1587_v9  ;;  %1928 = vmatmul.bf16.gmra.mxu2 %v1834_v1  ;;  %v4123_v7 = vadd.f32 %v1431_v37, %v1163_v2  ;;  %v1589_v36 = vsel %vm1574_vm3, %v1586_v48, %v1588_v25  ;;  %v2145_v9 = vshll.u32 %v2068_v54, 16  ;;  %v2370_v1 = vunpack.c.l.b16 %v2319_v57 }
 0x11c   : > { %v2144_v6 = vrot.slane %v2142_v62, 2 }
 0x11d   : > { %2239 = vmatmul.bf16.gmra.mxu3 %v2131_v4  ;;  %2487 = vmatmul.bf16.gmra.mxu0 %v2393_v63  ;;  %v1573_v4 = vpack.c.b16 %v1564_v61, %v1564_v61  ;;  %v2147_v35 = vrot.slane %v2145_v9, 3 }
 0x11e   : > { %v876_v43 = vpop.f32.mrf.mxu2 }
 0x11f   : > { %v917_v11 = vadd.f32 %v876_v43, %v669_v5  ;;  %v2379_v43 = vpack.c.b16 %v2370_v1, %v2370_v1  ;;  %v2148_v17 = vor.u32 %v2147_v35, %v2144_v6 }
 0x120   : > { %v1123_v16 = vpop.f32.mrf.mxu3  ;;  %v630_v12 = vpop.f32.mrf.mxu1 }
 0x121   : > { %v1164_v19 = vadd.f32 %v1123_v16, %v917_v11  ;;  %v670_v21 = vadd.f32 %v630_v12, %v4046_v51  ;;  %v1761_v51 = vld [vmem:[%s3723_s11 + $0x48] sm:$0x3]  ;;  %v1590_v16 = vrot.slane %v1573_v4, 2  ;;  %v2396_v13 = vrot.slane %v2379_v43, 3  ;;  %s2717_s11 = sshll.u32 %s3690_s16, 4 }
 0x122   : > { %v1436_v20 = vpop.f32.mrf.mxu0  ;;  %v1812_v48 = vunpack.c.l.b16 %v1761_v51  ;;  %p194_p4 = scmp.lt.s32.totalorder %s2717_s11, 31 }
 0x123   : > { %v4134_v26 = vadd.f32 %v1434_v3, %v1164_v19  ;;  %v1591_v29 = vsel %vm1574_vm3, %v1588_v25, %v1590_v16 }
 0x124   : > { %v1821_v63 = vpack.c.b16 %v1812_v48, %v1812_v48  ;;  %s4245_s11 = smov (!%p194_p4, %s2717_s11), 31 }
 0x125   : > { %s2718_s16 = sshll.u32 %s4245_s11, 2 }
 0x126   : > { %v878_v33 = vpop.f32.mrf.mxu2  ;;  %v1837_v12 = vrot.slane %v1821_v63, 2  ;;  %s4185_s7 = scalar_lea.vmem %s4243_s4, %s2718_s16 }
 0x127   : > { %v918_v34 = vadd.f32 %v878_v33, %v670_v21  ;;  %v2149_v33 = vsel %vm2069_vm4, %v2139_v30, %v2148_v17 }
 0x128   : > { %v1125_v40 = vpop.f32.mrf.mxu3  ;;  %v633_v41 = vpop.f32.mrf.mxu1  ;;  %v1838_v24 = vsel %vm1574_vm3, %v1835_v27, %v1837_v12 }
 0x129   : > { %v1165_v44 = vadd.f32 %v1125_v40, %v918_v34  ;;  %v671_v50 = vadd.f32 %v633_v41, %v4008_v55  ;;  %v2397_v34 = vsel %vm2380_vm5, %v2394_v31, %v2396_v13 }
 0x12a   : > { %v1439_v37 = vpop.f32.mrf.mxu0 }
 0x12b   : > { %1686 = vmatmul.bf16.gmra.mxu1 %v1589_v36  ;;  %1933 = vmatmul.bf16.gmra.mxu2 %v1836_v42  ;;  %v4146_v58 = vadd.f32 %v1436_v20, %v1165_v44 }
 0x12d   : > { %2244 = vmatmul.bf16.gmra.mxu3 %v2140_v14  ;;  %2492 = vmatmul.bf16.gmra.mxu0 %v2395_v46 }
 0x12e   : > { %v881_v49 = vpop.f32.mrf.mxu2 }
 0x12f   : > { %v919_v2 = vadd.f32 %v881_v49, %v671_v50 }
 0x130   : > { %v1128_v45 = vpop.f32.mrf.mxu3  ;;  %v635_v3 = vpop.f32.mrf.mxu1 }
 0x131   : > { %v1166_v0 = vadd.f32 %v1128_v45, %v919_v2  ;;  %v672_v55 = vadd.f32 %v635_v3, %v4018_v8 }
 0x132   : > { %v1441_v5 = vpop.f32.mrf.mxu0 }
 0x133   : > { %v4149_v11 = vadd.f32 %v1439_v37, %v1166_v0  ;;  %v4176_v0 = vld [vmem:[%s4242_s3] ss:$0 sm:$0xff] }
 0x136   : > { %v883_v19 = vpop.f32.mrf.mxu2 }
 0x137   : > { %v920_v20 = vadd.f32 %v883_v19, %v672_v55 }
 0x138   : > { %v1130_v39 = vpop.f32.mrf.mxu3  ;;  %v638_v23 = vpop.f32.mrf.mxu1 }
 0x139   : > { %v1167_v21 = vadd.f32 %v1130_v39, %v920_v20  ;;  %v673_v8 = vadd.f32 %v638_v23, %v4037_v28 }
 0x13a   : > { %v1444_v60 = vpop.f32.mrf.mxu0 }
 0x13b   : > { %1691 = vmatmul.bf16.gmra.mxu1 %v1591_v29  ;;  %1938 = vmatmul.bf16.gmra.mxu2 %v1838_v24  ;;  %v4156_v40 = vadd.f32 %v1441_v5, %v1167_v21 }
 0x13d   : > { %2249 = vmatmul.bf16.gmra.mxu3 %v2149_v33  ;;  %2497 = vmatmul.bf16.gmra.mxu0 %v2397_v34 }
 0x13e   : > { %v886_v41 = vpop.f32.mrf.mxu2 }
 0x13f   : > { %v921_v36 = vadd.f32 %v886_v41, %v673_v8 }
 0x140   : > { %v1133_v42 = vpop.f32.mrf.mxu3  ;;  %v640_v25 = vpop.f32.mrf.mxu1 }
 0x141   : > { %v1168_v44 = vadd.f32 %v1133_v42, %v921_v36  ;;  %v674_v30 = vadd.f32 %v640_v25, %v4048_v52  ;;  %v4169_v52 = vld [vmem:[%s4241_s2] ss:$0 sm:$0xff] }
 0x142   : > { %v1446_v27 = vpop.f32.mrf.mxu0 }
 0x143   : > { %v4159_v37 = vadd.f32 %v1444_v60, %v1168_v44 }
 0x146   : > { %v888_v31 = vpop.f32.mrf.mxu2 }
 0x147   : > { %v922_v14 = vadd.f32 %v888_v31, %v674_v30 }
 0x148   : > { %v1135_v46 = vpop.f32.mrf.mxu3  ;;  %v1657_v56 = vpop.f32.mrf.mxu1 }
 0x149   : > { %v1169_v51 = vadd.f32 %v1135_v46, %v922_v14  ;;  %v1713_v28 = vadd.f32 %v1657_v56, %v4060_v18 }
 0x14a   : > { %v2463_v54 = vpop.f32.mrf.mxu0 }
 0x14b   : > { %v4162_v57 = vadd.f32 %v1446_v27, %v1169_v51 }
 0x14e   : > { %v1904_v61 = vpop.f32.mrf.mxu2 }
 0x14f   : > { %v1960_v48 = vadd.f32 %v1904_v61, %v1713_v28 }
 0x150   : > { %v2215_v50 = vpop.f32.mrf.mxu3  ;;  %v1659_v62 = vpop.f32.mrf.mxu1 }
 0x151   : > { %v2271_v9 = vadd.f32 %v2215_v50, %v1960_v48  ;;  %v1714_v2 = vadd.f32 %v1659_v62, %v4068_v38 }
 0x152   : > { %v2465_v1 = vpop.f32.mrf.mxu0 }
 0x153   : > { %v2519_v49 = vadd.f32 %v2463_v54, %v2271_v9 }
 0x155   : > { %v2571_v63 = vmul.f32 %v4169_v52, %v2519_v49 }
 0x156   : > { %v1906_v45 = vpop.f32.mrf.mxu2 }
 0x157   : > { %v1961_v3 = vadd.f32 %v1906_v45, %v1714_v2  ;;  %v2591_v43 = vadd.f32 %v4176_v0, %v2571_v63 }
 0x158   : > { %v2217_v4 = vpop.f32.mrf.mxu3  ;;  %v1662_v18 = vpop.f32.mrf.mxu1 }
 0x159   : > { %v2272_v5 = vadd.f32 %v2217_v4, %v1961_v3  ;;  %v1715_v16 = vadd.f32 %v1662_v18, %v4074_v59  ;;  %v2607_v20 = vmax.f32 %v2591_v43, 0.0 }
 0x15a   : > { %v2468_v6 = vpop.f32.mrf.mxu0 }
 0x15b   : > { %v2520_v35 = vadd.f32 %v2465_v1, %v2272_v5 }
 0x15d   : > { %v2572_v38 = vmul.f32 %v4169_v52, %v2520_v35 }
 0x15e   : > { %v1909_v12 = vpop.f32.mrf.mxu2 }
 0x15f   : > { %v2592_v55 = vadd.f32 %v4176_v0, %v2572_v38  ;;  %v1962_v17 = vadd.f32 %v1909_v12, %v1715_v16 }
 0x160   : > { %v2220_v13 = vpop.f32.mrf.mxu3  ;;  %v1664_v19 = vpop.f32.mrf.mxu1 }
 0x161   : > { %v2608_v39 = vmax.f32 %v2592_v55, 0.0  ;;  %v2273_v23 = vadd.f32 %v2220_v13, %v1962_v17  ;;  %v1716_v21 = vadd.f32 %v1664_v19, %v4082_v15 }
 0x162   : > { %v2470_v29 = vpop.f32.mrf.mxu0 }
 0x163   : > { %v3572_v24 = vpack.c.bf16 %v2608_v39, %v2607_v20  ;;  %v2521_v59 = vadd.f32 %v2468_v6, %v2273_v23 }
 0x165   : > { %3573 = vst [vmem:[%s4185_s7] sm:$0xff] %v3572_v24   ;;  %v2573_v41 = vmul.f32 %v4169_v52, %v2521_v59 }
 0x166   : > { %v1911_v60 = vpop.f32.mrf.mxu2 }
 0x167   : > { %v1963_v33 = vadd.f32 %v1911_v60, %v1716_v21  ;;  %v2593_v44 = vadd.f32 %v4176_v0, %v2573_v41 }
 0x168   : > { %v2222_v34 = vpop.f32.mrf.mxu3  ;;  %v1667_v8 = vpop.f32.mrf.mxu1 }
 0x169   : > { %v2274_v36 = vadd.f32 %v2222_v34, %v1963_v33  ;;  %v1717_v30 = vadd.f32 %v1667_v8, %v4088_v32  ;;  %v2609_v51 = vmax.f32 %v2593_v44, 0.0 }
 0x16a   : > { %v2473_v42 = vpop.f32.mrf.mxu0 }
 0x16b   : > { %v2522_v25 = vadd.f32 %v2470_v29, %v2274_v36 }
 0x16d   : > { %v2574_v27 = vmul.f32 %v4169_v52, %v2522_v25 }
 0x16e   : > { %v1914_v31 = vpop.f32.mrf.mxu2 }
 0x16f   : > { %v2594_v14 = vadd.f32 %v4176_v0, %v2574_v27  ;;  %v1964_v15 = vadd.f32 %v1914_v31, %v1717_v30 }
 0x170   : > { %v2225_v46 = vpop.f32.mrf.mxu3  ;;  %v1669_v56 = vpop.f32.mrf.mxu1 }
 0x171   : > { %v2610_v54 = vmax.f32 %v2594_v14, 0.0  ;;  %v2275_v28 = vadd.f32 %v2225_v46, %v1964_v15  ;;  %v1718_v62 = vadd.f32 %v1669_v56, %v4096_v53 }
 0x172   : > { %v2475_v61 = vpop.f32.mrf.mxu0 }
 0x173   : > { %v3577_v48 = vpack.c.bf16 %v2610_v54, %v2609_v51  ;;  %v2523_v50 = vadd.f32 %v2473_v42, %v2275_v28 }
 0x175   : > { %3609 = vst [vmem:[%s4185_s7 + $0x8] sm:$0xff] %v3577_v48   ;;  %v2575_v32 = vmul.f32 %v4169_v52, %v2523_v50 }
 0x176   : > { %v1916_v9 = vpop.f32.mrf.mxu2 }
 0x177   : > { %v1965_v1 = vadd.f32 %v1916_v9, %v1718_v62  ;;  %v2595_v18 = vadd.f32 %v4176_v0, %v2575_v32 }
 0x178   : > { %v2227_v49 = vpop.f32.mrf.mxu3  ;;  %v1672_v2 = vpop.f32.mrf.mxu1 }
 0x179   : > { %v2276_v45 = vadd.f32 %v2227_v49, %v1965_v1  ;;  %v1719_v5 = vadd.f32 %v1672_v2, %v4102_v10  ;;  %v2611_v16 = vmax.f32 %v2595_v18, 0.0 }
 0x17a   : > { %v2478_v3 = vpop.f32.mrf.mxu0 }
 0x17b   : > { %v2524_v4 = vadd.f32 %v2475_v61, %v2276_v45 }
 0x17d   : > { %v2576_v63 = vmul.f32 %v4169_v52, %v2524_v4 }
 0x17e   : > { %v1919_v6 = vpop.f32.mrf.mxu2 }
 0x17f   : > { %v2596_v35 = vadd.f32 %v4176_v0, %v2576_v63  ;;  %v1966_v53 = vadd.f32 %v1919_v6, %v1719_v5 }
 0x180   : > { %v2230_v43 = vpop.f32.mrf.mxu3  ;;  %v1674_v38 = vpop.f32.mrf.mxu1 }
 0x181   : > { %v2612_v12 = vmax.f32 %v2596_v35, 0.0  ;;  %v2277_v55 = vadd.f32 %v2230_v43, %v1966_v53  ;;  %v1720_v20 = vadd.f32 %v1674_v38, %v4109_v22 }
 0x182   : > { %v2480_v17 = vpop.f32.mrf.mxu0 }
 0x183   : > { %v3582_v13 = vpack.c.bf16 %v2612_v12, %v2611_v16  ;;  %v2525_v19 = vadd.f32 %v2478_v3, %v2277_v55 }
 0x185   : > { %3610 = vst [vmem:[%s4185_s7 + $0x10] sm:$0xff] %v3582_v13   ;;  %v2577_v10 = vmul.f32 %v4169_v52, %v2525_v19 }
 0x186   : > { %v1921_v39 = vpop.f32.mrf.mxu2 }
 0x187   : > { %v1967_v23 = vadd.f32 %v1921_v39, %v1720_v20  ;;  %v2597_v33 = vadd.f32 %v4176_v0, %v2577_v10 }
 0x188   : > { %v2232_v29 = vpop.f32.mrf.mxu3  ;;  %v1677_v24 = vpop.f32.mrf.mxu1 }
 0x189   : > { %v2278_v59 = vadd.f32 %v2232_v29, %v1967_v23  ;;  %v1721_v8 = vadd.f32 %v1677_v24, %v4115_v47  ;;  %v2613_v44 = vmax.f32 %v2597_v33, 0.0 }
 0x18a   : > { %v2483_v21 = vpop.f32.mrf.mxu0 }
 0x18b   : > { %v2526_v60 = vadd.f32 %v2480_v17, %v2278_v59 }
 0x18d   : > { %v2578_v34 = vmul.f32 %v4169_v52, %v2526_v60 }
 0x18e   : > { %v1924_v41 = vpop.f32.mrf.mxu2 }
 0x18f   : > { %v2598_v36 = vadd.f32 %v4176_v0, %v2578_v34  ;;  %v1968_v22 = vadd.f32 %v1924_v41, %v1721_v8 }
 0x190   : > { %v2235_v42 = vpop.f32.mrf.mxu3  ;;  %v1679_v25 = vpop.f32.mrf.mxu1 }
 0x191   : > { %v2614_v27 = vmax.f32 %v2598_v36, 0.0  ;;  %v2279_v30 = vadd.f32 %v2235_v42, %v1968_v22  ;;  %v1722_v46 = vadd.f32 %v1679_v25, %v4123_v7 }
 0x192   : > { %v2485_v31 = vpop.f32.mrf.mxu0 }
 0x193   : > { %v3587_v14 = vpack.c.bf16 %v2614_v27, %v2613_v44  ;;  %v2527_v15 = vadd.f32 %v2483_v21, %v2279_v30 }
 0x195   : > { %3611 = vst [vmem:[%s4185_s7 + $0x18] sm:$0xff] %v3587_v14   ;;  %v2579_v47 = vmul.f32 %v4169_v52, %v2527_v15 }
 0x196   : > { %v1926_v56 = vpop.f32.mrf.mxu2 }
 0x197   : > { %v1969_v51 = vadd.f32 %v1926_v56, %v1722_v46  ;;  %v2599_v62 = vadd.f32 %v4176_v0, %v2579_v47 }
 0x198   : > { %v2237_v54 = vpop.f32.mrf.mxu3  ;;  %v1682_v28 = vpop.f32.mrf.mxu1 }
 0x199   : > { %v2280_v61 = vadd.f32 %v2237_v54, %v1969_v51  ;;  %v1723_v1 = vadd.f32 %v1682_v28, %v4134_v26  ;;  %v2615_v3 = vmax.f32 %v2599_v62, 0.0 }
 0x19a   : > { %v2488_v48 = vpop.f32.mrf.mxu0 }
 0x19b   : > { %v2528_v50 = vadd.f32 %v2485_v31, %v2280_v61 }
 0x19d   : > { %v2580_v9 = vmul.f32 %v4169_v52, %v2528_v50 }
 0x19e   : > { %v1929_v49 = vpop.f32.mrf.mxu2 }
 0x19f   : > { %v2600_v2 = vadd.f32 %v4176_v0, %v2580_v9  ;;  %v1970_v7 = vadd.f32 %v1929_v49, %v1723_v1 }
 0x1a0   : > { %v2240_v32 = vpop.f32.mrf.mxu3  ;;  %v1684_v45 = vpop.f32.mrf.mxu1 }
 0x1a1   : > { %v2616_v4 = vmax.f32 %v2600_v2, 0.0  ;;  %v2281_v18 = vadd.f32 %v2240_v32, %v1970_v7  ;;  %v1724_v35 = vadd.f32 %v1684_v45, %v4146_v58 }
 0x1a2   : > { %v2490_v63 = vpop.f32.mrf.mxu0 }
 0x1a3   : > { %v3592_v5 = vpack.c.bf16 %v2616_v4, %v2615_v3  ;;  %v2529_v6 = vadd.f32 %v2488_v48, %v2281_v18 }
 0x1a5   : > { %3612 = vst [vmem:[%s4185_s7 + $0x20] sm:$0xff] %v3592_v5   ;;  %v2581_v26 = vmul.f32 %v4169_v52, %v2529_v6 }
 0x1a6   : > { %v1931_v53 = vpop.f32.mrf.mxu2 }
 0x1a7   : > { %v1971_v43 = vadd.f32 %v1931_v53, %v1724_v35  ;;  %v2601_v13 = vadd.f32 %v4176_v0, %v2581_v26 }
 0x1a8   : > { %v2242_v38 = vpop.f32.mrf.mxu3  ;;  %v1687_v16 = vpop.f32.mrf.mxu1 }
 0x1a9   : > { %v2282_v12 = vadd.f32 %v2242_v38, %v1971_v43  ;;  %v1725_v20 = vadd.f32 %v1687_v16, %v4149_v11  ;;  %v2617_v10 = vmax.f32 %v2601_v13, 0.0 }
 0x1aa   : > { %v2493_v17 = vpop.f32.mrf.mxu0 }
 0x1ab   : > { %v2530_v55 = vadd.f32 %v2490_v63, %v2282_v12 }
 0x1ad   : > { %v2582_v19 = vmul.f32 %v4169_v52, %v2530_v55 }
 0x1ae   : > { %v1934_v39 = vpop.f32.mrf.mxu2 }
 0x1af   : > { %v2602_v23 = vadd.f32 %v4176_v0, %v2582_v19  ;;  %v1972_v58 = vadd.f32 %v1934_v39, %v1725_v20 }
 0x1b0   : > { %v2245_v29 = vpop.f32.mrf.mxu3  ;;  %v1689_v24 = vpop.f32.mrf.mxu1 }
 0x1b1   : > { %v2618_v59 = vmax.f32 %v2602_v23, 0.0  ;;  %v2283_v21 = vadd.f32 %v2245_v29, %v1972_v58  ;;  %v1726_v34 = vadd.f32 %v1689_v24, %v4156_v40 }
 0x1b2   : > { %v2495_v8 = vpop.f32.mrf.mxu0 }
 0x1b3   : > { %v3597_v60 = vpack.c.bf16 %v2618_v59, %v2617_v10  ;;  %v2531_v33 = vadd.f32 %v2493_v17, %v2283_v21 }
 0x1b5   : > { %3613 = vst [vmem:[%s4185_s7 + $0x28] sm:$0xff] %v3597_v60   ;;  %v2583_v11 = vmul.f32 %v4169_v52, %v2531_v33 }
 0x1b6   : > { %v1936_v41 = vpop.f32.mrf.mxu2 }
 0x1b7   : > { %v1973_v36 = vadd.f32 %v1936_v41, %v1726_v34  ;;  %v2603_v27 = vadd.f32 %v4176_v0, %v2583_v11 }
 0x1b8   : > { %v2247_v22 = vpop.f32.mrf.mxu3  ;;  %v1692_v42 = vpop.f32.mrf.mxu1 }
 0x1b9   : > { %v2284_v25 = vadd.f32 %v2247_v22, %v1973_v36  ;;  %v1727_v31 = vadd.f32 %v1692_v42, %v4159_v37  ;;  %v2619_v51 = vmax.f32 %v2603_v27, 0.0 }
 0x1ba   : > { %v2498_v56 = vpop.f32.mrf.mxu0 }
 0x1bb   : > { %v2532_v44 = vadd.f32 %v2495_v8, %v2284_v25 }
 0x1bd   : > { %v2584_v30 = vmul.f32 %v4169_v52, %v2532_v44 }
 0x1be   : > { %v1939_v14 = vpop.f32.mrf.mxu2 }
 0x1bf   : > { %v2604_v15 = vadd.f32 %v4176_v0, %v2584_v30  ;;  %v1974_v40 = vadd.f32 %v1939_v14, %v1727_v31 }
 0x1c0   : > { %v2250_v46 = vpop.f32.mrf.mxu3  ;;  %v1694_v47 = vpop.f32.mrf.mxu1 }
 0x1c1   : > { %v2620_v54 = vmax.f32 %v2604_v15, 0.0  ;;  %v2285_v28 = vadd.f32 %v2250_v46, %v1974_v40  ;;  %v1728_v50 = vadd.f32 %v1694_v47, %v4162_v57 }
 0x1c2   : > { %v2500_v2 = vpop.f32.mrf.mxu0 }
 0x1c3   : > { %v3602_v61 = vpack.c.bf16 %v2620_v54, %v2619_v51  ;;  %v2533_v48 = vadd.f32 %v2498_v56, %v2285_v28 }
 0x1c5   : > { %3614 = vst [vmem:[%s4185_s7 + $0x30] sm:$0xff] %v3602_v61   ;;  %v2585_v37 = vmul.f32 %v4169_v52, %v2533_v48 }
 0x1c6   : > { %v1941_v62 = vpop.f32.mrf.mxu2 }
 0x1c7   : > { %v1975_v9 = vadd.f32 %v1941_v62, %v1728_v50  ;;  %v2605_v32 = vadd.f32 %v4176_v0, %v2585_v37 }
 0x1c8   : > { %v2252_v1 = vpop.f32.mrf.mxu3 }
 0x1c9   : > { %v2286_v49 = vadd.f32 %v2252_v1, %v1975_v9  ;;  %v2621_v4 = vmax.f32 %v2605_v32, 0.0 }
 0x1cb   : > { %v2534_v7 = vadd.f32 %v2500_v2, %v2286_v49 }
 0x1cd   : > { %v2586_v45 = vmul.f32 %v4169_v52, %v2534_v7 }
 0x1cf   : > { %v2606_v3 = vadd.f32 %v4176_v0, %v2586_v45 }
 0x1d1   : > { %v2622_v18 = vmax.f32 %v2606_v3, 0.0 }
 0x1d3   : > { %v3607_v63 = vpack.c.bf16 %v2622_v18, %v2621_v4 }
 0x1d5   : > { %3615 = vst [vmem:[%s4185_s7 + $0x38] sm:$0xff] %v3607_v63  }
 0x1d6 PF: > { %s14_s15 = sadd.s32 1, %s3657_s15  }
 0x1d7   : > { %p11_p5 = scmp.ge.s32.totalorder %s14_s15, 4  }
 0x1d9   :  { %13 = sbr.rel (!%p11_p5) target bundleno = 1 (0x1), region = 74 }

</bundles_post_ra>
